<compile_context>
chip_gen: v7x
topology: tpu7x:2x2x1
jax: 0.10.0
libtpu: 0.0.40
codegen_flags: <defaults>
</compile_context>

<pallas_src>
import functools
import math

import jax
import jax.numpy as jnp
import numpy as np
from jax.experimental import pallas as pl
from jax.experimental.pallas import tpu as pltpu


def _round_up(v, m):
    return ((v + m - 1) // m) * m


# =============================================================================
# STConvBlock kernel: one block of `bblk` batch elements per grid step.
# =============================================================================
def _stconv_kernel(x_ref,      # (bblk, c1, Lin)    channel-padded input, NCHW-flat
                   w1_ref,     # (2*c1, kt*c1)      packed GLU temporal-conv weight
                   th_ref,     # (ks*c1, c1)        stacked Chebyshev theta
                   lbig_ref,   # (ks*Lp1, Lp1)      block-diagonal graph operator
                   w2_ref,     # (c2, kt*c1)        packed temporal-conv-2 weight
                   bias_ref,   # (c1, 4)            cols = [b1a | b1b | b_spatial | b2]
                   gb_ref,     # (2*c2, L2)         rows = [gamma_T ; beta_T]
                   gavg_ref,   # (L2, L2)           LayerNorm group-average matrix
                   o_ref,      # (bblk, c2, L2)     output, NCHW-flat
                   *, kt, ks, N, c1, c2, bblk, L2, Lp1, approx_recip):
    f32 = jnp.float32
    mxu_dt = x_ref.dtype                        # MXU operand dtype (f32 or bf16)

    def sigmoid(v):                             # exact divide in f32 path, EUP recip in bf16
        e = jnp.exp(-v)
        return pl.reciprocal(1.0 + e, approx=True) if approx_recip else 1.0 / (1.0 + e)

    # Packed per-channel bias columns (always f32).
    b1 = jnp.concatenate([bias_ref[:, 0:1], bias_ref[:, 1:2]], axis=0)    # (2*c1, 1)
    bs = bias_ref[:, 2:3]                                                 # (c1, 1)
    b2 = bias_ref[:, 3:4]                                                 # (c2, 1)

    # ---------------- TemporalConv #1 (GLU): single im2col matmul ----------------
    # a1[k*c1 + i, b*Lp1 + t*N + n] = x[b, i, (t+k)*N + n]; each batch segment is
    # padded to Lp1 (multiple of 128) lanes so cross-batch seams are tile-aligned.
    a1 = jnp.concatenate(
        [jnp.concatenate([x_ref[b, :, k * N:k * N + Lp1] for b in range(bblk)], axis=1)
         for k in range(kt)], axis=0)                                     # (kt*c1, bblk*Lp1)
    xc = jnp.dot(w1_ref[...], a1, preferred_element_type=f32) + b1        # (2*c1, bblk*Lp1)
    x_in = a1[(kt - 1) * c1:, :].astype(f32)        # Align residual == last im2col tap
    x_t1 = (xc[:c1, :] + x_in) * sigmoid(xc[c1:, :])                      # (c1, bblk*Lp1)

    # ---------------- SpatialConv (Chebyshev): two matmuls -----------------------
    z = jnp.dot(th_ref[...], x_t1.astype(mxu_dt), preferred_element_type=f32)
    # z_stack[b*c1 + o, k*Lp1 + p] = z[k*c1 + o, b*Lp1 + p]   (all seams 128-aligned)
    z_stack = jnp.concatenate(
        [jnp.concatenate([z[k * c1:(k + 1) * c1, b * Lp1:(b + 1) * Lp1]
                          for k in range(ks)], axis=1)
         for b in range(bblk)], axis=0)                                   # (bblk*c1, ks*Lp1)
    y = jnp.dot(z_stack.astype(mxu_dt), lbig_ref[...],
                preferred_element_type=f32)                               # (bblk*c1, Lp1)
    x_gc = jnp.concatenate([y[b * c1:(b + 1) * c1, :] for b in range(bblk)], axis=1)
    x_s = jnp.maximum(x_gc + bs + x_t1, 0.0)                              # (c1, bblk*Lp1)

    # ---------------- TemporalConv #2 (ReLU): single im2col matmul ---------------
    x_s_m = x_s.astype(mxu_dt)                   # single down-cast before the im2col build
    a2 = jnp.concatenate(
        [jnp.concatenate([x_s_m[:, b * Lp1 + k * N: b * Lp1 + k * N + L2]
                          for b in range(bblk)], axis=1)
         for k in range(kt)], axis=0)                                     # (kt*c1, bblk*L2)
    xc2 = jnp.dot(w2_ref[...], a2, preferred_element_type=f32) + b2       # (c2, bblk*L2)
    x_in2 = a2[(kt - 1) * c1:, :].astype(f32)       # Align identity residual (c1 == c2)
    x_t2 = jnp.maximum(xc2 + x_in2, 0.0)                                  # (c2, bblk*L2)

    # ---------------- LayerNorm over (N, c2) per (batch, time) -------------------
    # One (2*bblk, L2) @ (L2, L2) matmul produces all per-group means / E[x^2].
    # (One-pass variance E[x^2]-mean^2; fine in f32 at these magnitudes.)
    s1 = jnp.sum(x_t2, axis=0, keepdims=True)                             # (1, bblk*L2)
    s2 = jnp.sum(x_t2 * x_t2, axis=0, keepdims=True)
    stats_in = jnp.concatenate(
        [s1[:, b * L2:(b + 1) * L2] for b in range(bblk)]
        + [s2[:, b * L2:(b + 1) * L2] for b in range(bblk)], axis=0)      # (2*bblk, L2)
    stats = jnp.dot(stats_in.astype(mxu_dt), gavg_ref[...],
                    preferred_element_type=f32)                           # (2*bblk, L2)
    gamma = gb_ref[:c2, :]
    beta = gb_ref[c2:, :]
    for b in range(bblk):
        mean = stats[b:b + 1, :]
        inv = jax.lax.rsqrt(stats[bblk + b:bblk + b + 1, :] - mean * mean + 1e-5)
        xb = x_t2[:, b * L2:(b + 1) * L2]
        o_ref[b, :, :] = ((xb - mean) * inv * gamma + beta).astype(o_ref.dtype)
    # dropout: identity (inference / eval mode)


def pack_stconv_params(Lk, prm, *, kt, ks, c, N, T, mxu_dtype=jnp.float32):
    """One-time host-side (numpy) packing of every constant for one STConvBlock."""
    c0, c1, c2 = c
    assert c1 == c2, "kernel assumes c_mid == c_out (Align identity in tconv2)"
    if c0 > c1:
        # TODO(synk): Align 1x1-conv branch (c_in > c_out) not implemented.
        raise NotImplementedError("Align conv1x1 branch (c_in > c_out) not implemented")
    T1 = T - kt + 1
    T2 = T1 - kt + 1
    L1, L2 = T1 * N, T2 * N
    Lp1 = _round_up(L1, 128)            # 128-aligned per-batch lane segment
    Lin = (kt - 1) * N + Lp1            # padded input width so every tap slice is in range

    w1 = np.asarray(prm["w1"], np.float32)          # (2*c1, c0, kt)
    w2 = np.asarray(prm["w2"], np.float32)          # (c2, c1, kt)
    th = np.asarray(prm["theta"], np.float32)       # (c1, c1, ks)
    Lk_np = np.asarray(Lk, np.float32)              # (ks, N, N)

    # im2col weights: W[o, k*c1 + i] = w[o, i, k]; tconv1 zero-extended over padded channels.
    w1p = np.zeros((2 * c1, kt, c1), np.float32)
    w1p[:, :, :c0] = np.transpose(w1, (0, 2, 1))
    w1p = w1p.reshape(2 * c1, kt * c1)
    w2p = np.transpose(w2, (0, 2, 1)).reshape(c2, kt * c1)
    # Chebyshev thetas stacked on rows: Theta[k*c1 + o, i] = theta[i, o, k].
    thp = np.transpose(th, (2, 1, 0)).reshape(ks * c1, c1)
    # Block-diagonal graph operator, zero-extended to the padded lane width.
    lbig = np.zeros((ks * Lp1, Lp1), np.float32)
    eye_t1 = np.eye(T1, dtype=np.float32)
    for k in range(ks):
        lbig[k * Lp1:k * Lp1 + L1, :L1] = np.kron(eye_t1, Lk_np[k].T)
    # Packed biases: columns = [b1a | b1b | b_spatial | b2].
    b1 = np.asarray(prm["b1"], np.float32)
    bias = np.stack([b1[:c1], b1[c1:],
                     np.asarray(prm["b_sp"], np.float32).reshape(c1),
                     np.asarray(prm["b2"], np.float32)], axis=1)          # (c1, 4)
    # LayerNorm gamma/beta tiled to kernel layout (rows = channel, cols = t*N + n).
    gamma = np.asarray(prm["gamma"], np.float32)
    beta = np.asarray(prm["beta"], np.float32)
    gb = np.concatenate([np.tile(gamma.T, (1, T2)), np.tile(beta.T, (1, T2))], axis=0)
    # Group-average matrix (independent of the batch block): kron(I_T2, 1_NxN)/(N*c2).
    gavg = np.kron(np.eye(T2, dtype=np.float32), np.ones((N, N), np.float32)) / float(N * c2)

    return dict(
        w1p=jnp.asarray(w1p, mxu_dtype), thp=jnp.asarray(thp, mxu_dtype),
        lbig=jnp.asarray(lbig, mxu_dtype), w2p=jnp.asarray(w2p, mxu_dtype),
        bias=jnp.asarray(bias, jnp.float32), gb=jnp.asarray(gb, jnp.float32),
        gavg=jnp.asarray(gavg, mxu_dtype),   # 1/(N*c2) exactly representable in bf16
        meta=dict(kt=kt, ks=ks, c0=c0, c1=c1, c2=c2, N=N, T=T, T1=T1, T2=T2,
                  L1=L1, L2=L2, Lp1=Lp1, Lin=Lin, mxu_dtype=mxu_dtype),
    )


def stconv_block_apply(x, packed, *, block_batch=4):
    m = packed["meta"]
    kt, ks, N, T = m["kt"], m["ks"], m["N"], m["T"]
    c0, c1, c2 = m["c0"], m["c1"], m["c2"]
    T2, L2, Lp1, Lin = m["T2"], m["L2"], m["Lp1"], m["Lin"]
    mxu_dtype = m["mxu_dtype"]
    B = x.shape[0]
    assert x.shape == (B, c0, T, N), x.shape

    bblk = max(1, min(block_batch, B))
    while B % bblk:                      # fall back to the largest divisor of B
        bblk -= 1

    # Lane-dense NCHW-flat input; Align channel zero-pad folded in; per-batch lane
    # padding (zeros beyond T*N) keeps every kt-tap slice of width Lp1 in range.
    x_k = jnp.pad(x, ((0, 0), (0, c1 - c0), (0, 0), (0, 0))).reshape(B, c1, T * N)
    x_k = jnp.pad(x_k, ((0, 0), (0, 0), (0, Lin - T * N))).astype(mxu_dtype)

    kernel = functools.partial(_stconv_kernel, kt=kt, ks=ks, N=N, c1=c1, c2=c2,
                               bblk=bblk, L2=L2, Lp1=Lp1,
                               approx_recip=(mxu_dtype == jnp.bfloat16))

    itemsize = np.dtype(mxu_dtype).itemsize
    const_bytes = sum(int(np.prod(packed[k].shape)) * packed[k].dtype.itemsize
                      for k in ("w1p", "thp", "lbig", "w2p", "bias", "gb", "gavg"))
    cost = pl.CostEstimate(
        flops=2 * B * ((2 * c1) * (kt * c1) * Lp1 + (ks * c1) * c1 * Lp1
                       + c1 * (ks * Lp1) * Lp1 + c2 * (kt * c1) * L2)
              + 2 * (B // bblk) * (2 * bblk) * L2 * L2,
        transcendentals=B * c1 * Lp1,
        bytes_accessed=int(const_bytes + B * c1 * Lin * itemsize + B * c2 * L2 * 4))

    out = pl.pallas_call(
        kernel,
        out_shape=jax.ShapeDtypeStruct((B, c2, L2), jnp.float32),
        grid_spec=pltpu.PrefetchScalarGridSpec(
            num_scalar_prefetch=0,
            grid=(B // bblk,),
            in_specs=[
                pl.BlockSpec((bblk, c1, Lin), lambda g: (g, 0, 0)),        # x
                pl.BlockSpec((2 * c1, kt * c1), lambda g: (0, 0)),         # packed tconv1 W
                pl.BlockSpec((ks * c1, c1), lambda g: (0, 0)),             # stacked theta
                pl.BlockSpec((ks * Lp1, Lp1), lambda g: (0, 0)),           # block-diag graph op
                pl.BlockSpec((c2, kt * c1), lambda g: (0, 0)),             # packed tconv2 W
                pl.BlockSpec((c1, 4), lambda g: (0, 0)),                   # packed biases
                pl.BlockSpec((2 * c2, L2), lambda g: (0, 0)),              # gamma / beta
                pl.BlockSpec((L2, L2), lambda g: (0, 0)),                  # LN group-average
            ],
            out_specs=pl.BlockSpec((bblk, c2, L2), lambda g: (g, 0, 0)),
        ),
        compiler_params=pltpu.CompilerParams(dimension_semantics=("parallel",)),
        cost_estimate=cost,
    )(x_k, packed["w1p"], packed["thp"], packed["lbig"], packed["w2p"],
      packed["bias"], packed["gb"], packed["gavg"])

    return out.reshape(B, c2, T2, N)


# =============================================================================
# OutLayer kernel: GLU tconv over the full window -> LayerNorm -> 1x1 sigmoid tconv
# -> FullyConv.  One grid step; all B*N columns on lanes.
# =============================================================================
def _outlayer_kernel(x_ref,     # (Ko*c, B*N)   im2col'ed input, rows = (tap, channel)
                     w1_ref,    # (2*c, Ko*c)
                     w2_ref,    # (c, c)
                     wfc_ref,   # (1, c)
                     bias_ref,  # (c, 4)        cols = [b1a | b1b | b2 | (bfc in row 0)]
                     gb_ref,    # (2*c, B*N)    rows = [gamma_T ; beta_T]
                     gavg_ref,  # (B*N, B*N)    LayerNorm group-average matrix
                     o_ref,     # (1, B*N)
                     *, c, Ko, approx_recip):
    f32 = jnp.float32
    mxu_dt = x_ref.dtype

    def sigmoid(v):
        e = jnp.exp(-v)
        return pl.reciprocal(1.0 + e, approx=True) if approx_recip else 1.0 / (1.0 + e)

    b1 = jnp.concatenate([bias_ref[:, 0:1], bias_ref[:, 1:2]], axis=0)    # (2*c, 1)
    b2 = bias_ref[:, 2:3]                                                 # (c, 1)
    bfc = bias_ref[0:1, 3:4]                                              # (1, 1)

    xin = x_ref[...]
    # tconv1 (GLU over the whole remaining time window -> one output step)
    xc = jnp.dot(w1_ref[...], xin, preferred_element_type=f32) + b1       # (2*c, B*N)
    x_in = xin[(Ko - 1) * c:, :].astype(f32)       # residual = last im2col tap
    x_t1 = (xc[:c, :] + x_in) * sigmoid(xc[c:, :])                        # (c, B*N)

    # LayerNorm over (N, c) per batch: one (2, B*N) @ (B*N, B*N) stats matmul
    s1 = jnp.sum(x_t1, axis=0, keepdims=True)
    s2 = jnp.sum(x_t1 * x_t1, axis=0, keepdims=True)
    stats = jnp.dot(jnp.concatenate([s1, s2], axis=0).astype(mxu_dt), gavg_ref[...],
                    preferred_element_type=f32)                           # (2, B*N)
    mean = stats[0:1, :]
    inv = jax.lax.rsqrt(stats[1:2, :] - mean * mean + 1e-5)
    x_ln = (x_t1 - mean) * inv * gb_ref[:c, :] + gb_ref[c:, :]            # (c, B*N)

    # tconv2 (1x1, sigmoid) with Align identity residual
    xc2 = jnp.dot(w2_ref[...], x_ln.astype(mxu_dt), preferred_element_type=f32) + b2
    x_t2 = sigmoid(xc2 + x_ln)                                            # (c, B*N)

    # FullyConv: 1x1 conv down to one channel
    out = jnp.dot(wfc_ref[...], x_t2.astype(mxu_dt), preferred_element_type=f32) + bfc
    o_ref[...] = out.astype(o_ref.dtype)


def pack_outlayer_params(prm, *, c, Ko, N, B, mxu_dtype=jnp.float32):
    """One-time host-side packing of the OutLayer constants (numpy)."""
    w1 = np.asarray(prm["w1"], np.float32)          # (2c, c, Ko)
    w1p = np.transpose(w1, (0, 2, 1)).reshape(2 * c, Ko * c)
    w2 = np.asarray(prm["w2"], np.float32)          # (c, c)
    wfc = np.asarray(prm["wfc"], np.float32)        # (1, c)
    bias = np.zeros((c, 4), np.float32)
    b1 = np.asarray(prm["b1"], np.float32)
    bias[:, 0] = b1[:c]
    bias[:, 1] = b1[c:]
    bias[:, 2] = np.asarray(prm["b2"], np.float32)
    bias[0, 3] = float(np.asarray(prm["bfc"], np.float32)[0])
    gamma = np.asarray(prm["gamma"], np.float32)    # (N, c)
    beta = np.asarray(prm["beta"], np.float32)
    gb = np.concatenate([np.tile(gamma.T, (1, B)), np.tile(beta.T, (1, B))], axis=0)
    gavg = np.kron(np.eye(B, dtype=np.float32), np.ones((N, N), np.float32)) / float(N * c)
    return dict(
        w1p=jnp.asarray(w1p, mxu_dtype), w2=jnp.asarray(w2, mxu_dtype),
        wfc=jnp.asarray(wfc, mxu_dtype), bias=jnp.asarray(bias, jnp.float32),
        gb=jnp.asarray(gb, jnp.float32), gavg=jnp.asarray(gavg, mxu_dtype),
        meta=dict(c=c, Ko=Ko, N=N, B=B, mxu_dtype=mxu_dtype))


def outlayer_apply(x, packed):
    m = packed["meta"]
    c, Ko, N, B = m["c"], m["Ko"], m["N"], m["B"]
    mxu_dtype = m["mxu_dtype"]
    assert x.shape == (B, c, Ko, N), x.shape
    # Lane-dense layout: rows = (tap, channel), columns = (batch, node).
    xin = jnp.transpose(x, (2, 1, 0, 3)).reshape(Ko * c, B * N).astype(mxu_dtype)
    kernel = functools.partial(_outlayer_kernel, c=c, Ko=Ko,
                               approx_recip=(mxu_dtype == jnp.bfloat16))
    const_bytes = sum(int(np.prod(packed[k].shape)) * packed[k].dtype.itemsize
                      for k in ("w1p", "w2", "wfc", "bias", "gb", "gavg"))
    cost = pl.CostEstimate(
        flops=2 * B * N * ((2 * c) * (Ko * c) + 2 * c * c + c) + 2 * 2 * (B * N) * (B * N),
        transcendentals=2 * c * B * N,
        bytes_accessed=int(const_bytes + Ko * c * B * N * np.dtype(mxu_dtype).itemsize
                           + B * N * 4))
    out = pl.pallas_call(
        kernel,
        out_shape=jax.ShapeDtypeStruct((1, B * N), jnp.float32),
        grid_spec=pltpu.PrefetchScalarGridSpec(
            num_scalar_prefetch=0,
            grid=(1,),
            in_specs=[
                pl.BlockSpec((Ko * c, B * N), lambda g: (0, 0)),
                pl.BlockSpec((2 * c, Ko * c), lambda g: (0, 0)),
                pl.BlockSpec((c, c), lambda g: (0, 0)),
                pl.BlockSpec((1, c), lambda g: (0, 0)),
                pl.BlockSpec((c, 4), lambda g: (0, 0)),
                pl.BlockSpec((2 * c, B * N), lambda g: (0, 0)),
                pl.BlockSpec((B * N, B * N), lambda g: (0, 0)),
            ],
            out_specs=pl.BlockSpec((1, B * N), lambda g: (0, 0)),
        ),
        compiler_params=pltpu.CompilerParams(dimension_semantics=("arbitrary",)),
        cost_estimate=cost,
    )(xin, packed["w1p"], packed["w2"], packed["wfc"], packed["bias"],
      packed["gb"], packed["gavg"])
    return out.reshape(B, N)[:, None, None, :]              # [B, 1, 1, N]


# =============================================================================
# Full STGCN forward (packing hoisted out of the per-forward path).
# =============================================================================
def _default_block_batch(B):
    # v5e / v6e: single TensorCore per chip -> fold the whole batch (grid == 1).
    # v7x / v4 / v5p (2 TCs) and anything unknown: keep grid >= 2 so both cores get work.
    try:
        kind = jax.devices()[0].device_kind.lower()
    except Exception:
        kind = ""
    if any(tag in kind for tag in ("v5 lite", "v5e", "v5litepod", "v6 lite", "v6e", "trillium")):
        return B
    return max(1, min(4, B))


def make_stgcn_forward(Lk, prm1, prm2, prmo, *, ks, kt, bs, N, T, B,
                       mxu_dtype=jnp.float32, block_batch=None):
    T_blk2 = T - 2 * (kt - 1)
    Ko = T - 4 * (kt - 1)
    p1 = pack_stconv_params(Lk, prm1, kt=kt, ks=ks, c=bs[0], N=N, T=T, mxu_dtype=mxu_dtype)
    p2 = pack_stconv_params(Lk, prm2, kt=kt, ks=ks, c=bs[1], N=N, T=T_blk2, mxu_dtype=mxu_dtype)
    po = pack_outlayer_params(prmo, c=bs[1][2], Ko=Ko, N=N, B=B, mxu_dtype=mxu_dtype)
    if block_batch is None:
        block_batch = _default_block_batch(B)

    def forward(x):
        h = stconv_block_apply(x, p1, block_batch=block_batch)
        h = stconv_block_apply(h, p2, block_batch=block_batch)
        return outlayer_apply(h, po)

    return jax.jit(forward)


# =============================================================================
# Pure-JAX reference (mirrors the PyTorch forward, full precision).
# =============================================================================
def stconv_reference(x, Lk, prm, *, kt, c):
    hp = jax.lax.Precision.HIGHEST
    c0, c1, c2 = c
    w1, b1, theta, b_sp = prm["w1"], prm["b1"], prm["theta"], prm["b_sp"]
    w2, b2, gamma, beta = prm["w2"], prm["b2"], prm["gamma"], prm["beta"]
    B, _, T, N = x.shape
    T1 = T - kt + 1
    T2 = T1 - kt + 1
    x_align = jnp.pad(x, ((0, 0), (0, c1 - c0), (0, 0), (0, 0)))
    x_in = x_align[:, :, kt - 1:, :]
    xc = jnp.zeros((B, 2 * c1, T1, N), jnp.float32)
    for k in range(kt):
        xc = xc + jnp.einsum('oi,bitn->botn', w1[:, :, k], x[:, :, k:k + T1, :], precision=hp)
    xc = xc + b1[None, :, None, None]
    x_t1 = (xc[:, :c1] + x_in) * jax.nn.sigmoid(xc[:, c1:])
    x_c = jnp.einsum('knm,bitm->bitkn', Lk, x_t1, precision=hp)
    x_gc = jnp.einsum('iok,bitkn->botn', theta, x_c, precision=hp) + b_sp
    x_s = jax.nn.relu(x_gc + x_t1)
    x_in2 = x_s[:, :, kt - 1:, :]
    xc2 = jnp.zeros((B, c2, T2, N), jnp.float32)
    for k in range(kt):
        xc2 = xc2 + jnp.einsum('oi,bitn->botn', w2[:, :, k], x_s[:, :, k:k + T2, :], precision=hp)
    xc2 = xc2 + b2[None, :, None, None]
    x_t2 = jax.nn.relu(xc2 + x_in2)
    y = jnp.transpose(x_t2, (0, 2, 3, 1))
    mu = jnp.mean(y, axis=(2, 3), keepdims=True)
    var = jnp.mean((y - mu) ** 2, axis=(2, 3), keepdims=True)
    y = (y - mu) / jnp.sqrt(var + 1e-5) * gamma + beta
    return jnp.transpose(y, (0, 3, 1, 2))


def outlayer_reference(x, prm):
    hp = jax.lax.Precision.HIGHEST
    B, c, Ko, N = x.shape
    w1, b1 = prm["w1"], prm["b1"]
    gamma, beta = prm["gamma"], prm["beta"]
    w2, b2, wfc, bfc = prm["w2"], prm["b2"], prm["wfc"], prm["bfc"]
    x_in = x[:, :, Ko - 1:, :]
    xc = jnp.zeros((B, 2 * c, 1, N), jnp.float32)
    for k in range(Ko):
        xc = xc + jnp.einsum('oi,bin->bon', w1[:, :, k], x[:, :, k, :],
                             precision=hp)[:, :, None, :]
    xc = xc + b1[None, :, None, None]
    x_t1 = (xc[:, :c] + x_in) * jax.nn.sigmoid(xc[:, c:])
    y = jnp.transpose(x_t1, (0, 2, 3, 1))
    mu = jnp.mean(y, axis=(2, 3), keepdims=True)
    var = jnp.mean((y - mu) ** 2, axis=(2, 3), keepdims=True)
    y = (y - mu) / jnp.sqrt(var + 1e-5) * gamma + beta
    x_ln = jnp.transpose(y, (0, 3, 1, 2))
    xc2 = jnp.einsum('oi,bitn->botn', w2, x_ln, precision=hp) + b2[None, :, None, None]
    x_t2 = jax.nn.sigmoid(xc2 + x_ln)
    return jnp.einsum('oi,bitn->botn', wfc, x_t2, precision=hp) + bfc[None, :, None, None]


def stgcn_reference(x, Lk, prm1, prm2, prmo, *, kt, cfg1, cfg2):
    h = stconv_reference(x, Lk, prm1, kt=kt, c=cfg1)
    h = stconv_reference(h, Lk, prm2, kt=kt, c=cfg2)
    return outlayer_reference(h, prmo)


# =============================================================================
# Parameter initialization (deterministic, PyTorch-like uniform bounds).
# =============================================================================
def _uniform(key, shape, fan_in):
    bound = 1.0 / math.sqrt(fan_in)
    return jax.random.uniform(key, shape, jnp.float32, -bound, bound)


def init_block_params(key, c, *, ks, kt, N):
    c0, c1, c2 = c
    k = jax.random.split(key, 8)
    return dict(
        w1=_uniform(k[0], (2 * c1, c0, kt), c0 * kt),
        b1=_uniform(k[1], (2 * c1,), c0 * kt),
        theta=_uniform(k[2], (c1, c1, ks), c1 * ks),
        b_sp=_uniform(k[3], (1, c1, 1, 1), c1 * ks),
        w2=_uniform(k[4], (c2, c1, kt), c1 * kt),
        b2=_uniform(k[5], (c2,), c1 * kt),
        gamma=1.0 + 0.1 * jax.random.normal(k[6], (N, c2), jnp.float32),
        beta=0.1 * jax.random.normal(k[7], (N, c2), jnp.float32),
    )


def init_out_params(key, *, c, Ko, N):
    k = jax.random.split(key, 8)
    return dict(
        w1=_uniform(k[0], (2 * c, c, Ko), c * Ko),
        b1=_uniform(k[1], (2 * c,), c * Ko),
        gamma=1.0 + 0.1 * jax.random.normal(k[2], (N, c), jnp.float32),
        beta=0.1 * jax.random.normal(k[3], (N, c), jnp.float32),
        w2=_uniform(k[4], (c, c), c),
        b2=_uniform(k[5], (c,), c),
        wfc=_uniform(k[6], (1, c), c),
        bfc=_uniform(k[7], (1,), c),
    )


if __name__ == "__main__":
    # Small config: ks=3, kt=3, n_route=16, n_his=12, batch=8, channels [1,8,8] / [8,8,8].
    B, T, N = 8, 12, 16
    ks, kt = 3, 3
    bs = ((1, 8, 8), (8, 8, 8))

    key = jax.random.PRNGKey(0)
    kx, kl, k1, k2, ko = jax.random.split(key, 5)

    x = jax.random.normal(kx, (B, 1, T, N), jnp.float32)
    Lk = jax.random.normal(kl, (ks, N, N), jnp.float32) * 0.2

    prm1 = init_block_params(k1, bs[0], ks=ks, kt=kt, N=N)
    prm2 = init_block_params(k2, bs[1], ks=ks, kt=kt, N=N)
    Ko = T - 4 * (kt - 1)
    prmo = init_out_params(ko, c=bs[1][2], Ko=Ko, N=N)

    ref = jax.block_until_ready(
        stgcn_reference(x, Lk, prm1, prm2, prmo, kt=kt, cfg1=bs[0], cfg2=bs[1]))
    assert ref.shape == (B, 1, 1, N), ref.shape

    # f32 path (exact sigmoid divide; MXU operands f32).
    fwd_f32 = make_stgcn_forward(Lk, prm1, prm2, prmo, ks=ks, kt=kt, bs=bs, N=N, T=T, B=B,
                                 mxu_dtype=jnp.float32)
    out_f32 = jax.block_until_ready(fwd_f32(x))
    assert out_f32.shape == (B, 1, 1, N), out_f32.shape
    d32 = float(jnp.max(jnp.abs(out_f32 - ref)))
    assert np.isfinite(d32) and d32 < 5e-2, f"f32 path max |diff| = {d32}"

    # bf16-MXU path (f32 accumulation / elementwise, EUP approx reciprocal in the gates).
    fwd_bf16 = make_stgcn_forward(Lk, prm1, prm2, prmo, ks=ks, kt=kt, bs=bs, N=N, T=T, B=B,
                                  mxu_dtype=jnp.bfloat16)
    out_bf16 = jax.block_until_ready(fwd_bf16(x))
    d16 = float(jnp.max(jnp.abs(out_bf16 - ref)))
    assert np.isfinite(d16) and d16 < 5e-1, f"bf16 path max |diff| = {d16}"

    print("KERNEL_OK")
</pallas_src>

<mosaic_0001>
module attributes {stable_mosaic.version = 11 : i64} {
  func.func @_stconv_kernel(%arg0: i32, %arg1: memref<4x8x288xf32, #tpu.memory_space<vmem>>, %arg2: memref<16x24xf32, #tpu.memory_space<vmem>>, %arg3: memref<24x8xf32, #tpu.memory_space<vmem>>, %arg4: memref<768x256xf32, #tpu.memory_space<vmem>>, %arg5: memref<8x24xf32, #tpu.memory_space<vmem>>, %arg6: memref<8x4xf32, #tpu.memory_space<vmem>>, %arg7: memref<16x128xf32, #tpu.memory_space<vmem>>, %arg8: memref<128x128xf32, #tpu.memory_space<vmem>>, %arg9: memref<4x8x128xf32, #tpu.memory_space<vmem>>) attributes {dimension_semantics = [#tpu.dimension_semantics<parallel>], iteration_bounds = array<i64: 2>, scalar_prefetch = 0 : i64, scratch_operands = 0 : i64, tpu.core_type = #tpu.core_type<tc>, window_params = [{transform_indices = @transform_0, window_bounds = array<i64: 4, 8, 288>}, {pipeline_mode = #tpu.pipeline_mode<synchronous>, transform_indices = @transform_1, window_bounds = array<i64: 16, 24>}, {pipeline_mode = #tpu.pipeline_mode<synchronous>, transform_indices = @transform_2, window_bounds = array<i64: 24, 8>}, {pipeline_mode = #tpu.pipeline_mode<synchronous>, transform_indices = @transform_3, window_bounds = array<i64: 768, 256>}, {pipeline_mode = #tpu.pipeline_mode<synchronous>, transform_indices = @transform_4, window_bounds = array<i64: 8, 24>}, {pipeline_mode = #tpu.pipeline_mode<synchronous>, transform_indices = @transform_5, window_bounds = array<i64: 8, 4>}, {pipeline_mode = #tpu.pipeline_mode<synchronous>, transform_indices = @transform_6, window_bounds = array<i64: 16, 128>}, {pipeline_mode = #tpu.pipeline_mode<synchronous>, transform_indices = @transform_7, window_bounds = array<i64: 128, 128>}, {transform_indices = @transform_8, window_bounds = array<i64: 4, 8, 128>}]} {
    %c0 = arith.constant 0 : index
    %c0_0 = arith.constant 0 : index
    %0 = vector.load %arg6[%c0, %c0_0] : memref<8x4xf32, #tpu.memory_space<vmem>>, vector<8x1xf32>
    %c0_1 = arith.constant 0 : index
    %c1 = arith.constant 1 : index
    %1 = vector.load %arg6[%c0_1, %c1] : memref<8x4xf32, #tpu.memory_space<vmem>>, vector<8x1xf32>
    %2 = tpu.concatenate %0, %1 in 0 : vector<8x1xf32>, vector<8x1xf32> -> vector<16x1xf32>
    %c0_2 = arith.constant 0 : index
    %c2 = arith.constant 2 : index
    %3 = vector.load %arg6[%c0_2, %c2] : memref<8x4xf32, #tpu.memory_space<vmem>>, vector<8x1xf32>
    %c0_3 = arith.constant 0 : index
    %c3 = arith.constant 3 : index
    %4 = vector.load %arg6[%c0_3, %c3] : memref<8x4xf32, #tpu.memory_space<vmem>>, vector<8x1xf32>
    %c0_4 = arith.constant 0 : index
    %c0_5 = arith.constant 0 : index
    %c0_6 = arith.constant 0 : index
    %5 = vector.load %arg1[%c0_4, %c0_5, %c0_6] : memref<4x8x288xf32, #tpu.memory_space<vmem>>, vector<1x8x256xf32>
    %6 = vector.shape_cast %5 : vector<1x8x256xf32> to vector<8x256xf32>
    %c1_7 = arith.constant 1 : index
    %c0_8 = arith.constant 0 : index
    %c0_9 = arith.constant 0 : index
    %7 = vector.load %arg1[%c1_7, %c0_8, %c0_9] : memref<4x8x288xf32, #tpu.memory_space<vmem>>, vector<1x8x256xf32>
    %8 = vector.shape_cast %7 : vector<1x8x256xf32> to vector<8x256xf32>
    %c2_10 = arith.constant 2 : index
    %c0_11 = arith.constant 0 : index
    %c0_12 = arith.constant 0 : index
    %9 = vector.load %arg1[%c2_10, %c0_11, %c0_12] : memref<4x8x288xf32, #tpu.memory_space<vmem>>, vector<1x8x256xf32>
    %10 = vector.shape_cast %9 : vector<1x8x256xf32> to vector<8x256xf32>
    %c3_13 = arith.constant 3 : index
    %c0_14 = arith.constant 0 : index
    %c0_15 = arith.constant 0 : index
    %11 = vector.load %arg1[%c3_13, %c0_14, %c0_15] : memref<4x8x288xf32, #tpu.memory_space<vmem>>, vector<1x8x256xf32>
    %12 = vector.shape_cast %11 : vector<1x8x256xf32> to vector<8x256xf32>
    %13 = tpu.concatenate %6, %8, %10, %12 in 1 : vector<8x256xf32>, vector<8x256xf32>, vector<8x256xf32>, vector<8x256xf32> -> vector<8x1024xf32>
    %c0_16 = arith.constant 0 : index
    %c0_17 = arith.constant 0 : index
    %c16 = arith.constant 16 : index
    %14 = vector.load %arg1[%c0_16, %c0_17, %c16] : memref<4x8x288xf32, #tpu.memory_space<vmem>>, vector<1x8x256xf32>
    %15 = vector.shape_cast %14 : vector<1x8x256xf32> to vector<8x256xf32>
    %c1_18 = arith.constant 1 : index
    %c0_19 = arith.constant 0 : index
    %c16_20 = arith.constant 16 : index
    %16 = vector.load %arg1[%c1_18, %c0_19, %c16_20] : memref<4x8x288xf32, #tpu.memory_space<vmem>>, vector<1x8x256xf32>
    %17 = vector.shape_cast %16 : vector<1x8x256xf32> to vector<8x256xf32>
    %c2_21 = arith.constant 2 : index
    %c0_22 = arith.constant 0 : index
    %c16_23 = arith.constant 16 : index
    %18 = vector.load %arg1[%c2_21, %c0_22, %c16_23] : memref<4x8x288xf32, #tpu.memory_space<vmem>>, vector<1x8x256xf32>
    %19 = vector.shape_cast %18 : vector<1x8x256xf32> to vector<8x256xf32>
    %c3_24 = arith.constant 3 : index
    %c0_25 = arith.constant 0 : index
    %c16_26 = arith.constant 16 : index
    %20 = vector.load %arg1[%c3_24, %c0_25, %c16_26] : memref<4x8x288xf32, #tpu.memory_space<vmem>>, vector<1x8x256xf32>
    %21 = vector.shape_cast %20 : vector<1x8x256xf32> to vector<8x256xf32>
    %22 = tpu.concatenate %15, %17, %19, %21 in 1 : vector<8x256xf32>, vector<8x256xf32>, vector<8x256xf32>, vector<8x256xf32> -> vector<8x1024xf32>
    %c0_27 = arith.constant 0 : index
    %c0_28 = arith.constant 0 : index
    %c32 = arith.constant 32 : index
    %23 = vector.load %arg1[%c0_27, %c0_28, %c32] : memref<4x8x288xf32, #tpu.memory_space<vmem>>, vector<1x8x256xf32>
    %24 = vector.shape_cast %23 : vector<1x8x256xf32> to vector<8x256xf32>
    %c1_29 = arith.constant 1 : index
    %c0_30 = arith.constant 0 : index
    %c32_31 = arith.constant 32 : index
    %25 = vector.load %arg1[%c1_29, %c0_30, %c32_31] : memref<4x8x288xf32, #tpu.memory_space<vmem>>, vector<1x8x256xf32>
    %26 = vector.shape_cast %25 : vector<1x8x256xf32> to vector<8x256xf32>
    %c2_32 = arith.constant 2 : index
    %c0_33 = arith.constant 0 : index
    %c32_34 = arith.constant 32 : index
    %27 = vector.load %arg1[%c2_32, %c0_33, %c32_34] : memref<4x8x288xf32, #tpu.memory_space<vmem>>, vector<1x8x256xf32>
    %28 = vector.shape_cast %27 : vector<1x8x256xf32> to vector<8x256xf32>
    %c3_35 = arith.constant 3 : index
    %c0_36 = arith.constant 0 : index
    %c32_37 = arith.constant 32 : index
    %29 = vector.load %arg1[%c3_35, %c0_36, %c32_37] : memref<4x8x288xf32, #tpu.memory_space<vmem>>, vector<1x8x256xf32>
    %30 = vector.shape_cast %29 : vector<1x8x256xf32> to vector<8x256xf32>
    %31 = tpu.concatenate %24, %26, %28, %30 in 1 : vector<8x256xf32>, vector<8x256xf32>, vector<8x256xf32>, vector<8x256xf32> -> vector<8x1024xf32>
    %32 = tpu.concatenate %13, %22, %31 in 0 : vector<8x1024xf32>, vector<8x1024xf32>, vector<8x1024xf32> -> vector<24x1024xf32>
    %c0_38 = arith.constant 0 : index
    %c0_39 = arith.constant 0 : index
    %33 = vector.load %arg2[%c0_38, %c0_39] : memref<16x24xf32, #tpu.memory_space<vmem>>, vector<16x24xf32>
    %cst = arith.constant dense<0.000000e+00> : vector<16x1024xf32>
    %34 = tpu.matmul %33, %32, %cst {dimension_numbers = #tpu.dot_dimension_numbers<[1], [0], [0], [1], [0, 0, 1, 1], [], []>} : vector<16x24xf32>, vector<24x1024xf32>, vector<16x1024xf32> -> vector<16x1024xf32>
    %35 = vector.broadcast %2 : vector<16x1xf32> to vector<16x1024xf32>
    %36 = arith.addf %34, %35 : vector<16x1024xf32>
    %37 = vector.extract_strided_slice %32 {offsets = [16, 0], sizes = [8, 1024], strides = [1, 1]} : vector<24x1024xf32> to vector<8x1024xf32>
    %38 = vector.extract_strided_slice %36 {offsets = [0, 0], sizes = [8, 1024], strides = [1, 1]} : vector<16x1024xf32> to vector<8x1024xf32>
    %39 = arith.addf %38, %37 : vector<8x1024xf32>
    %40 = vector.extract_strided_slice %36 {offsets = [8, 0], sizes = [8, 1024], strides = [1, 1]} : vector<16x1024xf32> to vector<8x1024xf32>
    %cst_40 = arith.constant 0.000000e+00 : f32
    %41 = vector.broadcast %cst_40 : f32 to vector<8x1024xf32>
    %42 = arith.subf %41, %40 : vector<8x1024xf32>
    %43 = math.exp %42 : vector<8x1024xf32>
    %cst_41 = arith.constant 1.000000e+00 : f32
    %44 = vector.broadcast %cst_41 : f32 to vector<8x1024xf32>
    %45 = arith.addf %44, %43 : vector<8x1024xf32>
    %cst_42 = arith.constant 1.000000e+00 : f32
    %46 = vector.broadcast %cst_42 : f32 to vector<8x1024xf32>
    %47 = arith.divf %46, %45 : vector<8x1024xf32>
    %48 = arith.mulf %39, %47 : vector<8x1024xf32>
    %c0_43 = arith.constant 0 : index
    %c0_44 = arith.constant 0 : index
    %49 = vector.load %arg3[%c0_43, %c0_44] : memref<24x8xf32, #tpu.memory_space<vmem>>, vector<24x8xf32>
    %cst_45 = arith.constant dense<0.000000e+00> : vector<24x1024xf32>
    %50 = tpu.matmul %49, %48, %cst_45 {dimension_numbers = #tpu.dot_dimension_numbers<[1], [0], [0], [1], [0, 0, 1, 1], [], []>} : vector<24x8xf32>, vector<8x1024xf32>, vector<24x1024xf32> -> vector<24x1024xf32>
    %51 = vector.extract_strided_slice %50 {offsets = [0, 0], sizes = [8, 256], strides = [1, 1]} : vector<24x1024xf32> to vector<8x256xf32>
    %52 = vector.extract_strided_slice %50 {offsets = [8, 0], sizes = [8, 256], strides = [1, 1]} : vector<24x1024xf32> to vector<8x256xf32>
    %53 = vector.extract_strided_slice %50 {offsets = [16, 0], sizes = [8, 256], strides = [1, 1]} : vector<24x1024xf32> to vector<8x256xf32>
    %54 = tpu.concatenate %51, %52, %53 in 1 : vector<8x256xf32>, vector<8x256xf32>, vector<8x256xf32> -> vector<8x768xf32>
    %55 = vector.extract_strided_slice %50 {offsets = [0, 256], sizes = [8, 256], strides = [1, 1]} : vector<24x1024xf32> to vector<8x256xf32>
    %56 = vector.extract_strided_slice %50 {offsets = [8, 256], sizes = [8, 256], strides = [1, 1]} : vector<24x1024xf32> to vector<8x256xf32>
    %57 = vector.extract_strided_slice %50 {offsets = [16, 256], sizes = [8, 256], strides = [1, 1]} : vector<24x1024xf32> to vector<8x256xf32>
    %58 = tpu.concatenate %55, %56, %57 in 1 : vector<8x256xf32>, vector<8x256xf32>, vector<8x256xf32> -> vector<8x768xf32>
    %59 = vector.extract_strided_slice %50 {offsets = [0, 512], sizes = [8, 256], strides = [1, 1]} : vector<24x1024xf32> to vector<8x256xf32>
    %60 = vector.extract_strided_slice %50 {offsets = [8, 512], sizes = [8, 256], strides = [1, 1]} : vector<24x1024xf32> to vector<8x256xf32>
    %61 = vector.extract_strided_slice %50 {offsets = [16, 512], sizes = [8, 256], strides = [1, 1]} : vector<24x1024xf32> to vector<8x256xf32>
    %62 = tpu.concatenate %59, %60, %61 in 1 : vector<8x256xf32>, vector<8x256xf32>, vector<8x256xf32> -> vector<8x768xf32>
    %63 = vector.extract_strided_slice %50 {offsets = [0, 768], sizes = [8, 256], strides = [1, 1]} : vector<24x1024xf32> to vector<8x256xf32>
    %64 = vector.extract_strided_slice %50 {offsets = [8, 768], sizes = [8, 256], strides = [1, 1]} : vector<24x1024xf32> to vector<8x256xf32>
    %65 = vector.extract_strided_slice %50 {offsets = [16, 768], sizes = [8, 256], strides = [1, 1]} : vector<24x1024xf32> to vector<8x256xf32>
    %66 = tpu.concatenate %63, %64, %65 in 1 : vector<8x256xf32>, vector<8x256xf32>, vector<8x256xf32> -> vector<8x768xf32>
    %67 = tpu.concatenate %54, %58, %62, %66 in 0 : vector<8x768xf32>, vector<8x768xf32>, vector<8x768xf32>, vector<8x768xf32> -> vector<32x768xf32>
    %c0_46 = arith.constant 0 : index
    %c0_47 = arith.constant 0 : index
    %68 = vector.load %arg4[%c0_46, %c0_47] : memref<768x256xf32, #tpu.memory_space<vmem>>, vector<768x256xf32>
    %cst_48 = arith.constant dense<0.000000e+00> : vector<32x256xf32>
    %69 = tpu.matmul %67, %68, %cst_48 {dimension_numbers = #tpu.dot_dimension_numbers<[1], [0], [0], [1], [0, 0, 1, 1], [], []>} : vector<32x768xf32>, vector<768x256xf32>, vector<32x256xf32> -> vector<32x256xf32>
    %70 = vector.extract_strided_slice %69 {offsets = [0, 0], sizes = [8, 256], strides = [1, 1]} : vector<32x256xf32> to vector<8x256xf32>
    %71 = vector.extract_strided_slice %69 {offsets = [8, 0], sizes = [8, 256], strides = [1, 1]} : vector<32x256xf32> to vector<8x256xf32>
    %72 = vector.extract_strided_slice %69 {offsets = [16, 0], sizes = [8, 256], strides = [1, 1]} : vector<32x256xf32> to vector<8x256xf32>
    %73 = vector.extract_strided_slice %69 {offsets = [24, 0], sizes = [8, 256], strides = [1, 1]} : vector<32x256xf32> to vector<8x256xf32>
    %74 = tpu.concatenate %70, %71, %72, %73 in 1 : vector<8x256xf32>, vector<8x256xf32>, vector<8x256xf32>, vector<8x256xf32> -> vector<8x1024xf32>
    %75 = vector.broadcast %3 : vector<8x1xf32> to vector<8x1024xf32>
    %76 = arith.addf %74, %75 : vector<8x1024xf32>
    %77 = arith.addf %76, %48 : vector<8x1024xf32>
    %cst_49 = arith.constant 0.000000e+00 : f32
    %78 = vector.broadcast %cst_49 : f32 to vector<8x1024xf32>
    %79 = arith.maximumf %77, %78 : vector<8x1024xf32>
    %80 = vector.extract_strided_slice %79 {offsets = [0, 0], sizes = [8, 128], strides = [1, 1]} : vector<8x1024xf32> to vector<8x128xf32>
    %81 = vector.extract_strided_slice %79 {offsets = [0, 256], sizes = [8, 128], strides = [1, 1]} : vector<8x1024xf32> to vector<8x128xf32>
    %82 = vector.extract_strided_slice %79 {offsets = [0, 512], sizes = [8, 128], strides = [1, 1]} : vector<8x1024xf32> to vector<8x128xf32>
    %83 = vector.extract_strided_slice %79 {offsets = [0, 768], sizes = [8, 128], strides = [1, 1]} : vector<8x1024xf32> to vector<8x128xf32>
    %84 = tpu.concatenate %80, %81, %82, %83 in 1 : vector<8x128xf32>, vector<8x128xf32>, vector<8x128xf32>, vector<8x128xf32> -> vector<8x512xf32>
    %85 = vector.extract_strided_slice %79 {offsets = [0, 16], sizes = [8, 128], strides = [1, 1]} : vector<8x1024xf32> to vector<8x128xf32>
    %86 = vector.extract_strided_slice %79 {offsets = [0, 272], sizes = [8, 128], strides = [1, 1]} : vector<8x1024xf32> to vector<8x128xf32>
    %87 = vector.extract_strided_slice %79 {offsets = [0, 528], sizes = [8, 128], strides = [1, 1]} : vector<8x1024xf32> to vector<8x128xf32>
    %88 = vector.extract_strided_slice %79 {offsets = [0, 784], sizes = [8, 128], strides = [1, 1]} : vector<8x1024xf32> to vector<8x128xf32>
    %89 = tpu.concatenate %85, %86, %87, %88 in 1 : vector<8x128xf32>, vector<8x128xf32>, vector<8x128xf32>, vector<8x128xf32> -> vector<8x512xf32>
    %90 = vector.extract_strided_slice %79 {offsets = [0, 32], sizes = [8, 128], strides = [1, 1]} : vector<8x1024xf32> to vector<8x128xf32>
    %91 = vector.extract_strided_slice %79 {offsets = [0, 288], sizes = [8, 128], strides = [1, 1]} : vector<8x1024xf32> to vector<8x128xf32>
    %92 = vector.extract_strided_slice %79 {offsets = [0, 544], sizes = [8, 128], strides = [1, 1]} : vector<8x1024xf32> to vector<8x128xf32>
    %93 = vector.extract_strided_slice %79 {offsets = [0, 800], sizes = [8, 128], strides = [1, 1]} : vector<8x1024xf32> to vector<8x128xf32>
    %94 = tpu.concatenate %90, %91, %92, %93 in 1 : vector<8x128xf32>, vector<8x128xf32>, vector<8x128xf32>, vector<8x128xf32> -> vector<8x512xf32>
    %95 = tpu.concatenate %84, %89, %94 in 0 : vector<8x512xf32>, vector<8x512xf32>, vector<8x512xf32> -> vector<24x512xf32>
    %c0_50 = arith.constant 0 : index
    %c0_51 = arith.constant 0 : index
    %96 = vector.load %arg5[%c0_50, %c0_51] : memref<8x24xf32, #tpu.memory_space<vmem>>, vector<8x24xf32>
    %cst_52 = arith.constant dense<0.000000e+00> : vector<8x512xf32>
    %97 = tpu.matmul %96, %95, %cst_52 {dimension_numbers = #tpu.dot_dimension_numbers<[1], [0], [0], [1], [0, 0, 1, 1], [], []>} : vector<8x24xf32>, vector<24x512xf32>, vector<8x512xf32> -> vector<8x512xf32>
    %98 = vector.broadcast %4 : vector<8x1xf32> to vector<8x512xf32>
    %99 = arith.addf %97, %98 : vector<8x512xf32>
    %100 = vector.extract_strided_slice %95 {offsets = [16, 0], sizes = [8, 512], strides = [1, 1]} : vector<24x512xf32> to vector<8x512xf32>
    %101 = arith.addf %99, %100 : vector<8x512xf32>
    %cst_53 = arith.constant 0.000000e+00 : f32
    %102 = vector.broadcast %cst_53 : f32 to vector<8x512xf32>
    %103 = arith.maximumf %101, %102 : vector<8x512xf32>
    %cst_54 = arith.constant dense<0.000000e+00> : vector<512xf32>
    %104 = vector.multi_reduction <add>, %103, %cst_54 [0] : vector<8x512xf32> to vector<512xf32>
    %105 = vector.shape_cast %104 : vector<512xf32> to vector<1x512xf32>
    %106 = arith.mulf %103, %103 : vector<8x512xf32>
    %cst_55 = arith.constant dense<0.000000e+00> : vector<512xf32>
    %107 = vector.multi_reduction <add>, %106, %cst_55 [0] : vector<8x512xf32> to vector<512xf32>
    %108 = vector.shape_cast %107 : vector<512xf32> to vector<1x512xf32>
    %109 = vector.extract_strided_slice %105 {offsets = [0, 0], sizes = [1, 128], strides = [1, 1]} : vector<1x512xf32> to vector<1x128xf32>
    %110 = vector.extract_strided_slice %105 {offsets = [0, 128], sizes = [1, 128], strides = [1, 1]} : vector<1x512xf32> to vector<1x128xf32>
    %111 = vector.extract_strided_slice %105 {offsets = [0, 256], sizes = [1, 128], strides = [1, 1]} : vector<1x512xf32> to vector<1x128xf32>
    %112 = vector.extract_strided_slice %105 {offsets = [0, 384], sizes = [1, 128], strides = [1, 1]} : vector<1x512xf32> to vector<1x128xf32>
    %113 = vector.extract_strided_slice %108 {offsets = [0, 0], sizes = [1, 128], strides = [1, 1]} : vector<1x512xf32> to vector<1x128xf32>
    %114 = vector.extract_strided_slice %108 {offsets = [0, 128], sizes = [1, 128], strides = [1, 1]} : vector<1x512xf32> to vector<1x128xf32>
    %115 = vector.extract_strided_slice %108 {offsets = [0, 256], sizes = [1, 128], strides = [1, 1]} : vector<1x512xf32> to vector<1x128xf32>
    %116 = vector.extract_strided_slice %108 {offsets = [0, 384], sizes = [1, 128], strides = [1, 1]} : vector<1x512xf32> to vector<1x128xf32>
    %117 = tpu.concatenate %109, %110, %111, %112, %113, %114, %115, %116 in 0 : vector<1x128xf32>, vector<1x128xf32>, vector<1x128xf32>, vector<1x128xf32>, vector<1x128xf32>, vector<1x128xf32>, vector<1x128xf32>, vector<1x128xf32> -> vector<8x128xf32>
    %c0_56 = arith.constant 0 : index
    %c0_57 = arith.constant 0 : index
    %118 = vector.load %arg8[%c0_56, %c0_57] : memref<128x128xf32, #tpu.memory_space<vmem>>, vector<128x128xf32>
    %cst_58 = arith.constant dense<0.000000e+00> : vector<8x128xf32>
    %119 = tpu.matmul %117, %118, %cst_58 {dimension_numbers = #tpu.dot_dimension_numbers<[1], [0], [0], [1], [0, 0, 1, 1], [], []>} : vector<8x128xf32>, vector<128x128xf32>, vector<8x128xf32> -> vector<8x128xf32>
    %c0_59 = arith.constant 0 : index
    %c0_60 = arith.constant 0 : index
    %120 = vector.load %arg7[%c0_59, %c0_60] : memref<16x128xf32, #tpu.memory_space<vmem>>, vector<8x128xf32>
    %c8 = arith.constant 8 : index
    %c0_61 = arith.constant 0 : index
    %121 = vector.load %arg7[%c8, %c0_61] : memref<16x128xf32, #tpu.memory_space<vmem>>, vector<8x128xf32>
    %122 = vector.extract_strided_slice %119 {offsets = [0, 0], sizes = [1, 128], strides = [1, 1]} : vector<8x128xf32> to vector<1x128xf32>
    %123 = vector.extract_strided_slice %119 {offsets = [4, 0], sizes = [1, 128], strides = [1, 1]} : vector<8x128xf32> to vector<1x128xf32>
    %124 = arith.mulf %122, %122 : vector<1x128xf32>
    %125 = arith.subf %123, %124 : vector<1x128xf32>
    %cst_62 = arith.constant 9.99999974E-6 : f32
    %126 = vector.broadcast %cst_62 : f32 to vector<1x128xf32>
    %127 = arith.addf %125, %126 : vector<1x128xf32>
    %128 = math.rsqrt %127 : vector<1x128xf32>
    %129 = vector.extract_strided_slice %103 {offsets = [0, 0], sizes = [8, 128], strides = [1, 1]} : vector<8x512xf32> to vector<8x128xf32>
    %130 = vector.broadcast %122 : vector<1x128xf32> to vector<8x128xf32>
    %131 = arith.subf %129, %130 : vector<8x128xf32>
    %132 = vector.broadcast %128 : vector<1x128xf32> to vector<8x128xf32>
    %133 = arith.mulf %131, %132 : vector<8x128xf32>
    %134 = arith.mulf %133, %120 : vector<8x128xf32>
    %135 = arith.addf %134, %121 : vector<8x128xf32>
    %c0_63 = arith.constant 0 : index
    %c0_64 = arith.constant 0 : index
    %c0_65 = arith.constant 0 : index
    %136 = vector.load %arg9[%c0_63, %c0_64, %c0_65] : memref<4x8x128xf32, #tpu.memory_space<vmem>>, vector<1x8x128xf32>
    %137 = vector.shape_cast %136 : vector<1x8x128xf32> to vector<8x128xf32>
    %138 = vector.shape_cast %135 : vector<8x128xf32> to vector<1x8x128xf32>
    tpu.vector_store %arg9[%c0_63, %c0_64, %c0_65], %138 {strides = array<i32>} : memref<4x8x128xf32, #tpu.memory_space<vmem>>, vector<1x8x128xf32>,
    %139 = vector.extract_strided_slice %119 {offsets = [1, 0], sizes = [1, 128], strides = [1, 1]} : vector<8x128xf32> to vector<1x128xf32>
    %140 = vector.extract_strided_slice %119 {offsets = [5, 0], sizes = [1, 128], strides = [1, 1]} : vector<8x128xf32> to vector<1x128xf32>
    %141 = arith.mulf %139, %139 : vector<1x128xf32>
    %142 = arith.subf %140, %141 : vector<1x128xf32>
    %cst_66 = arith.constant 9.99999974E-6 : f32
    %143 = vector.broadcast %cst_66 : f32 to vector<1x128xf32>
    %144 = arith.addf %142, %143 : vector<1x128xf32>
    %145 = math.rsqrt %144 : vector<1x128xf32>
    %146 = vector.extract_strided_slice %103 {offsets = [0, 128], sizes = [8, 128], strides = [1, 1]} : vector<8x512xf32> to vector<8x128xf32>
    %147 = vector.broadcast %139 : vector<1x128xf32> to vector<8x128xf32>
    %148 = arith.subf %146, %147 : vector<8x128xf32>
    %149 = vector.broadcast %145 : vector<1x128xf32> to vector<8x128xf32>
    %150 = arith.mulf %148, %149 : vector<8x128xf32>
    %151 = arith.mulf %150, %120 : vector<8x128xf32>
    %152 = arith.addf %151, %121 : vector<8x128xf32>
    %c1_67 = arith.constant 1 : index
    %c0_68 = arith.constant 0 : index
    %c0_69 = arith.constant 0 : index
    %153 = vector.load %arg9[%c1_67, %c0_68, %c0_69] : memref<4x8x128xf32, #tpu.memory_space<vmem>>, vector<1x8x128xf32>
    %154 = vector.shape_cast %153 : vector<1x8x128xf32> to vector<8x128xf32>
    %155 = vector.shape_cast %152 : vector<8x128xf32> to vector<1x8x128xf32>
    tpu.vector_store %arg9[%c1_67, %c0_68, %c0_69], %155 {strides = array<i32>} : memref<4x8x128xf32, #tpu.memory_space<vmem>>, vector<1x8x128xf32>,
    %156 = vector.extract_strided_slice %119 {offsets = [2, 0], sizes = [1, 128], strides = [1, 1]} : vector<8x128xf32> to vector<1x128xf32>
    %157 = vector.extract_strided_slice %119 {offsets = [6, 0], sizes = [1, 128], strides = [1, 1]} : vector<8x128xf32> to vector<1x128xf32>
    %158 = arith.mulf %156, %156 : vector<1x128xf32>
    %159 = arith.subf %157, %158 : vector<1x128xf32>
    %cst_70 = arith.constant 9.99999974E-6 : f32
    %160 = vector.broadcast %cst_70 : f32 to vector<1x128xf32>
    %161 = arith.addf %159, %160 : vector<1x128xf32>
    %162 = math.rsqrt %161 : vector<1x128xf32>
    %163 = vector.extract_strided_slice %103 {offsets = [0, 256], sizes = [8, 128], strides = [1, 1]} : vector<8x512xf32> to vector<8x128xf32>
    %164 = vector.broadcast %156 : vector<1x128xf32> to vector<8x128xf32>
    %165 = arith.subf %163, %164 : vector<8x128xf32>
    %166 = vector.broadcast %162 : vector<1x128xf32> to vector<8x128xf32>
    %167 = arith.mulf %165, %166 : vector<8x128xf32>
    %168 = arith.mulf %167, %120 : vector<8x128xf32>
    %169 = arith.addf %168, %121 : vector<8x128xf32>
    %c2_71 = arith.constant 2 : index
    %c0_72 = arith.constant 0 : index
    %c0_73 = arith.constant 0 : index
    %170 = vector.load %arg9[%c2_71, %c0_72, %c0_73] : memref<4x8x128xf32, #tpu.memory_space<vmem>>, vector<1x8x128xf32>
    %171 = vector.shape_cast %170 : vector<1x8x128xf32> to vector<8x128xf32>
    %172 = vector.shape_cast %169 : vector<8x128xf32> to vector<1x8x128xf32>
    tpu.vector_store %arg9[%c2_71, %c0_72, %c0_73], %172 {strides = array<i32>} : memref<4x8x128xf32, #tpu.memory_space<vmem>>, vector<1x8x128xf32>,
    %173 = vector.extract_strided_slice %119 {offsets = [3, 0], sizes = [1, 128], strides = [1, 1]} : vector<8x128xf32> to vector<1x128xf32>
    %174 = vector.extract_strided_slice %119 {offsets = [7, 0], sizes = [1, 128], strides = [1, 1]} : vector<8x128xf32> to vector<1x128xf32>
    %175 = arith.mulf %173, %173 : vector<1x128xf32>
    %176 = arith.subf %174, %175 : vector<1x128xf32>
    %cst_74 = arith.constant 9.99999974E-6 : f32
    %177 = vector.broadcast %cst_74 : f32 to vector<1x128xf32>
    %178 = arith.addf %176, %177 : vector<1x128xf32>
    %179 = math.rsqrt %178 : vector<1x128xf32>
    %180 = vector.extract_strided_slice %103 {offsets = [0, 384], sizes = [8, 128], strides = [1, 1]} : vector<8x512xf32> to vector<8x128xf32>
    %181 = vector.broadcast %173 : vector<1x128xf32> to vector<8x128xf32>
    %182 = arith.subf %180, %181 : vector<8x128xf32>
    %183 = vector.broadcast %179 : vector<1x128xf32> to vector<8x128xf32>
    %184 = arith.mulf %182, %183 : vector<8x128xf32>
    %185 = arith.mulf %184, %120 : vector<8x128xf32>
    %186 = arith.addf %185, %121 : vector<8x128xf32>
    %c3_75 = arith.constant 3 : index
    %c0_76 = arith.constant 0 : index
    %c0_77 = arith.constant 0 : index
    %187 = vector.load %arg9[%c3_75, %c0_76, %c0_77] : memref<4x8x128xf32, #tpu.memory_space<vmem>>, vector<1x8x128xf32>
    %188 = vector.shape_cast %187 : vector<1x8x128xf32> to vector<8x128xf32>
    %189 = vector.shape_cast %186 : vector<8x128xf32> to vector<1x8x128xf32>
    tpu.vector_store %arg9[%c3_75, %c0_76, %c0_77], %189 {strides = array<i32>} : memref<4x8x128xf32, #tpu.memory_space<vmem>>, vector<1x8x128xf32>,
    return
  }
  func.func @transform_0(%arg0: i32) -> (i32, i32, i32) {
    %c0_i32 = arith.constant 0 : i32
    %c0_i32_0 = arith.constant 0 : i32
    %c0_i32_1 = arith.constant 0 : i32
    return %arg0, %c0_i32, %c0_i32_0 : i32, i32, i32
  }
  func.func @transform_1(%arg0: i32) -> (i32, i32) {
    %c0_i32 = arith.constant 0 : i32
    %c0_i32_0 = arith.constant 0 : i32
    %c0_i32_1 = arith.constant 0 : i32
    return %c0_i32, %c0_i32_0 : i32, i32
  }
  func.func @transform_2(%arg0: i32) -> (i32, i32) {
    %c0_i32 = arith.constant 0 : i32
    %c0_i32_0 = arith.constant 0 : i32
    %c0_i32_1 = arith.constant 0 : i32
    return %c0_i32, %c0_i32_0 : i32, i32
  }
  func.func @transform_3(%arg0: i32) -> (i32, i32) {
    %c0_i32 = arith.constant 0 : i32
    %c0_i32_0 = arith.constant 0 : i32
    %c0_i32_1 = arith.constant 0 : i32
    return %c0_i32, %c0_i32_0 : i32, i32
  }
  func.func @transform_4(%arg0: i32) -> (i32, i32) {
    %c0_i32 = arith.constant 0 : i32
    %c0_i32_0 = arith.constant 0 : i32
    %c0_i32_1 = arith.constant 0 : i32
    return %c0_i32, %c0_i32_0 : i32, i32
  }
  func.func @transform_5(%arg0: i32) -> (i32, i32) {
    %c0_i32 = arith.constant 0 : i32
    %c0_i32_0 = arith.constant 0 : i32
    %c0_i32_1 = arith.constant 0 : i32
    return %c0_i32, %c0_i32_0 : i32, i32
  }
  func.func @transform_6(%arg0: i32) -> (i32, i32) {
    %c0_i32 = arith.constant 0 : i32
    %c0_i32_0 = arith.constant 0 : i32
    %c0_i32_1 = arith.constant 0 : i32
    return %c0_i32, %c0_i32_0 : i32, i32
  }
  func.func @transform_7(%arg0: i32) -> (i32, i32) {
    %c0_i32 = arith.constant 0 : i32
    %c0_i32_0 = arith.constant 0 : i32
    %c0_i32_1 = arith.constant 0 : i32
    return %c0_i32, %c0_i32_0 : i32, i32
  }
  func.func @transform_8(%arg0: i32) -> (i32, i32, i32) {
    %c0_i32 = arith.constant 0 : i32
    %c0_i32_0 = arith.constant 0 : i32
    %c0_i32_1 = arith.constant 0 : i32
    return %arg0, %c0_i32, %c0_i32_0 : i32, i32, i32
  }
}

module attributes {stable_mosaic.version = 11 : i64} {
  func.func @_stconv_kernel(%arg0: i32, %arg1: memref<4x8x160xf32, #tpu.memory_space<vmem>>, %arg2: memref<16x24xf32, #tpu.memory_space<vmem>>, %arg3: memref<24x8xf32, #tpu.memory_space<vmem>>, %arg4: memref<384x128xf32, #tpu.memory_space<vmem>>, %arg5: memref<8x24xf32, #tpu.memory_space<vmem>>, %arg6: memref<8x4xf32, #tpu.memory_space<vmem>>, %arg7: memref<16x64xf32, #tpu.memory_space<vmem>>, %arg8: memref<64x64xf32, #tpu.memory_space<vmem>>, %arg9: memref<4x8x64xf32, #tpu.memory_space<vmem>>) attributes {dimension_semantics = [#tpu.dimension_semantics<parallel>], iteration_bounds = array<i64: 2>, scalar_prefetch = 0 : i64, scratch_operands = 0 : i64, tpu.core_type = #tpu.core_type<tc>, window_params = [{transform_indices = @transform_0, window_bounds = array<i64: 4, 8, 160>}, {pipeline_mode = #tpu.pipeline_mode<synchronous>, transform_indices = @transform_1, window_bounds = array<i64: 16, 24>}, {pipeline_mode = #tpu.pipeline_mode<synchronous>, transform_indices = @transform_2, window_bounds = array<i64: 24, 8>}, {pipeline_mode = #tpu.pipeline_mode<synchronous>, transform_indices = @transform_3, window_bounds = array<i64: 384, 128>}, {pipeline_mode = #tpu.pipeline_mode<synchronous>, transform_indices = @transform_4, window_bounds = array<i64: 8, 24>}, {pipeline_mode = #tpu.pipeline_mode<synchronous>, transform_indices = @transform_5, window_bounds = array<i64: 8, 4>}, {pipeline_mode = #tpu.pipeline_mode<synchronous>, transform_indices = @transform_6, window_bounds = array<i64: 16, 64>}, {pipeline_mode = #tpu.pipeline_mode<synchronous>, transform_indices = @transform_7, window_bounds = array<i64: 64, 64>}, {transform_indices = @transform_8, window_bounds = array<i64: 4, 8, 64>}]} {
    %c0 = arith.constant 0 : index
    %c0_0 = arith.constant 0 : index
    %0 = vector.load %arg6[%c0, %c0_0] : memref<8x4xf32, #tpu.memory_space<vmem>>, vector<8x1xf32>
    %c0_1 = arith.constant 0 : index
    %c1 = arith.constant 1 : index
    %1 = vector.load %arg6[%c0_1, %c1] : memref<8x4xf32, #tpu.memory_space<vmem>>, vector<8x1xf32>
    %2 = tpu.concatenate %0, %1 in 0 : vector<8x1xf32>, vector<8x1xf32> -> vector<16x1xf32>
    %c0_2 = arith.constant 0 : index
    %c2 = arith.constant 2 : index
    %3 = vector.load %arg6[%c0_2, %c2] : memref<8x4xf32, #tpu.memory_space<vmem>>, vector<8x1xf32>
    %c0_3 = arith.constant 0 : index
    %c3 = arith.constant 3 : index
    %4 = vector.load %arg6[%c0_3, %c3] : memref<8x4xf32, #tpu.memory_space<vmem>>, vector<8x1xf32>
    %c0_4 = arith.constant 0 : index
    %c0_5 = arith.constant 0 : index
    %c0_6 = arith.constant 0 : index
    %5 = vector.load %arg1[%c0_4, %c0_5, %c0_6] : memref<4x8x160xf32, #tpu.memory_space<vmem>>, vector<1x8x128xf32>
    %6 = vector.shape_cast %5 : vector<1x8x128xf32> to vector<8x128xf32>
    %c1_7 = arith.constant 1 : index
    %c0_8 = arith.constant 0 : index
    %c0_9 = arith.constant 0 : index
    %7 = vector.load %arg1[%c1_7, %c0_8, %c0_9] : memref<4x8x160xf32, #tpu.memory_space<vmem>>, vector<1x8x128xf32>
    %8 = vector.shape_cast %7 : vector<1x8x128xf32> to vector<8x128xf32>
    %c2_10 = arith.constant 2 : index
    %c0_11 = arith.constant 0 : index
    %c0_12 = arith.constant 0 : index
    %9 = vector.load %arg1[%c2_10, %c0_11, %c0_12] : memref<4x8x160xf32, #tpu.memory_space<vmem>>, vector<1x8x128xf32>
    %10 = vector.shape_cast %9 : vector<1x8x128xf32> to vector<8x128xf32>
    %c3_13 = arith.constant 3 : index
    %c0_14 = arith.constant 0 : index
    %c0_15 = arith.constant 0 : index
    %11 = vector.load %arg1[%c3_13, %c0_14, %c0_15] : memref<4x8x160xf32, #tpu.memory_space<vmem>>, vector<1x8x128xf32>
    %12 = vector.shape_cast %11 : vector<1x8x128xf32> to vector<8x128xf32>
    %13 = tpu.concatenate %6, %8, %10, %12 in 1 : vector<8x128xf32>, vector<8x128xf32>, vector<8x128xf32>, vector<8x128xf32> -> vector<8x512xf32>
    %c0_16 = arith.constant 0 : index
    %c0_17 = arith.constant 0 : index
    %c16 = arith.constant 16 : index
    %14 = vector.load %arg1[%c0_16, %c0_17, %c16] : memref<4x8x160xf32, #tpu.memory_space<vmem>>, vector<1x8x128xf32>
    %15 = vector.shape_cast %14 : vector<1x8x128xf32> to vector<8x128xf32>
    %c1_18 = arith.constant 1 : index
    %c0_19 = arith.constant 0 : index
    %c16_20 = arith.constant 16 : index
    %16 = vector.load %arg1[%c1_18, %c0_19, %c16_20] : memref<4x8x160xf32, #tpu.memory_space<vmem>>, vector<1x8x128xf32>
    %17 = vector.shape_cast %16 : vector<1x8x128xf32> to vector<8x128xf32>
    %c2_21 = arith.constant 2 : index
    %c0_22 = arith.constant 0 : index
    %c16_23 = arith.constant 16 : index
    %18 = vector.load %arg1[%c2_21, %c0_22, %c16_23] : memref<4x8x160xf32, #tpu.memory_space<vmem>>, vector<1x8x128xf32>
    %19 = vector.shape_cast %18 : vector<1x8x128xf32> to vector<8x128xf32>
    %c3_24 = arith.constant 3 : index
    %c0_25 = arith.constant 0 : index
    %c16_26 = arith.constant 16 : index
    %20 = vector.load %arg1[%c3_24, %c0_25, %c16_26] : memref<4x8x160xf32, #tpu.memory_space<vmem>>, vector<1x8x128xf32>
    %21 = vector.shape_cast %20 : vector<1x8x128xf32> to vector<8x128xf32>
    %22 = tpu.concatenate %15, %17, %19, %21 in 1 : vector<8x128xf32>, vector<8x128xf32>, vector<8x128xf32>, vector<8x128xf32> -> vector<8x512xf32>
    %c0_27 = arith.constant 0 : index
    %c0_28 = arith.constant 0 : index
    %c32 = arith.constant 32 : index
    %23 = vector.load %arg1[%c0_27, %c0_28, %c32] : memref<4x8x160xf32, #tpu.memory_space<vmem>>, vector<1x8x128xf32>
    %24 = vector.shape_cast %23 : vector<1x8x128xf32> to vector<8x128xf32>
    %c1_29 = arith.constant 1 : index
    %c0_30 = arith.constant 0 : index
    %c32_31 = arith.constant 32 : index
    %25 = vector.load %arg1[%c1_29, %c0_30, %c32_31] : memref<4x8x160xf32, #tpu.memory_space<vmem>>, vector<1x8x128xf32>
    %26 = vector.shape_cast %25 : vector<1x8x128xf32> to vector<8x128xf32>
    %c2_32 = arith.constant 2 : index
    %c0_33 = arith.constant 0 : index
    %c32_34 = arith.constant 32 : index
    %27 = vector.load %arg1[%c2_32, %c0_33, %c32_34] : memref<4x8x160xf32, #tpu.memory_space<vmem>>, vector<1x8x128xf32>
    %28 = vector.shape_cast %27 : vector<1x8x128xf32> to vector<8x128xf32>
    %c3_35 = arith.constant 3 : index
    %c0_36 = arith.constant 0 : index
    %c32_37 = arith.constant 32 : index
    %29 = vector.load %arg1[%c3_35, %c0_36, %c32_37] : memref<4x8x160xf32, #tpu.memory_space<vmem>>, vector<1x8x128xf32>
    %30 = vector.shape_cast %29 : vector<1x8x128xf32> to vector<8x128xf32>
    %31 = tpu.concatenate %24, %26, %28, %30 in 1 : vector<8x128xf32>, vector<8x128xf32>, vector<8x128xf32>, vector<8x128xf32> -> vector<8x512xf32>
    %32 = tpu.concatenate %13, %22, %31 in 0 : vector<8x512xf32>, vector<8x512xf32>, vector<8x512xf32> -> vector<24x512xf32>
    %c0_38 = arith.constant 0 : index
    %c0_39 = arith.constant 0 : index
    %33 = vector.load %arg2[%c0_38, %c0_39] : memref<16x24xf32, #tpu.memory_space<vmem>>, vector<16x24xf32>
    %cst = arith.constant dense<0.000000e+00> : vector<16x512xf32>
    %34 = tpu.matmul %33, %32, %cst {dimension_numbers = #tpu.dot_dimension_numbers<[1], [0], [0], [1], [0, 0, 1, 1], [], []>} : vector<16x24xf32>, vector<24x512xf32>, vector<16x512xf32> -> vector<16x512xf32>
    %35 = vector.broadcast %2 : vector<16x1xf32> to vector<16x512xf32>
    %36 = arith.addf %34, %35 : vector<16x512xf32>
    %37 = vector.extract_strided_slice %32 {offsets = [16, 0], sizes = [8, 512], strides = [1, 1]} : vector<24x512xf32> to vector<8x512xf32>
    %38 = vector.extract_strided_slice %36 {offsets = [0, 0], sizes = [8, 512], strides = [1, 1]} : vector<16x512xf32> to vector<8x512xf32>
    %39 = arith.addf %38, %37 : vector<8x512xf32>
    %40 = vector.extract_strided_slice %36 {offsets = [8, 0], sizes = [8, 512], strides = [1, 1]} : vector<16x512xf32> to vector<8x512xf32>
    %cst_40 = arith.constant 0.000000e+00 : f32
    %41 = vector.broadcast %cst_40 : f32 to vector<8x512xf32>
    %42 = arith.subf %41, %40 : vector<8x512xf32>
    %43 = math.exp %42 : vector<8x512xf32>
    %cst_41 = arith.constant 1.000000e+00 : f32
    %44 = vector.broadcast %cst_41 : f32 to vector<8x512xf32>
    %45 = arith.addf %44, %43 : vector<8x512xf32>
    %cst_42 = arith.constant 1.000000e+00 : f32
    %46 = vector.broadcast %cst_42 : f32 to vector<8x512xf32>
    %47 = arith.divf %46, %45 : vector<8x512xf32>
    %48 = arith.mulf %39, %47 : vector<8x512xf32>
    %c0_43 = arith.constant 0 : index
    %c0_44 = arith.constant 0 : index
    %49 = vector.load %arg3[%c0_43, %c0_44] : memref<24x8xf32, #tpu.memory_space<vmem>>, vector<24x8xf32>
    %cst_45 = arith.constant dense<0.000000e+00> : vector<24x512xf32>
    %50 = tpu.matmul %49, %48, %cst_45 {dimension_numbers = #tpu.dot_dimension_numbers<[1], [0], [0], [1], [0, 0, 1, 1], [], []>} : vector<24x8xf32>, vector<8x512xf32>, vector<24x512xf32> -> vector<24x512xf32>
    %51 = vector.extract_strided_slice %50 {offsets = [0, 0], sizes = [8, 128], strides = [1, 1]} : vector<24x512xf32> to vector<8x128xf32>
    %52 = vector.extract_strided_slice %50 {offsets = [8, 0], sizes = [8, 128], strides = [1, 1]} : vector<24x512xf32> to vector<8x128xf32>
    %53 = vector.extract_strided_slice %50 {offsets = [16, 0], sizes = [8, 128], strides = [1, 1]} : vector<24x512xf32> to vector<8x128xf32>
    %54 = tpu.concatenate %51, %52, %53 in 1 : vector<8x128xf32>, vector<8x128xf32>, vector<8x128xf32> -> vector<8x384xf32>
    %55 = vector.extract_strided_slice %50 {offsets = [0, 128], sizes = [8, 128], strides = [1, 1]} : vector<24x512xf32> to vector<8x128xf32>
    %56 = vector.extract_strided_slice %50 {offsets = [8, 128], sizes = [8, 128], strides = [1, 1]} : vector<24x512xf32> to vector<8x128xf32>
    %57 = vector.extract_strided_slice %50 {offsets = [16, 128], sizes = [8, 128], strides = [1, 1]} : vector<24x512xf32> to vector<8x128xf32>
    %58 = tpu.concatenate %55, %56, %57 in 1 : vector<8x128xf32>, vector<8x128xf32>, vector<8x128xf32> -> vector<8x384xf32>
    %59 = vector.extract_strided_slice %50 {offsets = [0, 256], sizes = [8, 128], strides = [1, 1]} : vector<24x512xf32> to vector<8x128xf32>
    %60 = vector.extract_strided_slice %50 {offsets = [8, 256], sizes = [8, 128], strides = [1, 1]} : vector<24x512xf32> to vector<8x128xf32>
    %61 = vector.extract_strided_slice %50 {offsets = [16, 256], sizes = [8, 128], strides = [1, 1]} : vector<24x512xf32> to vector<8x128xf32>
    %62 = tpu.concatenate %59, %60, %61 in 1 : vector<8x128xf32>, vector<8x128xf32>, vector<8x128xf32> -> vector<8x384xf32>
    %63 = vector.extract_strided_slice %50 {offsets = [0, 384], sizes = [8, 128], strides = [1, 1]} : vector<24x512xf32> to vector<8x128xf32>
    %64 = vector.extract_strided_slice %50 {offsets = [8, 384], sizes = [8, 128], strides = [1, 1]} : vector<24x512xf32> to vector<8x128xf32>
    %65 = vector.extract_strided_slice %50 {offsets = [16, 384], sizes = [8, 128], strides = [1, 1]} : vector<24x512xf32> to vector<8x128xf32>
    %66 = tpu.concatenate %63, %64, %65 in 1 : vector<8x128xf32>, vector<8x128xf32>, vector<8x128xf32> -> vector<8x384xf32>
    %67 = tpu.concatenate %54, %58, %62, %66 in 0 : vector<8x384xf32>, vector<8x384xf32>, vector<8x384xf32>, vector<8x384xf32> -> vector<32x384xf32>
    %c0_46 = arith.constant 0 : index
    %c0_47 = arith.constant 0 : index
    %68 = vector.load %arg4[%c0_46, %c0_47] : memref<384x128xf32, #tpu.memory_space<vmem>>, vector<384x128xf32>
    %cst_48 = arith.constant dense<0.000000e+00> : vector<32x128xf32>
    %69 = tpu.matmul %67, %68, %cst_48 {dimension_numbers = #tpu.dot_dimension_numbers<[1], [0], [0], [1], [0, 0, 1, 1], [], []>} : vector<32x384xf32>, vector<384x128xf32>, vector<32x128xf32> -> vector<32x128xf32>
    %70 = vector.extract_strided_slice %69 {offsets = [0, 0], sizes = [8, 128], strides = [1, 1]} : vector<32x128xf32> to vector<8x128xf32>
    %71 = vector.extract_strided_slice %69 {offsets = [8, 0], sizes = [8, 128], strides = [1, 1]} : vector<32x128xf32> to vector<8x128xf32>
    %72 = vector.extract_strided_slice %69 {offsets = [16, 0], sizes = [8, 128], strides = [1, 1]} : vector<32x128xf32> to vector<8x128xf32>
    %73 = vector.extract_strided_slice %69 {offsets = [24, 0], sizes = [8, 128], strides = [1, 1]} : vector<32x128xf32> to vector<8x128xf32>
    %74 = tpu.concatenate %70, %71, %72, %73 in 1 : vector<8x128xf32>, vector<8x128xf32>, vector<8x128xf32>, vector<8x128xf32> -> vector<8x512xf32>
    %75 = vector.broadcast %3 : vector<8x1xf32> to vector<8x512xf32>
    %76 = arith.addf %74, %75 : vector<8x512xf32>
    %77 = arith.addf %76, %48 : vector<8x512xf32>
    %cst_49 = arith.constant 0.000000e+00 : f32
    %78 = vector.broadcast %cst_49 : f32 to vector<8x512xf32>
    %79 = arith.maximumf %77, %78 : vector<8x512xf32>
    %80 = vector.extract_strided_slice %79 {offsets = [0, 0], sizes = [8, 64], strides = [1, 1]} : vector<8x512xf32> to vector<8x64xf32>
    %81 = vector.extract_strided_slice %79 {offsets = [0, 128], sizes = [8, 64], strides = [1, 1]} : vector<8x512xf32> to vector<8x64xf32>
    %82 = vector.extract_strided_slice %79 {offsets = [0, 256], sizes = [8, 64], strides = [1, 1]} : vector<8x512xf32> to vector<8x64xf32>
    %83 = vector.extract_strided_slice %79 {offsets = [0, 384], sizes = [8, 64], strides = [1, 1]} : vector<8x512xf32> to vector<8x64xf32>
    %84 = tpu.concatenate %80, %81, %82, %83 in 1 : vector<8x64xf32>, vector<8x64xf32>, vector<8x64xf32>, vector<8x64xf32> -> vector<8x256xf32>
    %85 = vector.extract_strided_slice %79 {offsets = [0, 16], sizes = [8, 64], strides = [1, 1]} : vector<8x512xf32> to vector<8x64xf32>
    %86 = vector.extract_strided_slice %79 {offsets = [0, 144], sizes = [8, 64], strides = [1, 1]} : vector<8x512xf32> to vector<8x64xf32>
    %87 = vector.extract_strided_slice %79 {offsets = [0, 272], sizes = [8, 64], strides = [1, 1]} : vector<8x512xf32> to vector<8x64xf32>
    %88 = vector.extract_strided_slice %79 {offsets = [0, 400], sizes = [8, 64], strides = [1, 1]} : vector<8x512xf32> to vector<8x64xf32>
    %89 = tpu.concatenate %85, %86, %87, %88 in 1 : vector<8x64xf32>, vector<8x64xf32>, vector<8x64xf32>, vector<8x64xf32> -> vector<8x256xf32>
    %90 = vector.extract_strided_slice %79 {offsets = [0, 32], sizes = [8, 64], strides = [1, 1]} : vector<8x512xf32> to vector<8x64xf32>
    %91 = vector.extract_strided_slice %79 {offsets = [0, 160], sizes = [8, 64], strides = [1, 1]} : vector<8x512xf32> to vector<8x64xf32>
    %92 = vector.extract_strided_slice %79 {offsets = [0, 288], sizes = [8, 64], strides = [1, 1]} : vector<8x512xf32> to vector<8x64xf32>
    %93 = vector.extract_strided_slice %79 {offsets = [0, 416], sizes = [8, 64], strides = [1, 1]} : vector<8x512xf32> to vector<8x64xf32>
    %94 = tpu.concatenate %90, %91, %92, %93 in 1 : vector<8x64xf32>, vector<8x64xf32>, vector<8x64xf32>, vector<8x64xf32> -> vector<8x256xf32>
    %95 = tpu.concatenate %84, %89, %94 in 0 : vector<8x256xf32>, vector<8x256xf32>, vector<8x256xf32> -> vector<24x256xf32>
    %c0_50 = arith.constant 0 : index
    %c0_51 = arith.constant 0 : index
    %96 = vector.load %arg5[%c0_50, %c0_51] : memref<8x24xf32, #tpu.memory_space<vmem>>, vector<8x24xf32>
    %cst_52 = arith.constant dense<0.000000e+00> : vector<8x256xf32>
    %97 = tpu.matmul %96, %95, %cst_52 {dimension_numbers = #tpu.dot_dimension_numbers<[1], [0], [0], [1], [0, 0, 1, 1], [], []>} : vector<8x24xf32>, vector<24x256xf32>, vector<8x256xf32> -> vector<8x256xf32>
    %98 = vector.broadcast %4 : vector<8x1xf32> to vector<8x256xf32>
    %99 = arith.addf %97, %98 : vector<8x256xf32>
    %100 = vector.extract_strided_slice %95 {offsets = [16, 0], sizes = [8, 256], strides = [1, 1]} : vector<24x256xf32> to vector<8x256xf32>
    %101 = arith.addf %99, %100 : vector<8x256xf32>
    %cst_53 = arith.constant 0.000000e+00 : f32
    %102 = vector.broadcast %cst_53 : f32 to vector<8x256xf32>
    %103 = arith.maximumf %101, %102 : vector<8x256xf32>
    %cst_54 = arith.constant dense<0.000000e+00> : vector<256xf32>
    %104 = vector.multi_reduction <add>, %103, %cst_54 [0] : vector<8x256xf32> to vector<256xf32>
    %105 = vector.shape_cast %104 : vector<256xf32> to vector<1x256xf32>
    %106 = arith.mulf %103, %103 : vector<8x256xf32>
    %cst_55 = arith.constant dense<0.000000e+00> : vector<256xf32>
    %107 = vector.multi_reduction <add>, %106, %cst_55 [0] : vector<8x256xf32> to vector<256xf32>
    %108 = vector.shape_cast %107 : vector<256xf32> to vector<1x256xf32>
    %109 = vector.extract_strided_slice %105 {offsets = [0, 0], sizes = [1, 64], strides = [1, 1]} : vector<1x256xf32> to vector<1x64xf32>
    %110 = vector.extract_strided_slice %105 {offsets = [0, 64], sizes = [1, 64], strides = [1, 1]} : vector<1x256xf32> to vector<1x64xf32>
    %111 = vector.extract_strided_slice %105 {offsets = [0, 128], sizes = [1, 64], strides = [1, 1]} : vector<1x256xf32> to vector<1x64xf32>
    %112 = vector.extract_strided_slice %105 {offsets = [0, 192], sizes = [1, 64], strides = [1, 1]} : vector<1x256xf32> to vector<1x64xf32>
    %113 = vector.extract_strided_slice %108 {offsets = [0, 0], sizes = [1, 64], strides = [1, 1]} : vector<1x256xf32> to vector<1x64xf32>
    %114 = vector.extract_strided_slice %108 {offsets = [0, 64], sizes = [1, 64], strides = [1, 1]} : vector<1x256xf32> to vector<1x64xf32>
    %115 = vector.extract_strided_slice %108 {offsets = [0, 128], sizes = [1, 64], strides = [1, 1]} : vector<1x256xf32> to vector<1x64xf32>
    %116 = vector.extract_strided_slice %108 {offsets = [0, 192], sizes = [1, 64], strides = [1, 1]} : vector<1x256xf32> to vector<1x64xf32>
    %117 = tpu.concatenate %109, %110, %111, %112, %113, %114, %115, %116 in 0 : vector<1x64xf32>, vector<1x64xf32>, vector<1x64xf32>, vector<1x64xf32>, vector<1x64xf32>, vector<1x64xf32>, vector<1x64xf32>, vector<1x64xf32> -> vector<8x64xf32>
    %c0_56 = arith.constant 0 : index
    %c0_57 = arith.constant 0 : index
    %118 = vector.load %arg8[%c0_56, %c0_57] : memref<64x64xf32, #tpu.memory_space<vmem>>, vector<64x64xf32>
    %cst_58 = arith.constant dense<0.000000e+00> : vector<8x64xf32>
    %119 = tpu.matmul %117, %118, %cst_58 {dimension_numbers = #tpu.dot_dimension_numbers<[1], [0], [0], [1], [0, 0, 1, 1], [], []>} : vector<8x64xf32>, vector<64x64xf32>, vector<8x64xf32> -> vector<8x64xf32>
    %c0_59 = arith.constant 0 : index
    %c0_60 = arith.constant 0 : index
    %120 = vector.load %arg7[%c0_59, %c0_60] : memref<16x64xf32, #tpu.memory_space<vmem>>, vector<8x64xf32>
    %c8 = arith.constant 8 : index
    %c0_61 = arith.constant 0 : index
    %121 = vector.load %arg7[%c8, %c0_61] : memref<16x64xf32, #tpu.memory_space<vmem>>, vector<8x64xf32>
    %122 = vector.extract_strided_slice %119 {offsets = [0, 0], sizes = [1, 64], strides = [1, 1]} : vector<8x64xf32> to vector<1x64xf32>
    %123 = vector.extract_strided_slice %119 {offsets = [4, 0], sizes = [1, 64], strides = [1, 1]} : vector<8x64xf32> to vector<1x64xf32>
    %124 = arith.mulf %122, %122 : vector<1x64xf32>
    %125 = arith.subf %123, %124 : vector<1x64xf32>
    %cst_62 = arith.constant 9.99999974E-6 : f32
    %126 = vector.broadcast %cst_62 : f32 to vector<1x64xf32>
    %127 = arith.addf %125, %126 : vector<1x64xf32>
    %128 = math.rsqrt %127 : vector<1x64xf32>
    %129 = vector.extract_strided_slice %103 {offsets = [0, 0], sizes = [8, 64], strides = [1, 1]} : vector<8x256xf32> to vector<8x64xf32>
    %130 = vector.broadcast %122 : vector<1x64xf32> to vector<8x64xf32>
    %131 = arith.subf %129, %130 : vector<8x64xf32>
    %132 = vector.broadcast %128 : vector<1x64xf32> to vector<8x64xf32>
    %133 = arith.mulf %131, %132 : vector<8x64xf32>
    %134 = arith.mulf %133, %120 : vector<8x64xf32>
    %135 = arith.addf %134, %121 : vector<8x64xf32>
    %c0_63 = arith.constant 0 : index
    %c0_64 = arith.constant 0 : index
    %c0_65 = arith.constant 0 : index
    %136 = vector.load %arg9[%c0_63, %c0_64, %c0_65] : memref<4x8x64xf32, #tpu.memory_space<vmem>>, vector<1x8x64xf32>
    %137 = vector.shape_cast %136 : vector<1x8x64xf32> to vector<8x64xf32>
    %138 = vector.shape_cast %135 : vector<8x64xf32> to vector<1x8x64xf32>
    tpu.vector_store %arg9[%c0_63, %c0_64, %c0_65], %138 {strides = array<i32>} : memref<4x8x64xf32, #tpu.memory_space<vmem>>, vector<1x8x64xf32>,
    %139 = vector.extract_strided_slice %119 {offsets = [1, 0], sizes = [1, 64], strides = [1, 1]} : vector<8x64xf32> to vector<1x64xf32>
    %140 = vector.extract_strided_slice %119 {offsets = [5, 0], sizes = [1, 64], strides = [1, 1]} : vector<8x64xf32> to vector<1x64xf32>
    %141 = arith.mulf %139, %139 : vector<1x64xf32>
    %142 = arith.subf %140, %141 : vector<1x64xf32>
    %cst_66 = arith.constant 9.99999974E-6 : f32
    %143 = vector.broadcast %cst_66 : f32 to vector<1x64xf32>
    %144 = arith.addf %142, %143 : vector<1x64xf32>
    %145 = math.rsqrt %144 : vector<1x64xf32>
    %146 = vector.extract_strided_slice %103 {offsets = [0, 64], sizes = [8, 64], strides = [1, 1]} : vector<8x256xf32> to vector<8x64xf32>
    %147 = vector.broadcast %139 : vector<1x64xf32> to vector<8x64xf32>
    %148 = arith.subf %146, %147 : vector<8x64xf32>
    %149 = vector.broadcast %145 : vector<1x64xf32> to vector<8x64xf32>
    %150 = arith.mulf %148, %149 : vector<8x64xf32>
    %151 = arith.mulf %150, %120 : vector<8x64xf32>
    %152 = arith.addf %151, %121 : vector<8x64xf32>
    %c1_67 = arith.constant 1 : index
    %c0_68 = arith.constant 0 : index
    %c0_69 = arith.constant 0 : index
    %153 = vector.load %arg9[%c1_67, %c0_68, %c0_69] : memref<4x8x64xf32, #tpu.memory_space<vmem>>, vector<1x8x64xf32>
    %154 = vector.shape_cast %153 : vector<1x8x64xf32> to vector<8x64xf32>
    %155 = vector.shape_cast %152 : vector<8x64xf32> to vector<1x8x64xf32>
    tpu.vector_store %arg9[%c1_67, %c0_68, %c0_69], %155 {strides = array<i32>} : memref<4x8x64xf32, #tpu.memory_space<vmem>>, vector<1x8x64xf32>,
    %156 = vector.extract_strided_slice %119 {offsets = [2, 0], sizes = [1, 64], strides = [1, 1]} : vector<8x64xf32> to vector<1x64xf32>
    %157 = vector.extract_strided_slice %119 {offsets = [6, 0], sizes = [1, 64], strides = [1, 1]} : vector<8x64xf32> to vector<1x64xf32>
    %158 = arith.mulf %156, %156 : vector<1x64xf32>
    %159 = arith.subf %157, %158 : vector<1x64xf32>
    %cst_70 = arith.constant 9.99999974E-6 : f32
    %160 = vector.broadcast %cst_70 : f32 to vector<1x64xf32>
    %161 = arith.addf %159, %160 : vector<1x64xf32>
    %162 = math.rsqrt %161 : vector<1x64xf32>
    %163 = vector.extract_strided_slice %103 {offsets = [0, 128], sizes = [8, 64], strides = [1, 1]} : vector<8x256xf32> to vector<8x64xf32>
    %164 = vector.broadcast %156 : vector<1x64xf32> to vector<8x64xf32>
    %165 = arith.subf %163, %164 : vector<8x64xf32>
    %166 = vector.broadcast %162 : vector<1x64xf32> to vector<8x64xf32>
    %167 = arith.mulf %165, %166 : vector<8x64xf32>
    %168 = arith.mulf %167, %120 : vector<8x64xf32>
    %169 = arith.addf %168, %121 : vector<8x64xf32>
    %c2_71 = arith.constant 2 : index
    %c0_72 = arith.constant 0 : index
    %c0_73 = arith.constant 0 : index
    %170 = vector.load %arg9[%c2_71, %c0_72, %c0_73] : memref<4x8x64xf32, #tpu.memory_space<vmem>>, vector<1x8x64xf32>
    %171 = vector.shape_cast %170 : vector<1x8x64xf32> to vector<8x64xf32>
    %172 = vector.shape_cast %169 : vector<8x64xf32> to vector<1x8x64xf32>
    tpu.vector_store %arg9[%c2_71, %c0_72, %c0_73], %172 {strides = array<i32>} : memref<4x8x64xf32, #tpu.memory_space<vmem>>, vector<1x8x64xf32>,
    %173 = vector.extract_strided_slice %119 {offsets = [3, 0], sizes = [1, 64], strides = [1, 1]} : vector<8x64xf32> to vector<1x64xf32>
    %174 = vector.extract_strided_slice %119 {offsets = [7, 0], sizes = [1, 64], strides = [1, 1]} : vector<8x64xf32> to vector<1x64xf32>
    %175 = arith.mulf %173, %173 : vector<1x64xf32>
    %176 = arith.subf %174, %175 : vector<1x64xf32>
    %cst_74 = arith.constant 9.99999974E-6 : f32
    %177 = vector.broadcast %cst_74 : f32 to vector<1x64xf32>
    %178 = arith.addf %176, %177 : vector<1x64xf32>
    %179 = math.rsqrt %178 : vector<1x64xf32>
    %180 = vector.extract_strided_slice %103 {offsets = [0, 192], sizes = [8, 64], strides = [1, 1]} : vector<8x256xf32> to vector<8x64xf32>
    %181 = vector.broadcast %173 : vector<1x64xf32> to vector<8x64xf32>
    %182 = arith.subf %180, %181 : vector<8x64xf32>
    %183 = vector.broadcast %179 : vector<1x64xf32> to vector<8x64xf32>
    %184 = arith.mulf %182, %183 : vector<8x64xf32>
    %185 = arith.mulf %184, %120 : vector<8x64xf32>
    %186 = arith.addf %185, %121 : vector<8x64xf32>
    %c3_75 = arith.constant 3 : index
    %c0_76 = arith.constant 0 : index
    %c0_77 = arith.constant 0 : index
    %187 = vector.load %arg9[%c3_75, %c0_76, %c0_77] : memref<4x8x64xf32, #tpu.memory_space<vmem>>, vector<1x8x64xf32>
    %188 = vector.shape_cast %187 : vector<1x8x64xf32> to vector<8x64xf32>
    %189 = vector.shape_cast %186 : vector<8x64xf32> to vector<1x8x64xf32>
    tpu.vector_store %arg9[%c3_75, %c0_76, %c0_77], %189 {strides = array<i32>} : memref<4x8x64xf32, #tpu.memory_space<vmem>>, vector<1x8x64xf32>,
    return
  }
  func.func @transform_0(%arg0: i32) -> (i32, i32, i32) {
    %c0_i32 = arith.constant 0 : i32
    %c0_i32_0 = arith.constant 0 : i32
    %c0_i32_1 = arith.constant 0 : i32
    return %arg0, %c0_i32, %c0_i32_0 : i32, i32, i32
  }
  func.func @transform_1(%arg0: i32) -> (i32, i32) {
    %c0_i32 = arith.constant 0 : i32
    %c0_i32_0 = arith.constant 0 : i32
    %c0_i32_1 = arith.constant 0 : i32
    return %c0_i32, %c0_i32_0 : i32, i32
  }
  func.func @transform_2(%arg0: i32) -> (i32, i32) {
    %c0_i32 = arith.constant 0 : i32
    %c0_i32_0 = arith.constant 0 : i32
    %c0_i32_1 = arith.constant 0 : i32
    return %c0_i32, %c0_i32_0 : i32, i32
  }
  func.func @transform_3(%arg0: i32) -> (i32, i32) {
    %c0_i32 = arith.constant 0 : i32
    %c0_i32_0 = arith.constant 0 : i32
    %c0_i32_1 = arith.constant 0 : i32
    return %c0_i32, %c0_i32_0 : i32, i32
  }
  func.func @transform_4(%arg0: i32) -> (i32, i32) {
    %c0_i32 = arith.constant 0 : i32
    %c0_i32_0 = arith.constant 0 : i32
    %c0_i32_1 = arith.constant 0 : i32
    return %c0_i32, %c0_i32_0 : i32, i32
  }
  func.func @transform_5(%arg0: i32) -> (i32, i32) {
    %c0_i32 = arith.constant 0 : i32
    %c0_i32_0 = arith.constant 0 : i32
    %c0_i32_1 = arith.constant 0 : i32
    return %c0_i32, %c0_i32_0 : i32, i32
  }
  func.func @transform_6(%arg0: i32) -> (i32, i32) {
    %c0_i32 = arith.constant 0 : i32
    %c0_i32_0 = arith.constant 0 : i32
    %c0_i32_1 = arith.constant 0 : i32
    return %c0_i32, %c0_i32_0 : i32, i32
  }
  func.func @transform_7(%arg0: i32) -> (i32, i32) {
    %c0_i32 = arith.constant 0 : i32
    %c0_i32_0 = arith.constant 0 : i32
    %c0_i32_1 = arith.constant 0 : i32
    return %c0_i32, %c0_i32_0 : i32, i32
  }
  func.func @transform_8(%arg0: i32) -> (i32, i32, i32) {
    %c0_i32 = arith.constant 0 : i32
    %c0_i32_0 = arith.constant 0 : i32
    %c0_i32_1 = arith.constant 0 : i32
    return %arg0, %c0_i32, %c0_i32_0 : i32, i32, i32
  }
}

module attributes {stable_mosaic.version = 11 : i64} {
  func.func @_outlayer_kernel(%arg0: i32, %arg1: memref<32x128xf32, #tpu.memory_space<vmem>>, %arg2: memref<16x32xf32, #tpu.memory_space<vmem>>, %arg3: memref<8x8xf32, #tpu.memory_space<vmem>>, %arg4: memref<1x8xf32, #tpu.memory_space<vmem>>, %arg5: memref<8x4xf32, #tpu.memory_space<vmem>>, %arg6: memref<16x128xf32, #tpu.memory_space<vmem>>, %arg7: memref<128x128xf32, #tpu.memory_space<vmem>>, %arg8: memref<1x128xf32, #tpu.memory_space<vmem>>) attributes {dimension_semantics = [#tpu.dimension_semantics<arbitrary>], iteration_bounds = array<i64: 1>, scalar_prefetch = 0 : i64, scratch_operands = 0 : i64, tpu.core_type = #tpu.core_type<tc>, window_params = [{pipeline_mode = #tpu.pipeline_mode<synchronous>, transform_indices = @transform_0, window_bounds = array<i64: 32, 128>}, {pipeline_mode = #tpu.pipeline_mode<synchronous>, transform_indices = @transform_1, window_bounds = array<i64: 16, 32>}, {pipeline_mode = #tpu.pipeline_mode<synchronous>, transform_indices = @transform_2, window_bounds = array<i64: 8, 8>}, {pipeline_mode = #tpu.pipeline_mode<synchronous>, transform_indices = @transform_3, window_bounds = array<i64: 1, 8>}, {pipeline_mode = #tpu.pipeline_mode<synchronous>, transform_indices = @transform_4, window_bounds = array<i64: 8, 4>}, {pipeline_mode = #tpu.pipeline_mode<synchronous>, transform_indices = @transform_5, window_bounds = array<i64: 16, 128>}, {pipeline_mode = #tpu.pipeline_mode<synchronous>, transform_indices = @transform_6, window_bounds = array<i64: 128, 128>}, {pipeline_mode = #tpu.pipeline_mode<synchronous>, transform_indices = @transform_7, window_bounds = array<i64: 1, 128>}]} {
    %c0 = arith.constant 0 : index
    %c0_0 = arith.constant 0 : index
    %0 = vector.load %arg5[%c0, %c0_0] : memref<8x4xf32, #tpu.memory_space<vmem>>, vector<8x1xf32>
    %c0_1 = arith.constant 0 : index
    %c1 = arith.constant 1 : index
    %1 = vector.load %arg5[%c0_1, %c1] : memref<8x4xf32, #tpu.memory_space<vmem>>, vector<8x1xf32>
    %2 = tpu.concatenate %0, %1 in 0 : vector<8x1xf32>, vector<8x1xf32> -> vector<16x1xf32>
    %c0_2 = arith.constant 0 : index
    %c2 = arith.constant 2 : index
    %3 = vector.load %arg5[%c0_2, %c2] : memref<8x4xf32, #tpu.memory_space<vmem>>, vector<8x1xf32>
    %c0_3 = arith.constant 0 : index
    %c3 = arith.constant 3 : index
    %4 = vector.load %arg5[%c0_3, %c3] : memref<8x4xf32, #tpu.memory_space<vmem>>, vector<1x1xf32>
    %c0_4 = arith.constant 0 : index
    %c0_5 = arith.constant 0 : index
    %5 = vector.load %arg1[%c0_4, %c0_5] : memref<32x128xf32, #tpu.memory_space<vmem>>, vector<32x128xf32>
    %c0_6 = arith.constant 0 : index
    %c0_7 = arith.constant 0 : index
    %6 = vector.load %arg2[%c0_6, %c0_7] : memref<16x32xf32, #tpu.memory_space<vmem>>, vector<16x32xf32>
    %cst = arith.constant dense<0.000000e+00> : vector<16x128xf32>
    %7 = tpu.matmul %6, %5, %cst {dimension_numbers = #tpu.dot_dimension_numbers<[1], [0], [0], [1], [0, 0, 1, 1], [], []>} : vector<16x32xf32>, vector<32x128xf32>, vector<16x128xf32> -> vector<16x128xf32>
    %8 = vector.broadcast %2 : vector<16x1xf32> to vector<16x128xf32>
    %9 = arith.addf %7, %8 : vector<16x128xf32>
    %10 = vector.extract_strided_slice %5 {offsets = [24, 0], sizes = [8, 128], strides = [1, 1]} : vector<32x128xf32> to vector<8x128xf32>
    %11 = vector.extract_strided_slice %9 {offsets = [0, 0], sizes = [8, 128], strides = [1, 1]} : vector<16x128xf32> to vector<8x128xf32>
    %12 = arith.addf %11, %10 : vector<8x128xf32>
    %13 = vector.extract_strided_slice %9 {offsets = [8, 0], sizes = [8, 128], strides = [1, 1]} : vector<16x128xf32> to vector<8x128xf32>
    %cst_8 = arith.constant 0.000000e+00 : f32
    %14 = vector.broadcast %cst_8 : f32 to vector<8x128xf32>
    %15 = arith.subf %14, %13 : vector<8x128xf32>
    %16 = math.exp %15 : vector<8x128xf32>
    %cst_9 = arith.constant 1.000000e+00 : f32
    %17 = vector.broadcast %cst_9 : f32 to vector<8x128xf32>
    %18 = arith.addf %17, %16 : vector<8x128xf32>
    %cst_10 = arith.constant 1.000000e+00 : f32
    %19 = vector.broadcast %cst_10 : f32 to vector<8x128xf32>
    %20 = arith.divf %19, %18 : vector<8x128xf32>
    %21 = arith.mulf %12, %20 : vector<8x128xf32>
    %cst_11 = arith.constant dense<0.000000e+00> : vector<128xf32>
    %22 = vector.multi_reduction <add>, %21, %cst_11 [0] : vector<8x128xf32> to vector<128xf32>
    %23 = vector.shape_cast %22 : vector<128xf32> to vector<1x128xf32>
    %24 = arith.mulf %21, %21 : vector<8x128xf32>
    %cst_12 = arith.constant dense<0.000000e+00> : vector<128xf32>
    %25 = vector.multi_reduction <add>, %24, %cst_12 [0] : vector<8x128xf32> to vector<128xf32>
    %26 = vector.shape_cast %25 : vector<128xf32> to vector<1x128xf32>
    %27 = tpu.concatenate %23, %26 in 0 : vector<1x128xf32>, vector<1x128xf32> -> vector<2x128xf32>
    %c0_13 = arith.constant 0 : index
    %c0_14 = arith.constant 0 : index
    %28 = vector.load %arg7[%c0_13, %c0_14] : memref<128x128xf32, #tpu.memory_space<vmem>>, vector<128x128xf32>
    %cst_15 = arith.constant dense<0.000000e+00> : vector<2x128xf32>
    %29 = tpu.matmul %27, %28, %cst_15 {dimension_numbers = #tpu.dot_dimension_numbers<[1], [0], [0], [1], [0, 0, 1, 1], [], []>} : vector<2x128xf32>, vector<128x128xf32>, vector<2x128xf32> -> vector<2x128xf32>
    %30 = vector.extract_strided_slice %29 {offsets = [0, 0], sizes = [1, 128], strides = [1, 1]} : vector<2x128xf32> to vector<1x128xf32>
    %31 = vector.extract_strided_slice %29 {offsets = [1, 0], sizes = [1, 128], strides = [1, 1]} : vector<2x128xf32> to vector<1x128xf32>
    %32 = arith.mulf %30, %30 : vector<1x128xf32>
    %33 = arith.subf %31, %32 : vector<1x128xf32>
    %cst_16 = arith.constant 9.99999974E-6 : f32
    %34 = vector.broadcast %cst_16 : f32 to vector<1x128xf32>
    %35 = arith.addf %33, %34 : vector<1x128xf32>
    %36 = math.rsqrt %35 : vector<1x128xf32>
    %37 = vector.broadcast %30 : vector<1x128xf32> to vector<8x128xf32>
    %38 = arith.subf %21, %37 : vector<8x128xf32>
    %39 = vector.broadcast %36 : vector<1x128xf32> to vector<8x128xf32>
    %40 = arith.mulf %38, %39 : vector<8x128xf32>
    %c0_17 = arith.constant 0 : index
    %c0_18 = arith.constant 0 : index
    %41 = vector.load %arg6[%c0_17, %c0_18] : memref<16x128xf32, #tpu.memory_space<vmem>>, vector<8x128xf32>
    %42 = arith.mulf %40, %41 : vector<8x128xf32>
    %c8 = arith.constant 8 : index
    %c0_19 = arith.constant 0 : index
    %43 = vector.load %arg6[%c8, %c0_19] : memref<16x128xf32, #tpu.memory_space<vmem>>, vector<8x128xf32>
    %44 = arith.addf %42, %43 : vector<8x128xf32>
    %c0_20 = arith.constant 0 : index
    %c0_21 = arith.constant 0 : index
    %45 = vector.load %arg3[%c0_20, %c0_21] : memref<8x8xf32, #tpu.memory_space<vmem>>, vector<8x8xf32>
    %cst_22 = arith.constant dense<0.000000e+00> : vector<8x128xf32>
    %46 = tpu.matmul %45, %44, %cst_22 {dimension_numbers = #tpu.dot_dimension_numbers<[1], [0], [0], [1], [0, 0, 1, 1], [], []>} : vector<8x8xf32>, vector<8x128xf32>, vector<8x128xf32> -> vector<8x128xf32>
    %47 = vector.broadcast %3 : vector<8x1xf32> to vector<8x128xf32>
    %48 = arith.addf %46, %47 : vector<8x128xf32>
    %49 = arith.addf %48, %44 : vector<8x128xf32>
    %cst_23 = arith.constant 0.000000e+00 : f32
    %50 = vector.broadcast %cst_23 : f32 to vector<8x128xf32>
    %51 = arith.subf %50, %49 : vector<8x128xf32>
    %52 = math.exp %51 : vector<8x128xf32>
    %cst_24 = arith.constant 1.000000e+00 : f32
    %53 = vector.broadcast %cst_24 : f32 to vector<8x128xf32>
    %54 = arith.addf %53, %52 : vector<8x128xf32>
    %cst_25 = arith.constant 1.000000e+00 : f32
    %55 = vector.broadcast %cst_25 : f32 to vector<8x128xf32>
    %56 = arith.divf %55, %54 : vector<8x128xf32>
    %c0_26 = arith.constant 0 : index
    %c0_27 = arith.constant 0 : index
    %57 = vector.load %arg4[%c0_26, %c0_27] : memref<1x8xf32, #tpu.memory_space<vmem>>, vector<1x8xf32>
    %cst_28 = arith.constant dense<0.000000e+00> : vector<1x128xf32>
    %58 = tpu.matmul %57, %56, %cst_28 {dimension_numbers = #tpu.dot_dimension_numbers<[1], [0], [0], [1], [0, 0, 1, 1], [], []>} : vector<1x8xf32>, vector<8x128xf32>, vector<1x128xf32> -> vector<1x128xf32>
    %59 = vector.broadcast %4 : vector<1x1xf32> to vector<1x128xf32>
    %60 = arith.addf %58, %59 : vector<1x128xf32>
    %c0_29 = arith.constant 0 : index
    %c0_30 = arith.constant 0 : index
    %61 = vector.load %arg8[%c0_29, %c0_30] : memref<1x128xf32, #tpu.memory_space<vmem>>, vector<1x128xf32>
    tpu.vector_store %arg8[%c0_29, %c0_30], %60 {strides = array<i32>} : memref<1x128xf32, #tpu.memory_space<vmem>>, vector<1x128xf32>,
    return
  }
  func.func @transform_0(%arg0: i32) -> (i32, i32) {
    %c0_i32 = arith.constant 0 : i32
    %c0_i32_0 = arith.constant 0 : i32
    %c0_i32_1 = arith.constant 0 : i32
    return %c0_i32, %c0_i32_0 : i32, i32
  }
  func.func @transform_1(%arg0: i32) -> (i32, i32) {
    %c0_i32 = arith.constant 0 : i32
    %c0_i32_0 = arith.constant 0 : i32
    %c0_i32_1 = arith.constant 0 : i32
    return %c0_i32, %c0_i32_0 : i32, i32
  }
  func.func @transform_2(%arg0: i32) -> (i32, i32) {
    %c0_i32 = arith.constant 0 : i32
    %c0_i32_0 = arith.constant 0 : i32
    %c0_i32_1 = arith.constant 0 : i32
    return %c0_i32, %c0_i32_0 : i32, i32
  }
  func.func @transform_3(%arg0: i32) -> (i32, i32) {
    %c0_i32 = arith.constant 0 : i32
    %c0_i32_0 = arith.constant 0 : i32
    %c0_i32_1 = arith.constant 0 : i32
    return %c0_i32, %c0_i32_0 : i32, i32
  }
  func.func @transform_4(%arg0: i32) -> (i32, i32) {
    %c0_i32 = arith.constant 0 : i32
    %c0_i32_0 = arith.constant 0 : i32
    %c0_i32_1 = arith.constant 0 : i32
    return %c0_i32, %c0_i32_0 : i32, i32
  }
  func.func @transform_5(%arg0: i32) -> (i32, i32) {
    %c0_i32 = arith.constant 0 : i32
    %c0_i32_0 = arith.constant 0 : i32
    %c0_i32_1 = arith.constant 0 : i32
    return %c0_i32, %c0_i32_0 : i32, i32
  }
  func.func @transform_6(%arg0: i32) -> (i32, i32) {
    %c0_i32 = arith.constant 0 : i32
    %c0_i32_0 = arith.constant 0 : i32
    %c0_i32_1 = arith.constant 0 : i32
    return %c0_i32, %c0_i32_0 : i32, i32
  }
  func.func @transform_7(%arg0: i32) -> (i32, i32) {
    %c0_i32 = arith.constant 0 : i32
    %c0_i32_0 = arith.constant 0 : i32
    %c0_i32_1 = arith.constant 0 : i32
    return %c0_i32, %c0_i32_0 : i32, i32
  }
}

</mosaic_0001>

<bundles_post_ra>
// kernel: forward.4
= control target key start
LH: loop header
LB: loop body
LE: loop exit
PB: predicated region body
PF: predicated region fallthrough
CT: control target
= control target key end

     0   :  { %s1812_s27 = smov 0   ;;  %s2171_s0 = inlined_call_operand.vmem [shape: f32[8,8,160], index: 0, kind: input, shape index: {}]   ;;  %s2172_s1 = inlined_call_operand.vmem [shape: f32[16,24], index: 1, kind: input, shape index: {}]   ;;  %s2173_s2 = inlined_call_operand.vmem [shape: f32[24,8], index: 2, kind: input, shape index: {}]   ;;  %s2174_s3 = inlined_call_operand.vmem [shape: f32[384,128], index: 3, kind: input, shape index: {}]   ;;  %s2175_s4 = inlined_call_operand.vmem [shape: f32[8,24], index: 4, kind: input, shape index: {}]   ;;  %s2176_s5 = inlined_call_operand.vmem [shape: f32[8,4], index: 5, kind: input, shape index: {}]   ;;  %s2177_s6 = inlined_call_operand.vmem [shape: f32[16,64], index: 6, kind: input, shape index: {}]   ;;  %s2178_s7 = inlined_call_operand.vmem [shape: f32[64,64], index: 7, kind: input, shape index: {}]   ;;  %s2179_s8 = inlined_call_operand.vmem [shape: f32[8,8,64], index: 8, kind: output, shape index: {}]  }
   0x1 LB: > { %s1414_s28 = sadd.s32 4294967295, %s1753_s27   ;;  %p1418_p0 = scmp.ge.s32.totalorder %s1753_s27, 1  ;;  %s1753_s27 = sphi %s1812_s27, %s18_s27  }
   0x2   : > { %p264_p1 = scmp.lt.s32.totalorder %s1753_s27, 3 }
   0x4   : > { %p265_p2 = pnand %p1418_p0, %p264_p1 }
   0x5   : > { %s1419_s29 = sshll.u32 (!%p265_p2), %s1414_s28, 2  ;;  %s1755_s12 = smov (!%p265_p2), 112   ;;  %v1756_v11 = vmov (!%p265_p2), 0.0   ;;  %v1758_v13 = vmov (!%p265_p2), 0   ;;  %v1851_v14 = vld [vmem:[%s2176_s5] sm:$0xff] (!%p265_p2)  ;;  %vm333_vm0 = vcmask (!%p265_p2), 916480  }
   0x6   : > { %268 = sbr.rel (%p265_p2) target bundleno = 1810 (0x712), region = 52  ;;  %p300_p3 = scmp.lt.s32.totalorder (!%p265_p2), %s1419_s29, 7  ;;  %466 = vmatprep.mubr.f32.mxu0 (!%p265_p2), %v1756_v11  ;;  %472 = vmatprep.mubr.f32.mxu1 (!%p265_p2), %v1756_v11  ;;  %vm364_vm1 = vcmask (!%p265_p2), 785408   ;;  %v385_v38 = vld [vmem:[%s2172_s1] sm:$0xff] (!%p265_p2)  ;;  %vm395_vm2 = vcmask (!%p265_p2), 195584   ;;  %v386_v39 = vld [vmem:[%s2172_s1 + $0x8] sm:$0xff] (!%p265_p2) }
   0x7   : > { %s1757_s13 = smov (!%p265_p2), 96   ;;  %1711 = vset.pattern.permute.xlu0 (!%p265_p2), %v1758_v13  ;;  %1710 = vset.pattern.permute.xlu1 (!%p265_p2), %v1758_v13  ;;  %s1759_s16 = smov (!%p265_p2), 127   ;;  %vm591_vm3 = vcmask (!%p265_p2), 64512   ;;  %vm1009_vm4 = vcmask (!%p265_p2), 523264   ;;  %vm1766_vm5 = vmmov (!%p265_p2), 0   ;;  %vm1167_vm6 = vcmask (!%p265_p2), 1040384  }
   0x8   : > { %s1761_s15 = smov (!%p265_p2), 64   ;;  %s1764_s17 = smov (!%p265_p2), 32   ;;  %vm1169_vm7 = vcmask (!%p265_p2), 1041408   ;;  %vm1171_vm8 = vcmask (!%p265_p2), 1042432   ;;  %vm1173_vm9 = vcmask (!%p265_p2), 1043456   ;;  %vm1175_vm10 = vcmask (!%p265_p2), 1044480  }
   0x9   : > { %vm1177_vm11 = vcmask (!%p265_p2), 1045504   ;;  %vm1179_vm12 = vcmask (!%p265_p2), 1046528  }
   0xd   : > { %s2181_s29 = smov (!%p300_p3, %s1419_s29), 7 }
   0xe   : > { %s1447_s30 = sshll.u32 %s2181_s29, 4 }
   0xf   : > { %s304_s11 = scalar_lea.vmem %s2171_s0, %s1447_s30 }
  0x10   : > { %v1826_v0 = vld [vmem:[%s304_s11 + $0x30] sm:$0xff]  ;;  %v1429_v1 = vld [vmem:[%s304_s11 + $0x38] sm:$0xff]  ;;  %v316_v5 = vld [vmem:[%s304_s11] sm:$0xff] }
  0x11   : > { %v1424_v2 = vld [vmem:[%s304_s11 + $0x10] sm:$0xff]  ;;  %v1700_v3 = vpack.i.bf16 %v1429_v1, %v1826_v0  ;;  %v1427_v4 = vld [vmem:[%s304_s11 + $0x18] sm:$0xff]  ;;  %v323_v6 = vld [vmem:[%s304_s11 + $0x8] sm:$0xff] }
  0x12   : > { %v1690_v7 = vpack.i.bf16 %v1427_v4, %v1424_v2  ;;  %v1695_v8 = vpack.i.bf16 %v323_v6, %v316_v5  ;;  %v1831_v9 = vld [vmem:[%s304_s11 + $0x20] sm:$0xff]  ;;  %v1428_v10 = vld [vmem:[%s304_s11 + $0x28] sm:$0xff] }
  0x13   : > { %1701 = vrot.lane.b32.xlu1 %v1700_v3, %s1755_s12  ;;  %v1705_v12 = vpack.i.bf16 %v1428_v10, %v1831_v9 }
  0x14   : > { %1691 = vrot.lane.b32.xlu0 %v1690_v7, %s1755_s12 }
  0x17   : > { %367 = vrot.lane.b32.xlu1 %v1424_v2, %s1757_s13 }
  0x18   : > { %1696 = vrot.lane.b32.xlu0 %v1695_v8, %s1755_s12 }
  0x1b   : > { %1706 = vrot.lane.b32.xlu1 %v1705_v12, %s1755_s12 }
  0x1c   : > { %369 = vrot.lane.b32.xlu0 %v1427_v4, %s1757_s13 }
  0x1f   : > { %362 = vrot.lane.b32.xlu1 %v323_v6, %s1757_s13 }
  0x20   : > { %360 = vrot.lane.b32.xlu0 %v316_v5, %s1757_s13 }
  0x23   : > { %381 = vrot.lane.b32.xlu1 %v1429_v1, %s1757_s13 }
  0x24   : > { %379 = vrot.lane.b32.xlu0 %v1826_v0, %s1757_s13 }
  0x27   : > { %375 = vrot.lane.b32.xlu1 %v1428_v10, %s1757_s13 }
  0x28   : > { %373 = vrot.lane.b32.xlu0 %v1831_v9, %s1757_s13 }
  0x2c   : > { %314 = vrot.lane.b32.xlu0 %v1851_v14, %s1759_s16  ;;  %s1763_s16 = smov 48  }
  0x30   : > { %388 = vperm.xlu0 %1711, %v1851_v14  }
  0x85   : > { %v1702_v15 = vpop.permute.xlu1 %1701 }
  0x86   : > { %v1692_v16 = vpop.permute.xlu0 %1691  ;;  %v1704_v25 = vunpack.i.h.bf16 %v1702_v15  ;;  %v1703_v26 = vunpack.i.l.bf16 %v1702_v15 }
  0x87   : > { %v1694_v17 = vunpack.i.h.bf16 %v1692_v16  ;;  %v1693_v18 = vunpack.i.l.bf16 %v1692_v16 }
  0x88   : > { %v358_v35 = vsel %vm333_vm0, %v1703_v26, %v1704_v25 }
  0x89   : > { %v368_v19 = vpop.permute.xlu1 %367  ;;  %v342_v20 = vsel %vm333_vm0, %v1693_v18, %v1694_v17  ;;  %v1582_v41 = vpack.c.bf16 %v358_v35, %v1826_v0  ;;  %v783_v18 = vld [vmem:[%s2174_s3 + $0x80] sm:$0xff] }
  0x8a   : > { %v1697_v21 = vpop.permute.xlu0 %1696  ;;  %v1578_v22 = vpack.c.bf16 %v342_v20, %v1424_v2 }
  0x8b   : > { %v1699_v23 = vunpack.i.h.bf16 %v1697_v21  ;;  %v1698_v24 = vunpack.i.l.bf16 %v1697_v21 }
  0x8c   : > { %1579 = vmatprep.subr.bf16.mxu0 %v1578_v22  ;;  %1666 = vmatprep.subr.bf16.mxu1 %v1578_v22 }
  0x8d   : > { %v1707_v27 = vpop.permute.xlu1 %1706  ;;  %v334_v28 = vsel %vm333_vm0, %v1698_v24, %v1699_v23  ;;  %v767_v23 = vld [vmem:[%s2174_s3] sm:$0xff]  ;;  %v768_v24 = vld [vmem:[%s2174_s3 + $0x8] sm:$0xff] }
  0x8e   : > { %v1709_v29 = vunpack.i.h.bf16 %v1707_v27  ;;  %v1708_v30 = vunpack.i.l.bf16 %v1707_v27  ;;  %v370_v31 = vpop.permute.xlu0 %369  ;;  %v1580_v32 = vpack.c.bf16 %v334_v28, %v316_v5  ;;  %v785_v27 = vld [vmem:[%s2174_s3 + $0x90] sm:$0xff]  ;;  %v786_v28 = vld [vmem:[%s2174_s3 + $0x98] sm:$0xff] }
  0x8f   : > { %v1858_v33 = vsel %vm364_vm1, %v368_v19, %v370_v31  ;;  %v784_v19 = vld [vmem:[%s2174_s3 + $0x88] sm:$0xff]  ;;  %v1590_v35 = vpack.c.bf16 %v786_v28, %v785_v27 }
  0x90   : > { %1581 = vmatpush1.bf16.msra.mxu0 %v1580_v32  ;;  %1668 = vmatpush1.bf16.msra.mxu1 %v1580_v32  ;;  %v350_v36 = vsel %vm333_vm0, %v1708_v30, %v1709_v29  ;;  %v1586_v31 = vpack.c.bf16 %v784_v19, %v783_v18  ;;  %v795_v18 = vld [vmem:[%s2174_s3 + $0xe0] sm:$0xff]  ;;  %v796_v19 = vld [vmem:[%s2174_s3 + $0xe8] sm:$0xff] }
  0x91   : > { %406 = vmatprep.subr.mxu0 %v1858_v33  ;;  %1667 = vmatprep.subr.mxu1 %v1858_v33  ;;  %v363_v34 = vpop.permute.xlu1 %362  ;;  %v1584_v42 = vpack.c.bf16 %v350_v36, %v1831_v9  ;;  %v769_v36 = vld [vmem:[%s2174_s3 + $0x10] sm:$0xff]  ;;  %v780_v27 = vld [vmem:[%s2174_s3 + $0x68] sm:$0xff] }
  0x92   : > { %v361_v37 = vpop.permute.xlu0 %360 }
  0x93   : > { %v365_v40 = vsel %vm364_vm1, %v361_v37, %v363_v34  ;;  %v1588_v34 = vpack.c.bf16 %v768_v24, %v767_v23  ;;  %v770_v37 = vld [vmem:[%s2174_s3 + $0x18] sm:$0xff]  ;;  %v1610_v24 = vpack.c.bf16 %v796_v19, %v795_v18 }
  0x94   : > { %407 = vmatpush1.msra.mxu0 %v365_v40  ;;  %1669 = vmatpush1.msra.mxu1 %v365_v40 }
  0x95   : > { %1430 = vmatmul.mubr.msk.f32.vlgmr.msra.gmra.mrb[0].mxu0 %vm395_vm2, %v385_v38  ;;  %1431 = vmatmul.mubr.msk.f32.vlgmr.msra.gmra.mrb[0].mxu1 %vm395_vm2, %v386_v39  ;;  %v382_v43 = vpop.permute.xlu1 %381 }
  0x96   : > { %1583 = vmatprep.subr.bf16.mxu1 %v1582_v41  ;;  %v380_v44 = vpop.permute.xlu0 %379  ;;  %543 = vmatprep.mubr.f32.mxu1 %v1756_v11  ;;  %v1937_v41 = vld [vmem:[%s2173_s2 + $0x8] sm:$0xff] }
  0x97   : > { %1585 = vmatpush1.bf16.msra.mxu1 %v1584_v42  ;;  %v1877_v45 = vsel %vm364_vm1, %v380_v44, %v382_v43  ;;  %665 = vmatprep.mubr.f32.mxu0 %v1756_v11  ;;  %v1592_v42 = vpack.c.bf16 %v770_v37, %v769_v36  ;;  %v771_v44 = vld [vmem:[%s2174_s3 + $0x20] sm:$0xff]  ;;  %v797_v37 = vld [vmem:[%s2174_s3 + $0xf0] sm:$0xff] }
  0x98   : > { %483 = vmatprep.subr.mxu1 %v1877_v45 }
  0x99   : > { %v376_v46 = vpop.permute.xlu1 %375 }
  0x9a   : > { %v374_v47 = vpop.permute.xlu0 %373 }
  0x9b   : > { %v1882_v48 = vsel %vm364_vm1, %v374_v47, %v376_v46  ;;  %v772_v46 = vld [vmem:[%s2174_s3 + $0x28] sm:$0xff]  ;;  %v789_v47 = vld [vmem:[%s2174_s3 + $0xb0] sm:$0xff] }
  0x9c   : > { %484 = vmatpush1.msra.mxu1 %v1882_v48 }
  0x9d   : > { %1432 = vmatmul.mubr.msk.f32.vlgmr.msra.gmra.mrb[2].mxu1 %vm395_vm2, %v385_v38  ;;  %v787_v38 = vld [vmem:[%s2174_s3 + $0xa0] sm:$0xff] }
  0x9e   : > { %549 = vmatprep.mubr.f32.mxu1 %v1756_v11  ;;  %v315_v49 = vpop.permute.xlu0 %314 }
  0x9f   : > { %392 = vperm.xlu1 %1710, %v315_v49   ;;  %v790_v49 = vld [vmem:[%s2174_s3 + $0xb8] sm:$0xff] }
  0xa1   : > { %1433 = vmatmul.mubr.msk.f32.gmra.mrb[4].mxu1 %vm395_vm2, %v386_v39  ;;  %v788_v39 = vld [vmem:[%s2174_s3 + $0xa8] sm:$0xff] }
  0xa2   : > { %748 = vmatprep.mubr.f32.mxu1 %v1756_v11  ;;  %v1594_v43 = vpack.c.bf16 %v788_v39, %v787_v38  ;;  %v798_v38 = vld [vmem:[%s2174_s3 + $0xf8] sm:$0xff]  ;;  %v811_v39 = vld [vmem:[%s2174_s3 + $0x160] sm:$0xff] }
  0xaf   : > { %v389_v12 = vpop.permute.xlu0 %388 }
 0x11e   : > { %v393_v50 = vpop.permute.xlu1 %392 }
 0x168   : > { %v468_v51 = vpop.f32.mrb[0].mxu0  ;;  %v474_v52 = vpop.f32.mrb[0].mxu1 }
 0x169   : > { %v475_v53 = vadd.f32 %v474_v52, %v393_v50  ;;  %v470_v54 = vpop.f32.mrb[1].mxu0  ;;  %v476_v55 = vpop.f32.mrb[1].mxu1  ;;  %v469_v13 = vadd.f32 %v468_v51, %v389_v12  ;;  %v1958_v52 = vld [vmem:[%s2173_s2 + $0x10] sm:$0xff] }
 0x16a   : > { %v477_v56 = vadd.f32 %v476_v55, %v393_v50  ;;  %v471_v15 = vadd.f32 %v470_v54, %v389_v12  ;;  %v1598_v55 = vpack.c.bf16 %v790_v49, %v789_v47  ;;  %v813_v47 = vld [vmem:[%s2174_s3 + $0x170] sm:$0xff]  ;;  %v814_v49 = vld [vmem:[%s2174_s3 + $0x178] sm:$0xff] }
 0x16b   : > { %v560_v57 = vsub.f32 0.0, %v475_v53  ;;  %v556_v17 = vadd.f32 %v469_v13, %v365_v40  ;;  %v1596_v53 = vpack.c.bf16 %v772_v46, %v771_v44 }
 0x16c   : > { %v561_v58 = vsub.f32 0.0, %v477_v56  ;;  %v557_v21 = vadd.f32 %v471_v15, %v1858_v33  ;;  %v1915_v33 = vld [vmem:[%s2173_s2] sm:$0xff]  ;;  %v773_v56 = vld [vmem:[%s2174_s3 + $0x30] sm:$0xff] }
 0x16d   : > { %v564_v59 = vmul.f32 1.442695, %v560_v57 }
 0x16e   : > { %v566_v60 = vmul.f32 1.442695, %v561_v58  ;;  %v799_v58 = vld [vmem:[%s2174_s3 + $0x100] sm:$0xff] }
 0x16f   : > { %1729 = vpow2.f32 %v564_v59  ;;  %v800_v59 = vld [vmem:[%s2174_s3 + $0x108] sm:$0xff] }
 0x170   : > { %1731 = vpow2.f32 %v566_v60  ;;  %v545_v61 = vpop.f32.mrb[2].mxu1 }
 0x171   : > { %v547_v62 = vpop.f32.mrb[3].mxu1  ;;  %v546_v40 = vadd.f32 %v545_v61, %v389_v12  ;;  %v801_v61 = vld [vmem:[%s2174_s3 + $0x110] sm:$0xff] }
 0x173   : > { %v558_v51 = vadd.f32 %v546_v40, %v1882_v48  ;;  %v774_v48 = vld [vmem:[%s2174_s3 + $0x38] sm:$0xff]  ;;  %v1614_v40 = vpack.c.bf16 %v798_v38, %v797_v37 }
 0x174   : > { %v551_v63 = vpop.f32.mrb[4].mxu1 }
 0x175   : > { %v552_v0 = vadd.f32 %v551_v63, %v393_v50  ;;  %v553_v1 = vpop.f32.mrb[5].mxu1  ;;  %v802_v63 = vld [vmem:[%s2174_s3 + $0x118] sm:$0xff] }
 0x176   : > { %v554_v2 = vadd.f32 %v553_v1, %v393_v50  ;;  %v548_v50 = vadd.f32 %v547_v62, %v389_v12  ;;  %v791_v1 = vld [vmem:[%s2174_s3 + $0xc0] sm:$0xff]  ;;  %v804_v12 = vld [vmem:[%s2174_s3 + $0x128] sm:$0xff] }
 0x177   : > { %v562_v3 = vsub.f32 0.0, %v552_v0  ;;  %v1600_v0 = vpack.c.bf16 %v774_v48, %v773_v56 }
 0x178   : > { %v563_v4 = vsub.f32 0.0, %v554_v2  ;;  %v559_v60 = vadd.f32 %v548_v50, %v1877_v45  ;;  %v792_v45 = vld [vmem:[%s2174_s3 + $0xc8] sm:$0xff]  ;;  %v1646_v50 = vpack.c.bf16 %v814_v49, %v813_v47 }
 0x179   : > { %v1730_v5 = vpop.eup %1729  ;;  %v568_v6 = vmul.f32 1.442695, %v562_v3  ;;  %v1618_v3 = vpack.c.bf16 %v800_v59, %v799_v58 }
 0x17a   : > { %v1732_v7 = vpop.eup %1731  ;;  %v572_v8 = vadd.f32 1.0, %v1730_v5  ;;  %v570_v9 = vmul.f32 1.442695, %v563_v4  ;;  %v775_v4 = vld [vmem:[%s2174_s3 + $0x40] sm:$0xff]  ;;  %v776_v5 = vld [vmem:[%s2174_s3 + $0x48] sm:$0xff] }
 0x17b   : > { %v573_v10 = vadd.f32 1.0, %v1732_v7  ;;  %1733 = vpow2.f32 %v568_v6  ;;  %v793_v6 = vld [vmem:[%s2174_s3 + $0xd0] sm:$0xff]  ;;  %v794_v7 = vld [vmem:[%s2174_s3 + $0xd8] sm:$0xff]  ;;  %v1604_v13 = vpack.c.bf16 %v776_v5, %v775_v4 }
 0x17c   : > { %1735 = vrcp.f32 %v572_v8  ;;  %v1622_v8 = vpack.c.bf16 %v802_v63, %v801_v61  ;;  %v1606_v15 = vpack.c.bf16 %v794_v7, %v793_v6 }
 0x17d   : > { %1737 = vrcp.f32 %v573_v10  ;;  %v803_v10 = vld [vmem:[%s2174_s3 + $0x120] sm:$0xff] }
 0x17e   : > { %1739 = vpow2.f32 %v570_v9  ;;  %v1602_v9 = vpack.c.bf16 %v792_v45, %v791_v1 }
 0x185   : > { %v1734_v16 = vpop.eup %1733 }
 0x186   : > { %v1736_v20 = vpop.eup %1735  ;;  %v574_v22 = vadd.f32 1.0, %v1734_v16  ;;  %v777_v16 = vld [vmem:[%s2174_s3 + $0x50] sm:$0xff] }
 0x187   : > { %v1738_v25 = vpop.eup %1737  ;;  %v1902_v26 = vmul.f32 %v1736_v20, %v556_v17  ;;  %v778_v17 = vld [vmem:[%s2174_s3 + $0x58] sm:$0xff]  ;;  %v1626_v20 = vpack.c.bf16 %v804_v12, %v803_v10 }
 0x188   : > { %v1740_v29 = vpop.eup %1739  ;;  %1741 = vrcp.f32 %v574_v22  ;;  %v1910_v30 = vmul.f32 %v1738_v25, %v557_v21  ;;  %v805_v21 = vld [vmem:[%s2174_s3 + $0x130] sm:$0xff]  ;;  %v806_v22 = vld [vmem:[%s2174_s3 + $0x138] sm:$0xff]  ;;  %v1608_v23 = vpack.c.bf16 %v778_v17, %v777_v16  ;;  %v779_v25 = vld [vmem:[%s2174_s3 + $0x60] sm:$0xff] }
 0x189   : > { %v575_v32 = vadd.f32 1.0, %v1740_v29  ;;  %v1630_v28 = vpack.c.bf16 %v806_v22, %v805_v21  ;;  %v807_v29 = vld [vmem:[%s2174_s3 + $0x140] sm:$0xff] }
 0x18a   : > { %601 = vmatprep.subr.mxu0 %v1910_v30 }
 0x18b   : > { %1743 = vrcp.f32 %v575_v32  ;;  %602 = vmatpush1.msra.mxu0 %v1902_v26  ;;  %v1612_v32 = vpack.c.bf16 %v780_v27, %v779_v25 }
 0x18c   : > { %1434 = vmatmul.mubr.msk.f32.vlgmr.msra.gmra.mrb[2].mxu0 %vm591_vm3, %v1915_v33  ;;  %1587 = vmatprep.subr.bf16.mxu0 %v1586_v31  ;;  %v808_v31 = vld [vmem:[%s2174_s3 + $0x148] sm:$0xff] }
 0x18d   : > { %671 = vmatprep.mubr.f32.mxu0 %v1756_v11  ;;  %1589 = vmatpush3.bf16.msra.mxu0 %v1588_v34  ;;  %v809_v34 = vld [vmem:[%s2174_s3 + $0x150] sm:$0xff] }
 0x18e   : > { %1591 = vmatprep.subr.bf16.mxu0 %v1590_v35  ;;  %v810_v35 = vld [vmem:[%s2174_s3 + $0x158] sm:$0xff] }
 0x18f   : > { %v1638_v36 = vpack.c.bf16 %v810_v35, %v809_v34 }
 0x190   : > { %1435 = vmatmul.mubr.msk.f32.gmra.mrb[4].mxu0 %vm591_vm3, %v1937_v41 }
 0x191   : > { %677 = vmatprep.mubr.f32.mxu0 %v1756_v11  ;;  %1593 = vmatpush3.bf16.msra.mxu0 %v1592_v42  ;;  %v781_v42 = vld [vmem:[%s2174_s3 + $0x70] sm:$0xff] }
 0x192   : > { %v1742_v54 = vpop.eup %1741  ;;  %1595 = vmatprep.subr.bf16.mxu0 %v1594_v43  ;;  %v782_v43 = vld [vmem:[%s2174_s3 + $0x78] sm:$0xff] }
 0x193   : > { %v1966_v57 = vmul.f32 %v1742_v54, %v558_v51  ;;  %v1616_v46 = vpack.c.bf16 %v782_v43, %v781_v42  ;;  %v1760_v51 = vmov 2  }
 0x194   : > { %1436 = vmatmul.mubr.msk.f32.gmra.mrb[6].mxu0 %vm591_vm3, %v1958_v52  ;;  %1712 = vset.pattern.permute.xlu1 %v1760_v51 }
 0x195   : > { %v1744_v62 = vpop.eup %1743  ;;  %1597 = vmatpush3.bf16.msra.mxu0 %v1596_v53  ;;  %986 = vperm.xlu1 %1712, %v1851_v14  }
 0x196   : > { %v1989_v2 = vmul.f32 %v1744_v62, %v559_v60  ;;  %1599 = vmatprep.subr.bf16.mxu0 %v1598_v55 }
 0x198   : > { %684 = vmatprep.subr.mxu1 %v1989_v2 }
 0x199   : > { %685 = vmatpush1.msra.mxu1 %v1966_v57  ;;  %1601 = vmatpush3.bf16.msra.mxu0 %v1600_v0 }
 0x19a   : > { %1437 = vmatmul.mubr.msk.f32.vlgmr.msra.gmra.mrb[6].mxu1 %vm591_vm3, %v1915_v33  ;;  %1619 = vmatprep.subr.bf16.mxu1 %v1618_v3  ;;  %v1634_v33 = vpack.c.bf16 %v808_v31, %v807_v29 }
 0x19b   : > { %754 = vmatprep.mubr.f32.mxu1 %v1756_v11  ;;  %1621 = vmatpush3.bf16.msra.mxu1 %v1618_v3 }
 0x19c   : > { %1623 = vmatprep.subr.bf16.mxu1 %v1622_v8  ;;  %1603 = vmatprep.subr.bf16.mxu0 %v1602_v9 }
 0x19d   : > { %1605 = vmatpush3.bf16.msra.mxu0 %v1604_v13 }
 0x19e   : > { %1438 = vmatmul.mubr.msk.f32.gmra.mrb[8].mxu1 %vm591_vm3, %v1937_v41  ;;  %1607 = vmatprep.subr.bf16.mxu0 %v1606_v15  ;;  %v812_v41 = vld [vmem:[%s2174_s3 + $0x168] sm:$0xff] }
 0x19f   : > { %760 = vmatprep.mubr.f32.mxu1 %v1756_v11  ;;  %1625 = vmatpush3.bf16.msra.mxu1 %v1622_v8  ;;  %v1642_v44 = vpack.c.bf16 %v812_v41, %v811_v39 }
 0x1a0   : > { %1627 = vmatprep.subr.bf16.mxu1 %v1626_v20 }
 0x1a1   : > { %1609 = vmatpush3.bf16.msra.mxu0 %v1608_v23 }
 0x1a2   : > { %1439 = vmatmul.mubr.msk.f32.gmra.mrb[10].mxu1 %vm591_vm3, %v1958_v52  ;;  %1611 = vmatprep.subr.bf16.mxu0 %v1610_v24 }
 0x1a3   : > { %1629 = vmatpush3.bf16.msra.mxu1 %v1626_v20 }
 0x1a4   : > { %1631 = vmatprep.subr.bf16.mxu1 %v1630_v28 }
 0x1a5   : > { %1613 = vmatpush3.bf16.msra.mxu0 %v1612_v32 }
 0x1a6   : > { %1615 = vmatprep.subr.bf16.mxu0 %v1614_v40 }
 0x1a7   : > { %1633 = vmatpush3.bf16.msra.mxu1 %v1630_v28 }
 0x1a8   : > { %1635 = vmatprep.subr.bf16.mxu1 %v1634_v33 }
 0x1a9   : > { %1617 = vmatpush3.bf16.msra.mxu0 %v1616_v46 }
 0x1ab   : > { %1637 = vmatpush3.bf16.msra.mxu1 %v1634_v33 }
 0x1ac   : > { %1639 = vmatprep.subr.bf16.mxu1 %v1638_v36 }
 0x1af   : > { %1641 = vmatpush3.bf16.msra.mxu1 %v1638_v36 }
 0x1b0   : > { %1643 = vmatprep.subr.bf16.mxu1 %v1642_v44 }
 0x1b3   : > { %1645 = vmatpush3.bf16.msra.mxu1 %v1642_v44 }
 0x1b4   : > { %1647 = vmatprep.subr.bf16.mxu1 %v1646_v50 }
 0x1b7   : > { %1649 = vmatpush3.bf16.msra.mxu1 %v1646_v50 }
 0x214   : > { %v987_v12 = vpop.permute.xlu1 %986 }
 0x25f   : > { %v667_v52 = vpop.f32.mrb[2].mxu0 }
 0x260   : > { %v669_v53 = vpop.f32.mrb[3].mxu0 }
 0x263   : > { %v673_v54 = vpop.f32.mrb[4].mxu0 }
 0x264   : > { %879 = vmatprep.mubr.f32.mxu0 %v673_v54  ;;  %v675_v55 = vpop.f32.mrb[5].mxu0 }
 0x265   : > { %880 = vmatmul.mubr.f32.vlgmr.msra.gmra.mrb[8].mxu0 %v667_v52 }
 0x266   : > { %884 = vmatprep.mubr.f32.mxu0 %v675_v55 }
 0x267   : > { %v679_v56 = vpop.f32.mrb[6].mxu0 }
 0x268   : > { %v681_v48 = vpop.f32.mrb[7].mxu0  ;;  %1553 = vmatprep.mubr.f32.mxu1 %v679_v56 }
 0x269   : > { %885 = vmatmul.mubr.f32.gmra.mrb[10].mxu0 %v669_v53  ;;  %1554 = vmatmul.mubr.f32.vlgmr.msra.gmra.mrb[12].mxu1 %v681_v48 }
 0x26d   : > { %v750_v58 = vpop.f32.mrb[6].mxu1 }
 0x26e   : > { %v752_v59 = vpop.f32.mrb[7].mxu1 }
 0x271   : > { %v756_v60 = vpop.f32.mrb[8].mxu1 }
 0x272   : > { %889 = vmatprep.mubr.f32.mxu0 %v756_v60  ;;  %v758_v61 = vpop.f32.mrb[9].mxu1  ;;  %v1182_v60 = vld [vmem:[%s2178_s7 + $0x8] sm:$0xff] }
 0x273   : > { %890 = vmatmul.mubr.f32.gmra.mrb[12].mxu0 %v750_v58  ;;  %v1042_v58 = vld [vmem:[%s2175_s4] sm:$0xff] }
 0x274   : > { %894 = vmatprep.mubr.f32.mxu0 %v758_v61  ;;  %v1183_v61 = vld [vmem:[%s2178_s7 + $0x10] sm:$0xff] }
 0x275   : > { %v762_v62 = vpop.f32.mrb[10].mxu1 }
 0x276   : > { %v764_v63 = vpop.f32.mrb[11].mxu1  ;;  %1556 = vmatprep.mubr.f32.mxu1 %v762_v62  ;;  %v1765_v62 = vmov 0.0|0.0  }
 0x277   : > { %895 = vmatmul.mubr.f32.gmra.mrb[14].mxu0 %v752_v59  ;;  %1557 = vmatmul.mubr.f32.gmra.mrb[14].mxu1 %v764_v63  ;;  %v1181_v59 = vld [vmem:[%s2178_s7] sm:$0xff] }
 0x278   : > { %1114 = vmatprep.mubr.f32.mxu1 %v1756_v11  ;;  %1654 = vmatprep.subr.bf16.mxu0 %v1765_v62  ;;  %v1655_v63 = vpack.c.bf16 %v1182_v60, %v1181_v59 }
 0x279   : > { %1575 = vmatprep.mubr.msk.f32.mxu0 %vm1766_vm5, %v1756_v11 }
 0x27a   : > { %1656 = vmatpush3.bf16.msra.mxu0 %v1655_v63 }
 0x27b   : > { %1657 = vmatprep.subr.bf16.mxu0 %v1765_v62 }
 0x338   : > { %v1480_v0 = vpop.f32.mrb[8].mxu0 }
 0x339   : > { %v1481_v1 = vpop.f32.mrb[9].mxu0 }
 0x33a   : > { %v1482_v45 = vadd.f32 %v1481_v1, %v1480_v0  ;;  %v1184_v0 = vld [vmem:[%s2178_s7 + $0x18] sm:$0xff] }
 0x33b   : > { %v1658_v1 = vpack.c.bf16 %v1184_v0, %v1183_v61 }
 0x33c   : > { %v1483_v3 = vpop.f32.mrb[10].mxu0  ;;  %v1555_v4 = vpop.f32.mrb[12].mxu1 }
 0x33d   : > { %v1484_v5 = vpop.f32.mrb[11].mxu0  ;;  %v966_v6 = vpop.f32.mrb[13].mxu1  ;;  %1659 = vmatpush3.bf16.msra.mxu0 %v1658_v1 }
 0x33e   : > { %v1485_v7 = vadd.f32 %v1484_v5, %v1483_v3  ;;  %v967_v8 = vadd.f32 %v1482_v45, %v966_v6  ;;  %1660 = vmatprep.subr.bf16.mxu0 %v1765_v62 }
 0x340   : > { %v972_v9 = vadd.f32 %v1555_v4, %v1485_v7  ;;  %v989_v16 = vadd.f32 %v987_v12, %v967_v8 }
 0x342   : > { %v990_v21 = vadd.f32 %v987_v12, %v972_v9  ;;  %v993_v24 = vadd.f32 %v989_v16, %v1902_v26  ;;  %v1762_v26 = vmov 3  }
 0x343   : > { %1728 = vset.pattern.permute.xlu0 %v1762_v26 }
 0x344   : > { %v994_v28 = vadd.f32 %v990_v21, %v1910_v30  ;;  %v997_v32 = vmax.f32 %v993_v24, 0.0 }
 0x346   : > { %v1486_v10 = vpop.f32.mrb[12].mxu0  ;;  %v998_v35 = vmax.f32 %v994_v28, 0.0 }
 0x347   : > { %v1487_v13 = vpop.f32.mrb[13].mxu0 }
 0x348   : > { %v1488_v15 = vadd.f32 %v1487_v13, %v1486_v10  ;;  %v1185_v10 = vld [vmem:[%s2178_s7 + $0x20] sm:$0xff] }
 0x34a   : > { %v1489_v17 = vpop.f32.mrb[14].mxu0  ;;  %v1558_v18 = vpop.f32.mrb[14].mxu1 }
 0x34b   : > { %v1490_v19 = vpop.f32.mrb[15].mxu0  ;;  %v976_v20 = vpop.f32.mrb[15].mxu1 }
 0x34c   : > { %v1491_v22 = vadd.f32 %v1490_v19, %v1489_v17  ;;  %v977_v23 = vadd.f32 %v1488_v15, %v976_v20 }
 0x34e   : > { %v982_v25 = vadd.f32 %v1558_v18, %v1491_v22  ;;  %v991_v27 = vadd.f32 %v987_v12, %v977_v23  ;;  %v1187_v22 = vld [vmem:[%s2178_s7 + $0x30] sm:$0xff]  ;;  %v1188_v23 = vld [vmem:[%s2178_s7 + $0x38] sm:$0xff] }
 0x350   : > { %v992_v29 = vadd.f32 %v987_v12, %v982_v25  ;;  %v995_v31 = vadd.f32 %v991_v27, %v1966_v57  ;;  %v1186_v12 = vld [vmem:[%s2178_s7 + $0x28] sm:$0xff]  ;;  %v1664_v27 = vpack.c.bf16 %v1188_v23, %v1187_v22 }
 0x351   : > { %v1661_v15 = vpack.c.bf16 %v1186_v12, %v1185_v10 }
 0x352   : > { %v996_v33 = vadd.f32 %v992_v29, %v1989_v2  ;;  %v999_v34 = vmax.f32 %v995_v31, 0.0 }
 0x353   : > { %1662 = vmatpush3.bf16.msra.mxu0 %v1661_v15 }
 0x354   : > { %v1000_v36 = vmax.f32 %v996_v33, 0.0  ;;  %v1713_v37 = vpack.i.bf16 %v997_v32, %v999_v34  ;;  %1663 = vmatprep.subr.bf16.mxu0 %v1765_v62 }
 0x356   : > { %1714 = vrot.lane.b32.xlu0 %v1713_v37, %s1755_s12  ;;  %v1718_v38 = vpack.i.bf16 %v998_v35, %v1000_v36 }
 0x357   : > { %1665 = vmatpush3.bf16.msra.mxu0 %v1664_v27 }
 0x358   : > { %1719 = vrot.lane.b32.xlu1 %v1718_v38, %s1761_s15 }
 0x35a   : > { %1034 = vrot.lane.b32.xlu0 %v999_v34, %s1757_s13 }
 0x35c   : > { %1724 = vrot.lane.b32.xlu1 %v1718_v38, %s1763_s16 }
 0x35e   : > { %1028 = vrot.lane.b32.xlu0 %v997_v32, %s1757_s13  ;;  %s1423_s13 = sshll.u32 %s2181_s29, 3 }
 0x35f   : > { %s310_s22 = scalar_lea.vmem %s2179_s8, %s1423_s13 }
 0x360   : > { %1037 = vrot.lane.b32.xlu1 %v1000_v36, %s1764_s17 }
 0x362   : > { %1044 = vperm.xlu0 %1728, %v1851_v14  }
 0x364   : > { %1031 = vrot.lane.b32.xlu1 %v998_v35, %s1764_s17 }
 0x3c8   : > { %v1715_v30 = vpop.permute.xlu0 %1714 }
 0x3c9   : > { %v1717_v41 = vunpack.i.h.bf16 %v1715_v30  ;;  %v1716_v42 = vunpack.i.l.bf16 %v1715_v30 }
 0x3ca   : > { %v1720_v57 = vpop.permute.xlu1 %1719 }
 0x3cb   : > { %v1722_v2 = vunpack.i.h.bf16 %v1720_v57  ;;  %v1721_v39 = vunpack.i.l.bf16 %v1720_v57 }
 0x3cc   : > { %v1035_v46 = vpop.permute.xlu0 %1034 }
 0x3cd   : > { %v1010_v47 = vsel %vm1009_vm4, %v997_v32, %v1722_v2  ;;  %v1011_v50 = vsel %vm1009_vm4, %v999_v34, %v1721_v39 }
 0x3ce   : > { %v1725_v40 = vpop.permute.xlu1 %1724 }
 0x3cf   : > { %v1727_v43 = vunpack.i.h.bf16 %v1725_v40  ;;  %v1726_v44 = vunpack.i.l.bf16 %v1725_v40 }
 0x3d0   : > { %v1029_v55 = vpop.permute.xlu0 %1028 }
 0x3d1   : > { %v1026_v49 = vsel %vm1009_vm4, %v1717_v41, %v1727_v43  ;;  %v1027_v14 = vsel %vm1009_vm4, %v1716_v42, %v1726_v44 }
 0x3d2   : > { %v1652_v51 = vpack.c.bf16 %v1026_v49, %v1010_v47  ;;  %v1038_v52 = vpop.permute.xlu1 %1037  ;;  %v1650_v53 = vpack.c.bf16 %v1027_v14, %v1011_v50 }
 0x3d3   : > { %v1041_v54 = vsel %vm1009_vm4, %v1035_v46, %v1038_v52 }
 0x3d4   : > { %1651 = vmatprep.subr.bf16.mxu1 %v1650_v53 }
 0x3d5   : > { %1653 = vmatpush1.bf16.msra.mxu1 %v1652_v51 }
 0x3d6   : > { %v1032_v56 = vpop.permute.xlu1 %1031  ;;  %1054 = vmatprep.subr.mxu1 %v1041_v54 }
 0x3d7   : > { %v1040_v48 = vsel %vm1009_vm4, %v1029_v55, %v1032_v56  ;;  %v1271_v55 = vlaneseq }
 0x3d9   : > { %1055 = vmatpush1.msra.mxu1 %v1040_v48  ;;  %v1272_v56 = vshrl.u32 %v1271_v55, 7 }
 0x3da   : > { %1440 = vmatmul.mubr.msk.f32.vlgmr.msra.gmra.mrb[16].mxu1 %vm395_vm2, %v1042_v58 }
 0x3db   : > { %v1320_v58 = vsub.s32 2, %v1272_v56  ;;  %v1334_v63 = vsub.s32 3, %v1272_v56  ;;  %v1343_v10 = vsub.s32 7, %v1272_v56  ;;  %v1295_v12 = vsub.s32 5, %v1272_v56 }
 0x3e1   : > { %v1045_v45 = vpop.permute.xlu0 %1044 }
 0x4ad   : > { %v1116_v3 = vpop.f32.mrb[16].mxu1 }
 0x4ae   : > { %v1117_v4 = vadd.f32 %v1116_v3, %v1045_v45  ;;  %v1118_v5 = vpop.f32.mrb[17].mxu1 }
 0x4af   : > { %v1119_v6 = vadd.f32 %v1118_v5, %v1045_v45  ;;  %v1273_v5 = vsub.s32 0, %v1272_v56 }
 0x4b0   : > { %v1121_v7 = vadd.f32 %v1117_v4, %v1040_v48  ;;  %v1286_v48 = vsub.s32 1, %v1272_v56 }
 0x4b1   : > { %v1122_v8 = vadd.f32 %v1119_v6, %v1041_v54  ;;  %v1262_v54 = vld [vmem:[%s2177_s6] sm:$0xff] }
 0x4b2   : > { %v2112_v9 = vmax.f32 %v1121_v7, 0.0  ;;  %v1278_v7 = vsub.s32 4, %v1272_v56 }
 0x4b3   : > { %v2120_v13 = vmax.f32 %v1122_v8, 0.0  ;;  %v1325_v8 = vsub.s32 6, %v1272_v56 }
 0x4b4   : > { %v1125_v16 = vrot.slane %v2112_v9, 4  ;;  %v1137_v17 = vmul.f32 %v2112_v9, %v2112_v9 }
 0x4b5   : > { %v1131_v18 = vrot.slane %v2120_v13, 4  ;;  %v1138_v19 = vmul.f32 %v2120_v13, %v2120_v13 }
 0x4b6   : > { %v1126_v20 = vadd.f32 %v1125_v16, %v2112_v9  ;;  %v1139_v21 = vrot.slane %v1137_v17, 4 }
 0x4b7   : > { %v1132_v24 = vadd.f32 %v1131_v18, %v2120_v13  ;;  %v1145_v25 = vrot.slane %v1138_v19, 4 }
 0x4b8   : > { %v1127_v28 = vrot.slane %v1126_v20, 2  ;;  %v1140_v29 = vadd.f32 %v1139_v21, %v1137_v17 }
 0x4b9   : > { %v1133_v31 = vrot.slane %v1132_v24, 2  ;;  %v1146_v32 = vadd.f32 %v1145_v25, %v1138_v19 }
 0x4ba   : > { %v1128_v33 = vadd.f32 %v1127_v28, %v1126_v20  ;;  %v1141_v34 = vrot.slane %v1140_v29, 2 }
 0x4bb   : > { %v1134_v35 = vadd.f32 %v1133_v31, %v1132_v24  ;;  %v1147_v36 = vrot.slane %v1146_v32, 2  ;;  %v1263_v24 = vld [vmem:[%s2177_s6 + $0x8] sm:$0xff] }
 0x4bc   : > { %v1129_v37 = vrot.slane %v1128_v33, 1  ;;  %v1142_v38 = vadd.f32 %v1141_v34, %v1140_v29 }
 0x4bd   : > { %v1135_v57 = vrot.slane %v1134_v35, 1  ;;  %v1148_v2 = vadd.f32 %v1147_v36, %v1146_v32 }
 0x4be   : > { %v1130_v26 = vadd.f32 %v1129_v37, %v1128_v33  ;;  %v1143_v30 = vrot.slane %v1142_v38, 1 }
 0x4bf   : > { %v1136_v40 = vadd.f32 %v1135_v57, %v1134_v35  ;;  %v1149_v41 = vrot.slane %v1148_v2, 1 }
 0x4c0   : > { %1152 = vrot.lane.b32.xlu1 %v1130_v26, %s1761_s15  ;;  %v1144_v39 = vadd.f32 %v1143_v30, %v1142_v38 }
 0x4c1   : > { %v1150_v42 = vadd.f32 %v1149_v41, %v1148_v2 }
 0x4c2   : > { %1160 = vrot.lane.b32.xlu0 %v1144_v39, %s1761_s15 }
 0x4c4   : > { %1156 = vrot.lane.b32.xlu1 %v1136_v40, %s1761_s15 }
 0x4c8   : > { %1164 = vrot.lane.b32.xlu1 %v1150_v42, %s1761_s15 }
 0x4cc   : > { %1303 = vrot.lane.b32.xlu1 %v1262_v54, %s1761_s15 }
 0x532   : > { %v1153_v11 = vpop.permute.xlu1 %1152 }
 0x533   : > { %v1168_v43 = vsel %vm1167_vm6, %v1130_v26, %v1153_v11 }
 0x534   : > { %v1170_v44 = vsel %vm1169_vm7, %v1168_v43, %v1136_v40  ;;  %v1161_v49 = vpop.permute.xlu0 %1160 }
 0x536   : > { %v1157_v46 = vpop.permute.xlu1 %1156 }
 0x537   : > { %v1172_v47 = vsel %vm1171_vm8, %v1170_v44, %v1157_v46 }
 0x538   : > { %v1174_v50 = vsel %vm1173_vm9, %v1172_v47, %v1144_v39 }
 0x539   : > { %v1176_v14 = vsel %vm1175_vm10, %v1174_v50, %v1161_v49 }
 0x53a   : > { %v1178_v51 = vsel %vm1177_vm11, %v1176_v14, %v1150_v42  ;;  %v1165_v52 = vpop.permute.xlu1 %1164 }
 0x53b   : > { %v1180_v53 = vsel %vm1179_vm12, %v1178_v51, %v1165_v52 }
 0x53c   : > { %1576 = vmatmul.mubr.msk.f32.vlgmr.msra.gmra.mrb[16].mxu0 %vm1009_vm4, %v1180_v53 }
 0x53e   : > { %v1304_v32 = vpop.permute.xlu1 %1303 }
 0x60f   : > { %v1258_v59 = vpop.f32.mrb[16].mxu0 }
 0x610   : > { %v1264_v60 = vmul.f32 %v1258_v59, %v1258_v59  ;;  %v1577_v61 = vpop.f32.mrb[17].mxu0  ;;  %v1287_v62 = vrot.slane %v1258_v59, %v1286_v48  ;;  %v1321_v0 = vrot.slane %v1258_v59, %v1320_v58  ;;  %v1335_v3 = vrot.slane %v1258_v59, %v1334_v63 }
 0x611   : > { %v1274_v6 = vrot.slane %v1258_v59, %v1273_v5 }
 0x612   : > { %v1266_v1 = vrot.slane %v1264_v60, 4  ;;  %1289 = vrot.lane.b32.xlu0 %v1287_v62, %s1761_s15  ;;  %v1322_v17 = vsub.f32 %v2120_v13, %v1321_v0 }
 0x613   : > { %v1275_v16 = vsub.f32 %v2112_v9, %v1274_v6 }
 0x614   : > { %v1268_v45 = vsub.f32 %v1258_v59, %v1266_v1 }
 0x616   : > { %v1269_v4 = vadd.f32 1e-05, %v1268_v45  ;;  %1337 = vrot.lane.b32.xlu0 %v1335_v3, %s1761_s15 }
 0x618   : > { %1745 = vrsqrt.f32 %v1269_v4 }
 0x622   : > { %v1746_v15 = vpop.eup %1745 }
 0x623   : > { %v1279_v18 = vrot.slane %v1746_v15, %v1278_v7  ;;  %v1326_v19 = vrot.slane %v1746_v15, %v1325_v8  ;;  %v1344_v20 = vrot.slane %v1746_v15, %v1343_v10  ;;  %v1296_v21 = vrot.slane %v1746_v15, %v1295_v12 }
 0x625   : > { %v1280_v22 = vmul.f32 %v1279_v18, %v1275_v16  ;;  %v1327_v23 = vmul.f32 %v1326_v19, %v1322_v17  ;;  %1346 = vrot.lane.b32.xlu0 %v1344_v20, %s1761_s15  ;;  %1298 = vrot.lane.b32.xlu1 %v1296_v21, %s1761_s15 }
 0x627   : > { %v1281_v25 = vmul.f32 %v1280_v22, %v1262_v54  ;;  %v1328_v27 = vmul.f32 %v1327_v23, %v1262_v54 }
 0x629   : > { %v1329_v28 = vadd.f32 %v1328_v27, %v1263_v24  ;;  %1308 = vrot.lane.b32.xlu1 %v1263_v24, %s1761_s15  ;;  %v1282_v29 = vadd.f32 %v1281_v25, %v1263_v24 }
 0x62b   : > { %1283 = vst.msk [vmem:[%s310_s22] sm:$0xff] %vm1009_vm4, %v1282_v29  ;;  %1443 = vst.msk [vmem:[%s310_s22 + $0x10] sm:$0xff] %vm1009_vm4, %v1329_v28 }
 0x684   : > { %v1290_v31 = vpop.permute.xlu0 %1289 }
 0x685   : > { %v1292_v34 = vsub.f32 %v2112_v9, %v1290_v31 }
 0x688   : > { %v1338_v33 = vpop.permute.xlu0 %1337 }
 0x689   : > { %v1340_v35 = vsub.f32 %v2120_v13, %v1338_v33 }
 0x697   : > { %v1347_v36 = vpop.permute.xlu0 %1346  ;;  %v1299_v37 = vpop.permute.xlu1 %1298 }
 0x698   : > { %v1349_v38 = vmul.f32 %v1347_v36, %v1340_v35  ;;  %v1301_v26 = vmul.f32 %v1299_v37, %v1292_v34 }
 0x69a   : > { %v1350_v30 = vmul.f32 %v1349_v38, %v1304_v32  ;;  %v1306_v57 = vmul.f32 %v1304_v32, %v1301_v26 }
 0x69b   : > { %v1309_v2 = vpop.permute.xlu1 %1308 }
 0x69c   : > { %v1311_v39 = vadd.f32 %v1309_v2, %v1306_v57  ;;  %v1351_v40 = vadd.f32 %v1350_v30, %v1309_v2 }
 0x69e   : > { %1313 = vrot.lane.b32.xlu0 %v1311_v39, %s1761_s15  ;;  %1353 = vrot.lane.b32.xlu1 %v1351_v40, %s1761_s15 }
 0x710   : > { %v1314_v41 = vpop.permute.xlu0 %1313  ;;  %v1354_v9 = vpop.permute.xlu1 %1353 }
 0x711   : > { %1442 = vst.msk [vmem:[%s310_s22 + $0x8] sm:$0xff] %vm1009_vm4, %v1314_v41  ;;  %1444 = vst.msk [vmem:[%s310_s22 + $0x18] sm:$0xff] %vm1009_vm4, %v1354_v9 }
 0x712 PF: > { %s18_s27 = sadd.s32 1, %s1753_s27  }
 0x713   : > { %p15_p4 = scmp.ge.s32.totalorder %s18_s27, 4  }
 0x715   :  { %17 = sbr.rel (!%p15_p4) target bundleno = 1 (0x1), region = 88 }

// kernel: forward.5
= control target key start
LH: loop header
LB: loop body
LE: loop exit
PB: predicated region body
PF: predicated region fallthrough
CT: control target
= control target key end

     0   :  { %vm45_vm0 = vcmask 261120   ;;  %v568_v3 = vmov 0   ;;  %s569_s30 = smov 127   ;;  %v570_v14 = vmov 0.0|0.0   ;;  %vm571_vm1 = vmmov 0   ;;  %s723_s4 = inlined_call_operand.vmem [shape: f32[8,4], index: 4, kind: input, shape index: {}]   ;;  %s724_s0 = inlined_call_operand.vmem [shape: f32[32,128], index: 0, kind: input, shape index: {}]   ;;  %s725_s1 = inlined_call_operand.vmem [shape: f32[16,32], index: 1, kind: input, shape index: {}]   ;;  %s726_s6 = inlined_call_operand.vmem [shape: f32[128,128], index: 6, kind: input, shape index: {}]   ;;  %s727_s5 = inlined_call_operand.vmem [shape: f32[16,128], index: 5, kind: input, shape index: {}]   ;;  %s728_s2 = inlined_call_operand.vmem [shape: f32[8,8], index: 2, kind: input, shape index: {}]   ;;  %s729_s3 = inlined_call_operand.vmem [shape: f32[1,8], index: 3, kind: input, shape index: {}]   ;;  %s730_s7 = inlined_call_operand.vmem [shape: f32[1,128], index: 7, kind: output, shape index: {}]  }
   0x1   :  { %v618_v0 = vld [vmem:[%s723_s4] sm:$0xff]  ;;  %v32_v2 = vld [vmem:[%s724_s0 + $0x8] sm:$0xff]  ;;  %554 = vset.pattern.permute.xlu1 %v568_v3  ;;  %553 = vset.pattern.permute.xlu0 %v568_v3  ;;  %v33_v5 = vld [vmem:[%s724_s0 + $0x10] sm:$0xff]  ;;  %v572_v29 = vmov 0.0   ;;  %vm148_vm2 = vcmask 1040384   ;;  %vm262_vm3 = vcmask 64512  }
   0x2   :  { %v31_v1 = vld [vmem:[%s724_s0] sm:$0xff]  ;;  %28 = vrot.lane.b32.xlu0 %v618_v0, %s569_s30  ;;  %v633_v6 = vld [vmem:[%s724_s0 + $0x18] sm:$0xff]  ;;  %38 = vperm.xlu1 %554, %v618_v0   ;;  %v36_v9 = vld [vmem:[%s725_s1 + $0x8] sm:$0xff] }
   0x3   :  { %v514_v4 = vpack.c.bf16 %v32_v2, %v31_v1  ;;  %v35_v7 = vld [vmem:[%s725_s1] sm:$0xff]  ;;  %v518_v8 = vpack.c.bf16 %v633_v6, %v33_v5  ;;  %v151_v12 = vld [vmem:[%s726_s6 + $0x8] sm:$0xff]  ;;  %522 = vmatprep.subr.bf16.mxu1 %v570_v14  ;;  %v152_v15 = vld [vmem:[%s726_s6 + $0x10] sm:$0xff]  ;;  %501 = vmatprep.mubr.msk.f32.mxu1 %vm571_vm1, %v572_v29  ;;  %v573_v1 = vmov 2  }
   0x4   :  { %466 = vmatprep.mubr.msk.f32.mxu0 %vm45_vm0, %v35_v7  ;;  %v150_v11 = vld [vmem:[%s726_s6] sm:$0xff]  ;;  %v153_v16 = vld [vmem:[%s726_s6 + $0x18] sm:$0xff]  ;;  %v155_v19 = vld [vmem:[%s726_s6 + $0x28] sm:$0xff] }
   0x5   :  { %515 = vmatprep.subr.bf16.mxu0 %v514_v4  ;;  %v523_v13 = vpack.c.bf16 %v151_v12, %v150_v11  ;;  %v526_v17 = vpack.c.bf16 %v153_v16, %v152_v15  ;;  %v154_v18 = vld [vmem:[%s726_s6 + $0x20] sm:$0xff]  ;;  %v156_v21 = vld [vmem:[%s726_s6 + $0x30] sm:$0xff]  ;;  %v157_v22 = vld [vmem:[%s726_s6 + $0x38] sm:$0xff] }
   0x6   :  { %517 = vmatpush3.bf16.msra.mxu0 %v514_v4  ;;  %v529_v20 = vpack.c.bf16 %v155_v19, %v154_v18  ;;  %v532_v23 = vpack.c.bf16 %v157_v22, %v156_v21  ;;  %v158_v24 = vld [vmem:[%s726_s6 + $0x40] sm:$0xff]  ;;  %v159_v25 = vld [vmem:[%s726_s6 + $0x48] sm:$0xff]  ;;  %v160_v27 = vld [vmem:[%s726_s6 + $0x50] sm:$0xff]  ;;  %555 = vset.pattern.permute.xlu1 %v573_v1  ;;  %v574_v22 = vmov 3  }
   0x7   :  { %519 = vmatprep.subr.bf16.mxu0 %v518_v8  ;;  %524 = vmatpush3.bf16.msra.mxu1 %v523_v13  ;;  %v535_v26 = vpack.c.bf16 %v159_v25, %v158_v24  ;;  %v161_v28 = vld [vmem:[%s726_s6 + $0x58] sm:$0xff]  ;;  %v162_v31 = vld [vmem:[%s726_s6 + $0x60] sm:$0xff]  ;;  %v163_v32 = vld [vmem:[%s726_s6 + $0x68] sm:$0xff] }
   0x8   :  { %525 = vmatprep.subr.bf16.mxu1 %v570_v14  ;;  %v538_v30 = vpack.c.bf16 %v161_v28, %v160_v27  ;;  %v541_v33 = vpack.c.bf16 %v163_v32, %v162_v31  ;;  %v164_v34 = vld [vmem:[%s726_s6 + $0x70] sm:$0xff]  ;;  %v165_v35 = vld [vmem:[%s726_s6 + $0x78] sm:$0xff]  ;;  %259 = vperm.xlu1 %555, %v618_v0   ;;  %v253_v16 = vld [vmem:[%s727_s5] sm:$0xff] }
   0x9   :  { %v544_v36 = vpack.c.bf16 %v165_v35, %v164_v34  ;;  %v30_v21 = vld [vmem:[%s723_s4] sm:$0x1] }
   0xa   :  { %521 = vmatpush3.bf16.msra.mxu0 %v518_v8 }
   0xb   :  { %527 = vmatpush3.bf16.msra.mxu1 %v526_v17  ;;  %504 = vmatprep.subr.mxu0 %v572_v29  ;;  %v255_v17 = vld [vmem:[%s727_s5 + $0x8] sm:$0xff] }
   0xc   :  { %528 = vmatprep.subr.bf16.mxu1 %v570_v14  ;;  %556 = vset.pattern.permute.xlu1 %v574_v22 }
   0xd   :  { %467 = vmatmul.mubr.msk.f32.vlgmr.msra.gmra.mrb[0].mxu0 %vm45_vm0, %v36_v9  ;;  %346 = vperm.xlu1 %556, %v30_v21  }
   0xe   :  { %506 = vmatprep.mubr.msk.f32.mxu0 %vm571_vm1, %v572_v29 }
   0xf   :  { %530 = vmatpush3.bf16.msra.mxu1 %v529_v20  ;;  %v257_v20 = vld [vmem:[%s728_s2] sm:$0xff] }
  0x10   :  { %531 = vmatprep.subr.bf16.mxu1 %v570_v14 }
  0x13   :  { %533 = vmatpush3.bf16.msra.mxu1 %v532_v23 }
  0x14   :  { %534 = vmatprep.subr.bf16.mxu1 %v570_v14 }
  0x17   :  { %536 = vmatpush3.bf16.msra.mxu1 %v535_v26 }
  0x18   :  { %537 = vmatprep.subr.bf16.mxu1 %v570_v14 }
  0x1b   :  { %539 = vmatpush3.bf16.msra.mxu1 %v538_v30 }
  0x1c   :  { %540 = vmatprep.subr.bf16.mxu1 %v570_v14 }
  0x1f   :  { %542 = vmatpush3.bf16.msra.mxu1 %v541_v33 }
  0x20   :  { %543 = vmatprep.subr.bf16.mxu1 %v570_v14 }
  0x23   :  { %545 = vmatpush3.bf16.msra.mxu1 %v544_v36 }
  0x74   :  { %v29_v10 = vpop.permute.xlu0 %28 }
  0x75   :  { %42 = vperm.xlu0 %553, %v29_v10  }
  0x79   :  { %557 = vset.pattern.permute.xlu0 %v574_v22 }
  0x81   :  { %v39_v45 = vpop.permute.xlu1 %38 }
  0x87   :  { %v260_v23 = vpop.permute.xlu1 %259 }
  0x8c   :  { %v347_v34 = vpop.permute.xlu1 %346 }
  0xe0   :  { %v468_v37 = vpop.f32.mrb[0].mxu0 }
  0xe1   :  { %v118_v38 = vpop.f32.mrb[1].mxu0 }
  0xe2   :  { %v119_v46 = vadd.f32 %v118_v38, %v39_v45 }
  0xe4   :  { %v127_v47 = vadd.f32 %v119_v46, %v633_v6  ;;  %v243_v6 = vlaneseq }
  0xe6   :  { %v244_v9 = vshrl.u32 %v243_v6, 7 }
  0xe8   :  { %v245_v10 = vsub.s32 0, %v244_v9  ;;  %v250_v12 = vsub.s32 1, %v244_v9 }
  0xf4   :  { %v43_v39 = vpop.permute.xlu0 %42 }
  0xf5   :  { %v124_v40 = vadd.f32 %v468_v37, %v43_v39 }
  0xf7   :  { %v128_v41 = vsub.f32 0.0, %v124_v40 }
  0xf9   :  { %v129_v42 = vmul.f32 1.442695, %v128_v41 }
  0xfb   :  { %558 = vpow2.f32 %v129_v42 }
 0x105   :  { %v559_v43 = vpop.eup %558 }
 0x106   :  { %v131_v44 = vadd.f32 1.0, %v559_v43 }
 0x108   :  { %560 = vrcp.f32 %v131_v44 }
 0x112   :  { %v561_v48 = vpop.eup %560 }
 0x113   :  { %v134_v49 = vmul.f32 %v561_v48, %v127_v47 }
 0x115   :  { %v135_v50 = vrot.slane %v134_v49, 4  ;;  %v141_v51 = vmul.f32 %v134_v49, %v134_v49 }
 0x117   :  { %v136_v52 = vadd.f32 %v135_v50, %v134_v49  ;;  %v142_v53 = vrot.slane %v141_v51, 4 }
 0x119   :  { %v137_v54 = vrot.slane %v136_v52, 2  ;;  %v143_v55 = vadd.f32 %v142_v53, %v141_v51 }
 0x11b   :  { %v138_v56 = vadd.f32 %v137_v54, %v136_v52  ;;  %v144_v57 = vrot.slane %v143_v55, 2 }
 0x11d   :  { %v139_v58 = vrot.slane %v138_v56, 1  ;;  %v145_v59 = vadd.f32 %v144_v57, %v143_v55 }
 0x11f   :  { %v146_v60 = vrot.slane %v145_v59, 1  ;;  %v140_v61 = vadd.f32 %v139_v58, %v138_v56 }
 0x121   :  { %v147_v62 = vadd.f32 %v146_v60, %v145_v59 }
 0x123   :  { %v149_v63 = vsel %vm148_vm2, %v140_v61, %v147_v62 }
 0x124   :  { %502 = vmatmul.mubr.f32.vlgmr.msra.gmra.mrb[0].mxu1 %v149_v63 }
 0x1f7   :  { %v232_v2 = vpop.f32.mrb[0].mxu1 }
 0x1f8   :  { %v236_v3 = vmul.f32 %v232_v2, %v232_v2  ;;  %v503_v4 = vpop.f32.mrb[1].mxu1  ;;  %v246_v11 = vrot.slane %v232_v2, %v245_v10 }
 0x1fa   :  { %v238_v5 = vrot.slane %v236_v3, 7  ;;  %v247_v14 = vsub.f32 %v134_v49, %v246_v11 }
 0x1fc   :  { %v240_v7 = vsub.f32 %v232_v2, %v238_v5 }
 0x1fe   :  { %v241_v8 = vadd.f32 1e-05, %v240_v7 }
 0x200   :  { %562 = vrsqrt.f32 %v241_v8 }
 0x20a   :  { %v563_v13 = vpop.eup %562 }
 0x20b   :  { %v251_v15 = vrot.slane %v563_v13, %v250_v12 }
 0x20d   :  { %v252_v0 = vmul.f32 %v251_v15, %v247_v14 }
 0x20f   :  { %v254_v18 = vmul.f32 %v253_v16, %v252_v0 }
 0x211   :  { %v256_v19 = vadd.f32 %v255_v17, %v254_v18 }
 0x213   :  { %505 = vmatpush3.msra.mxu0 %v256_v19 }
 0x214   :  { %507 = vmatmul.mubr.msk.f32.vlgmr.msra.gmra.mrb[2].mxu0 %vm262_vm3, %v257_v20  ;;  %509 = vmatprep.subr.mxu0 %v572_v29 }
 0x215   :  { %511 = vmatprep.mubr.msk.f32.mxu0 %vm571_vm1, %v572_v29  ;;  %v343_v29 = vld [vmem:[%s729_s3] sm:$0x1] }
 0x2e7   :  { %v332_v24 = vpop.f32.mrb[2].mxu0 }
 0x2e8   :  { %v333_v25 = vadd.f32 %v332_v24, %v260_v23  ;;  %v508_v26 = vpop.f32.mrb[3].mxu0 }
 0x2ea   :  { %v336_v27 = vadd.f32 %v333_v25, %v256_v19 }
 0x2ec   :  { %v337_v28 = vsub.f32 0.0, %v336_v27 }
 0x2ee   :  { %v338_v30 = vmul.f32 1.442695, %v337_v28 }
 0x2f0   :  { %564 = vpow2.f32 %v338_v30 }
 0x2fa   :  { %v565_v31 = vpop.eup %564 }
 0x2fb   :  { %v340_v32 = vadd.f32 1.0, %v565_v31 }
 0x2fd   :  { %566 = vrcp.f32 %v340_v32 }
 0x307   :  { %v567_v33 = vpop.eup %566 }
 0x308   :  { %510 = vmatpush3.msra.mxu0 %v567_v33 }
 0x309   :  { %512 = vmatmul.mubr.msk.f32.vlgmr.msra.gmra.mrb[4].mxu0 %vm262_vm3, %v343_v29 }
 0x3dc   :  { %v418_v35 = vpop.f32.mrb[4].mxu0 }
 0x3dd   :  { %v419_v36 = vadd.f32 %v418_v35, %v347_v34  ;;  %v513_v37 = vpop.f32.mrb[5].mxu0 }
 0x3df   :  { %422 = vst [vmem:[%s730_s7] sm:$0x1] %v419_v36 }

// kernel: forward.3
= control target key start
LH: loop header
LB: loop body
LE: loop exit
PB: predicated region body
PF: predicated region fallthrough
CT: control target
= control target key end

     0   :  { %s2649_s27 = smov 0   ;;  %s3654_s0 = inlined_call_operand.vmem [shape: f32[8,8,288], index: 0, kind: input, shape index: {}]   ;;  %s3655_s1 = inlined_call_operand.vmem [shape: f32[16,24], index: 1, kind: input, shape index: {}]   ;;  %s3656_s2 = inlined_call_operand.vmem [shape: f32[24,8], index: 2, kind: input, shape index: {}]   ;;  %s3657_s3 = inlined_call_operand.vmem [shape: f32[768,256], index: 3, kind: input, shape index: {}]   ;;  %s3658_s4 = inlined_call_operand.vmem [shape: f32[8,24], index: 4, kind: input, shape index: {}]   ;;  %s3659_s5 = inlined_call_operand.vmem [shape: f32[8,4], index: 5, kind: input, shape index: {}]   ;;  %s3660_s6 = inlined_call_operand.vmem [shape: f32[16,128], index: 6, kind: input, shape index: {}]   ;;  %s3661_s7 = inlined_call_operand.vmem [shape: f32[128,128], index: 7, kind: input, shape index: {}]   ;;  %s3662_s8 = inlined_call_operand.vmem [shape: f32[8,8,128], index: 8, kind: output, shape index: {}]  }
   0x1 LB: > { %s2132_s28 = sadd.s32 4294967295, %s2593_s27   ;;  %p2136_p0 = scmp.ge.s32.totalorder %s2593_s27, 1  ;;  %s2593_s27 = sphi %s2649_s27, %s18_s27  }
   0x2   : > { %p264_p1 = scmp.lt.s32.totalorder %s2593_s27, 3 }
   0x4   : > { %p265_p2 = pnand %p2136_p0, %p264_p1 }
   0x5   : > { %s2137_s29 = sshll.u32 (!%p265_p2), %s2132_s28, 2  ;;  %s2595_s12 = smov (!%p265_p2), 96   ;;  %v2596_v3 = vmov (!%p265_p2), 0.0   ;;  %v2598_v18 = vmov (!%p265_p2), 0   ;;  %v2721_v19 = vld [vmem:[%s3659_s5] sm:$0xff] (!%p265_p2)  ;;  %vm340_vm0 = vcmask (!%p265_p2), 916480  }
   0x6   : > { %268 = sbr.rel (%p265_p2) target bundleno = 1518 (0x5ee), region = 52  ;;  %p300_p3 = scmp.lt.s32.totalorder (!%p265_p2), %s2137_s29, 7  ;;  %506 = vmatprep.mubr.f32.mxu0 (!%p265_p2), %v2596_v3  ;;  %583 = vmatprep.mubr.f32.mxu1 (!%p265_p2), %v2596_v3  ;;  %vm390_vm1 = vcmask (!%p265_p2), 785408   ;;  %v2739_v37 = vld [vmem:[%s3655_s1] sm:$0xff] (!%p265_p2)  ;;  %vm435_vm2 = vcmask (!%p265_p2), 195584   ;;  %v426_v43 = vld [vmem:[%s3655_s1 + $0x8] sm:$0xff] (!%p265_p2) }
   0x7   : > { %s2597_s13 = smov (!%p265_p2), 112   ;;  %2528 = vset.pattern.permute.xlu0 (!%p265_p2), %v2598_v18  ;;  %2529 = vset.pattern.permute.xlu1 (!%p265_p2), %v2598_v18  ;;  %s2599_s16 = smov (!%p265_p2), 127   ;;  %vm817_vm3 = vcmask (!%p265_p2), 64512   ;;  %vm2603_vm4 = vmmov (!%p265_p2), 0   ;;  %vm1912_vm5 = vcmask (!%p265_p2), 1040384   ;;  %vm1914_vm6 = vcmask (!%p265_p2), 1041408  }
   0x8   : > { %vm1916_vm7 = vcmask (!%p265_p2), 1042432   ;;  %vm1918_vm8 = vcmask (!%p265_p2), 1043456   ;;  %vm1920_vm9 = vcmask (!%p265_p2), 1044480   ;;  %vm1922_vm10 = vcmask (!%p265_p2), 1045504  }
   0x9   : > { %vm1924_vm11 = vcmask (!%p265_p2), 1046528  }
   0xd   : > { %s3664_s29 = smov (!%p300_p3, %s2137_s29), 7 }
   0xe   : > { %s2485_s30 = smul.u32 24, %s3664_s29 }
  0x10   : > { %s2663_s11 = scalar_lea.vmem %s3654_s0, %s2485_s30 }
  0x11   : > { %v317_v0 = vld [vmem:[%s2663_s11 + $0x8] sm:$0xff]  ;;  %v327_v1 = vld [vmem:[%s2663_s11 + $0x10] sm:$0xff]  ;;  %v2670_v4 = vld [vmem:[%s2663_s11 + $0x20] sm:$0xff] }
  0x12   : > { %v2503_v2 = vpack.i.bf16 %v327_v1, %v317_v0  ;;  %386 = vrot.lane.b32.xlu1 %v317_v0, %s2595_s12  ;;  %v2147_v5 = vld [vmem:[%s2663_s11 + $0x28] sm:$0xff]  ;;  %v316_v6 = vld [vmem:[%s2663_s11] sm:$0xff]  ;;  %v2680_v8 = vld [vmem:[%s2663_s11 + $0x18] sm:$0xff] }
  0x13   : > { %v2508_v7 = vpack.i.bf16 %v2147_v5, %v2670_v4  ;;  %v2683_v9 = vld [vmem:[%s2663_s11 + $0x38] sm:$0xff]  ;;  %v2692_v11 = vld [vmem:[%s2663_s11 + $0x50] sm:$0xff]  ;;  %v2148_v14 = vld [vmem:[%s2663_s11 + $0x40] sm:$0xff] }
  0x14   : > { %2504 = vrot.lane.b32.xlu0 %v2503_v2, %s2597_s13  ;;  %v2513_v10 = vpack.i.bf16 %v2683_v9, %v2680_v8  ;;  %v2149_v12 = vld [vmem:[%s2663_s11 + $0x58] sm:$0xff]  ;;  %v2697_v13 = vld [vmem:[%s2663_s11 + $0x30] sm:$0xff]  ;;  %v2708_v17 = vld [vmem:[%s2663_s11 + $0x48] sm:$0xff]  ;;  %s2140_s11 = sshll.u32 %s3664_s29, 3 }
  0x15   : > { %v2523_v15 = vpack.i.bf16 %v2149_v12, %v2692_v11  ;;  %v2518_v16 = vpack.i.bf16 %v2697_v13, %v2148_v14 }
  0x16   : > { %388 = vrot.lane.b32.xlu1 %v327_v1, %s2595_s12 }
  0x18   : > { %334 = vrot.lane.b32.xlu0 %v316_v6, %s2597_s13 }
  0x1a   : > { %2509 = vrot.lane.b32.xlu1 %v2508_v7, %s2597_s13 }
  0x1c   : > { %384 = vrot.lane.b32.xlu0 %v316_v6, %s2595_s12 }
  0x1e   : > { %397 = vrot.lane.b32.xlu1 %v2670_v4, %s2595_s12 }
  0x20   : > { %2514 = vrot.lane.b32.xlu0 %v2513_v10, %s2597_s13 }
  0x22   : > { %395 = vrot.lane.b32.xlu1 %v2680_v8, %s2595_s12 }
  0x24   : > { %399 = vrot.lane.b32.xlu0 %v2147_v5, %s2595_s12 }
  0x26   : > { %2524 = vrot.lane.b32.xlu1 %v2523_v15, %s2597_s13 }
  0x28   : > { %2519 = vrot.lane.b32.xlu0 %v2518_v16, %s2597_s13 }
  0x2a   : > { %407 = vrot.lane.b32.xlu1 %v2683_v9, %s2595_s12 }
  0x2c   : > { %374 = vrot.lane.b32.xlu0 %v2708_v17, %s2597_s13 }
  0x2e   : > { %405 = vrot.lane.b32.xlu1 %v2697_v13, %s2595_s12 }
  0x30   : > { %409 = vrot.lane.b32.xlu0 %v2148_v14, %s2595_s12 }
  0x32   : > { %419 = vrot.lane.b32.xlu1 %v2149_v12, %s2595_s12 }
  0x34   : > { %417 = vrot.lane.b32.xlu0 %v2692_v11, %s2595_s12 }
  0x36   : > { %314 = vrot.lane.b32.xlu1 %v2721_v19, %s2599_s16 }
  0x38   : > { %415 = vrot.lane.b32.xlu0 %v2708_v17, %s2595_s12 }
  0x3a   : > { %428 = vperm.xlu1 %2529, %v2721_v19  }
  0x84   : > { %v387_v20 = vpop.permute.xlu1 %386 }
  0x86   : > { %v2505_v21 = vpop.permute.xlu0 %2504 }
  0x87   : > { %v2507_v22 = vunpack.i.h.bf16 %v2505_v21  ;;  %v2506_v23 = vunpack.i.l.bf16 %v2505_v21 }
  0x88   : > { %v389_v24 = vpop.permute.xlu1 %388 }
  0x89   : > { %v342_v25 = vsel %vm340_vm0, %v2506_v23, %v2507_v22  ;;  %v2732_v34 = vsel %vm390_vm1, %v387_v20, %v389_v24 }
  0x8a   : > { %v335_v26 = vpop.permute.xlu0 %334  ;;  %v2229_v27 = vpack.c.bf16 %v342_v25, %v317_v0 }
  0x8b   : > { %v341_v28 = vsel %vm340_vm0, %v335_v26, %v2506_v23 }
  0x8c   : > { %2230 = vmatprep.subr.bf16.mxu0 %v2229_v27  ;;  %v2231_v29 = vpack.c.bf16 %v341_v28, %v316_v6  ;;  %v2510_v30 = vpop.permute.xlu1 %2509 }
  0x8d   : > { %v2512_v31 = vunpack.i.h.bf16 %v2510_v30  ;;  %v2511_v32 = vunpack.i.l.bf16 %v2510_v30 }
  0x8e   : > { %2232 = vmatpush1.bf16.msra.mxu0 %v2231_v29  ;;  %v385_v33 = vpop.permute.xlu0 %384 }
  0x8f   : > { %446 = vmatprep.subr.mxu0 %v2732_v34  ;;  %v355_v35 = vsel %vm340_vm0, %v2511_v32, %v2512_v31  ;;  %v2743_v39 = vsel %vm390_vm1, %v385_v33, %v387_v20 }
  0x90   : > { %v398_v36 = vpop.permute.xlu1 %397  ;;  %v2233_v38 = vpack.c.bf16 %v355_v35, %v2670_v4 }
  0x92   : > { %447 = vmatpush1.msra.mxu0 %v2743_v39  ;;  %v2515_v40 = vpop.permute.xlu0 %2514  ;;  %2234 = vmatprep.subr.bf16.mxu1 %v2233_v38 }
  0x93   : > { %v2516_v41 = vunpack.i.l.bf16 %v2515_v40  ;;  %2150 = vmatmul.mubr.msk.f32.vlgmr.msra.gmra.mrb[0].mxu0 %vm435_vm2, %v2739_v37  ;;  %v2517_v49 = vunpack.i.h.bf16 %v2515_v40 }
  0x94   : > { %512 = vmatprep.mubr.f32.mxu0 %v2596_v3  ;;  %v396_v42 = vpop.permute.xlu1 %395 }
  0x95   : > { %v354_v44 = vsel %vm340_vm0, %v2516_v41, %v2511_v32  ;;  %v2761_v52 = vsel %vm390_vm1, %v396_v42, %v398_v36 }
  0x96   : > { %v400_v45 = vpop.permute.xlu0 %399  ;;  %v2235_v46 = vpack.c.bf16 %v354_v44, %v2680_v8 }
  0x97   : > { %2151 = vmatmul.mubr.msk.f32.gmra.mrb[2].mxu0 %vm435_vm2, %v426_v43  ;;  %v2756_v47 = vsel %vm390_vm1, %v398_v36, %v400_v45 }
  0x98   : > { %2236 = vmatpush1.bf16.msra.mxu1 %v2235_v46  ;;  %v2525_v48 = vpop.permute.xlu1 %2524  ;;  %660 = vmatprep.mubr.f32.mxu0 %v2596_v3 }
  0x99   : > { %v2527_v50 = vunpack.i.h.bf16 %v2525_v48  ;;  %v2526_v51 = vunpack.i.l.bf16 %v2525_v48  ;;  %523 = vmatprep.subr.mxu1 %v2756_v47 }
  0x9a   : > { %v2520_v53 = vpop.permute.xlu0 %2519 }
  0x9b   : > { %v2522_v54 = vunpack.i.h.bf16 %v2520_v53  ;;  %v2521_v55 = vunpack.i.l.bf16 %v2520_v53  ;;  %v381_v56 = vsel %vm340_vm0, %v2526_v51, %v2527_v50 }
  0x9c   : > { %524 = vmatpush1.msra.mxu1 %v2761_v52  ;;  %v408_v57 = vpop.permute.xlu1 %407  ;;  %v2241_v58 = vpack.c.bf16 %v381_v56, %v2692_v11 }
  0x9d   : > { %v367_v59 = vsel %vm340_vm0, %v2522_v54, %v2517_v49  ;;  %2152 = vmatmul.mubr.msk.f32.vlgmr.msra.gmra.mrb[0].mxu1 %vm435_vm2, %v2739_v37  ;;  %v368_v60 = vsel %vm340_vm0, %v2517_v49, %v2521_v55 }
  0x9e   : > { %v2239_v61 = vpack.c.bf16 %v367_v59, %v2697_v13  ;;  %v375_v62 = vpop.permute.xlu0 %374  ;;  %589 = vmatprep.mubr.f32.mxu1 %v2596_v3  ;;  %v2237_v63 = vpack.c.bf16 %v368_v60, %v2683_v9  ;;  %2242 = vmatprep.subr.bf16.mxu1 %v2241_v58 }
  0x9f   : > { %v380_v0 = vsel %vm340_vm0, %v375_v62, %v2526_v51 }
  0xa0   : > { %v2243_v1 = vpack.c.bf16 %v380_v0, %v2708_v17  ;;  %2238 = vmatprep.subr.bf16.mxu0 %v2237_v63  ;;  %v406_v2 = vpop.permute.xlu1 %405 }
  0xa1   : > { %2153 = vmatmul.mubr.msk.f32.gmra.mrb[2].mxu1 %vm435_vm2, %v426_v43  ;;  %2240 = vmatpush1.bf16.msra.mxu0 %v2239_v61  ;;  %v2777_v5 = vsel %vm390_vm1, %v406_v2, %v408_v57 }
  0xa2   : > { %v410_v4 = vpop.permute.xlu0 %409  ;;  %2244 = vmatpush1.bf16.msra.mxu1 %v2243_v1  ;;  %737 = vmatprep.mubr.f32.mxu1 %v2596_v3 }
  0xa3   : > { %v2781_v6 = vsel %vm390_vm1, %v408_v57, %v410_v4 }
  0xa4   : > { %600 = vmatprep.subr.mxu0 %v2781_v6  ;;  %v420_v7 = vpop.permute.xlu1 %419 }
  0xa5   : > { %601 = vmatpush1.msra.mxu0 %v2777_v5 }
  0xa6   : > { %v418_v8 = vpop.permute.xlu0 %417  ;;  %2154 = vmatmul.mubr.msk.f32.vlgmr.msra.gmra.mrb[4].mxu0 %vm435_vm2, %v2739_v37 }
  0xa7   : > { %666 = vmatprep.mubr.f32.mxu0 %v2596_v3  ;;  %v2789_v9 = vsel %vm390_vm1, %v418_v8, %v420_v7 }
  0xa8   : > { %677 = vmatprep.subr.mxu1 %v2789_v9  ;;  %v315_v10 = vpop.permute.xlu1 %314 }
  0xa9   : > { %432 = vperm.xlu0 %2528, %v315_v10  }
  0xaa   : > { %v416_v11 = vpop.permute.xlu0 %415  ;;  %2155 = vmatmul.mubr.msk.f32.gmra.mrb[6].mxu0 %vm435_vm2, %v426_v43 }
  0xab   : > { %v2794_v12 = vsel %vm390_vm1, %v416_v11, %v418_v8  ;;  %1057 = vmatprep.mubr.f32.mxu0 %v2596_v3 }
  0xac   : > { %678 = vmatpush1.msra.mxu1 %v2794_v12 }
  0xad   : > { %2156 = vmatmul.mubr.msk.f32.vlgmr.msra.gmra.mrb[4].mxu1 %vm435_vm2, %v2739_v37 }
  0xae   : > { %743 = vmatprep.mubr.f32.mxu1 %v2596_v3 }
  0xb1   : > { %2157 = vmatmul.mubr.msk.f32.gmra.mrb[6].mxu1 %vm435_vm2, %v426_v43 }
  0xb2   : > { %891 = vmatprep.mubr.f32.mxu1 %v2596_v3 }
  0xb9   : > { %v2809_v48 = vpop.permute.xlu1 %428 }
 0x128   : > { %v433_v15 = vpop.permute.xlu0 %432 }
 0x166   : > { %v508_v13 = vpop.f32.mrb[0].mxu0 }
 0x167   : > { %v510_v14 = vpop.f32.mrb[1].mxu0  ;;  %v509_v55 = vadd.f32 %v508_v13, %v2809_v48 }
 0x168   : > { %v511_v57 = vadd.f32 %v510_v14, %v2809_v48 }
 0x169   : > { %v750_v1 = vadd.f32 %v509_v55, %v2743_v39  ;;  %v2826_v39 = vld [vmem:[%s3656_s2] sm:$0xff] }
 0x16a   : > { %v514_v16 = vpop.f32.mrb[2].mxu0  ;;  %v751_v8 = vadd.f32 %v511_v57, %v2732_v34  ;;  %v1229_v57 = vld [vmem:[%s3657_s3 + $0x230] sm:$0xff] }
 0x16b   : > { %v515_v17 = vadd.f32 %v514_v16, %v433_v15  ;;  %v516_v18 = vpop.f32.mrb[3].mxu0 }
 0x16c   : > { %v517_v20 = vadd.f32 %v516_v18, %v433_v15 }
 0x16d   : > { %v758_v21 = vsub.f32 0.0, %v515_v17 }
 0x16e   : > { %v759_v22 = vsub.f32 0.0, %v517_v20 }
 0x16f   : > { %v766_v23 = vmul.f32 1.442695, %v758_v21 }
 0x170   : > { %v768_v24 = vmul.f32 1.442695, %v759_v22  ;;  %v585_v25 = vpop.f32.mrb[0].mxu1  ;;  %v2839_v22 = vld [vmem:[%s3656_s2 + $0x8] sm:$0xff] }
 0x171   : > { %2552 = vpow2.f32 %v766_v23  ;;  %v2803_v26 = vpop.f32.mrb[1].mxu1  ;;  %v586_v34 = vadd.f32 %v585_v25, %v2809_v48 }
 0x172   : > { %2554 = vpow2.f32 %v768_v24  ;;  %v588_v18 = vadd.f32 %v2803_v26, %v2809_v48 }
 0x173   : > { %v752_v24 = vadd.f32 %v586_v34, %v2761_v52 }
 0x174   : > { %v591_v27 = vpop.f32.mrb[2].mxu1 }
 0x175   : > { %v592_v28 = vadd.f32 %v591_v27, %v433_v15  ;;  %v593_v29 = vpop.f32.mrb[3].mxu1  ;;  %v753_v27 = vadd.f32 %v588_v18, %v2756_v47 }
 0x176   : > { %v594_v30 = vadd.f32 %v593_v29, %v433_v15  ;;  %v2851_v29 = vld [vmem:[%s3656_s2 + $0x10] sm:$0xff] }
 0x177   : > { %v760_v31 = vsub.f32 0.0, %v592_v28 }
 0x178   : > { %v761_v32 = vsub.f32 0.0, %v594_v30 }
 0x179   : > { %v770_v33 = vmul.f32 1.442695, %v760_v31  ;;  %v2805_v35 = vpop.f32.mrb[4].mxu0 }
 0x17a   : > { %v772_v36 = vmul.f32 1.442695, %v761_v32  ;;  %v2807_v37 = vpop.f32.mrb[5].mxu0  ;;  %v663_v47 = vadd.f32 %v2805_v35, %v2809_v48  ;;  %v1224_v35 = vld [vmem:[%s3657_s3 + $0x208] sm:$0xff] }
 0x17b   : > { %v2553_v38 = vpop.eup %2552  ;;  %2556 = vpow2.f32 %v770_v33  ;;  %v665_v33 = vadd.f32 %v2807_v37, %v2809_v48  ;;  %v1226_v37 = vld [vmem:[%s3657_s3 + $0x218] sm:$0xff] }
 0x17c   : > { %v2555_v40 = vpop.eup %2554  ;;  %2558 = vpow2.f32 %v772_v36  ;;  %v782_v41 = vadd.f32 1.0, %v2553_v38  ;;  %v754_v38 = vadd.f32 %v663_v47, %v2777_v5  ;;  %v1223_v5 = vld [vmem:[%s3657_s3 + $0x200] sm:$0xff] }
 0x17d   : > { %v783_v42 = vadd.f32 1.0, %v2555_v40  ;;  %v668_v43 = vpop.f32.mrb[6].mxu0 }
 0x17e   : > { %v669_v44 = vadd.f32 %v668_v43, %v433_v15  ;;  %v670_v45 = vpop.f32.mrb[7].mxu0  ;;  %2560 = vrcp.f32 %v782_v41  ;;  %v755_v41 = vadd.f32 %v665_v33, %v2781_v6  ;;  %v1228_v6 = vld [vmem:[%s3657_s3 + $0x228] sm:$0xff]  ;;  %v1167_v33 = vld [vmem:[%s3657_s3 + $0x40] sm:$0xff] }
 0x17f   : > { %2562 = vrcp.f32 %v783_v42  ;;  %v671_v46 = vadd.f32 %v670_v45, %v433_v15 }
 0x180   : > { %v762_v49 = vsub.f32 0.0, %v669_v44  ;;  %v2811_v50 = vpop.f32.mrb[4].mxu1  ;;  %v1225_v44 = vld [vmem:[%s3657_s3 + $0x210] sm:$0xff] }
 0x181   : > { %v763_v51 = vsub.f32 0.0, %v671_v46  ;;  %v2813_v53 = vpop.f32.mrb[5].mxu1  ;;  %v740_v45 = vadd.f32 %v2811_v50, %v2809_v48  ;;  %v2311_v50 = vpack.c.bf16 %v1225_v44, %v1223_v5  ;;  %v1246_v5 = vld [vmem:[%s3657_s3 + $0x2b8] sm:$0xff] }
 0x182   : > { %v774_v54 = vmul.f32 1.442695, %v762_v49  ;;  %v2309_v49 = vpack.c.bf16 %v1226_v37, %v1224_v35  ;;  %v1174_v37 = vld [vmem:[%s3657_s3 + $0x78] sm:$0xff] }
 0x183   : > { %v776_v56 = vmul.f32 1.442695, %v763_v51  ;;  %v1230_v51 = vld [vmem:[%s3657_s3 + $0x238] sm:$0xff] }
 0x184   : > { %2564 = vpow2.f32 %v774_v54  ;;  %v745_v58 = vpop.f32.mrb[6].mxu1  ;;  %v742_v54 = vadd.f32 %v2813_v53, %v2809_v48  ;;  %v2313_v55 = vpack.c.bf16 %v1230_v51, %v1228_v6  ;;  %v756_v48 = vadd.f32 %v740_v45, %v2794_v12  ;;  %v1160_v53 = vld [vmem:[%s3657_s3 + $0x8] sm:$0xff]  ;;  %v1159_v12 = vld [vmem:[%s3657_s3] sm:$0xff]  ;;  %v1173_v6 = vld [vmem:[%s3657_s3 + $0x70] sm:$0xff] }
 0x185   : > { %v2557_v59 = vpop.eup %2556  ;;  %2566 = vpow2.f32 %v776_v56  ;;  %v746_v60 = vadd.f32 %v745_v58, %v433_v15  ;;  %v747_v61 = vpop.f32.mrb[7].mxu1  ;;  %v1227_v56 = vld [vmem:[%s3657_s3 + $0x220] sm:$0xff]  ;;  %v1162_v58 = vld [vmem:[%s3657_s3 + $0x18] sm:$0xff]  ;;  %v1176_v51 = vld [vmem:[%s3657_s3 + $0x88] sm:$0xff] }
 0x186   : > { %v2559_v62 = vpop.eup %2558  ;;  %v784_v63 = vadd.f32 1.0, %v2557_v59  ;;  %v748_v0 = vadd.f32 %v747_v61, %v433_v15  ;;  %v1161_v61 = vld [vmem:[%s3657_s3 + $0x10] sm:$0xff] }
 0x187   : > { %v785_v2 = vadd.f32 1.0, %v2559_v62  ;;  %v764_v4 = vsub.f32 0.0, %v746_v60  ;;  %v757_v60 = vadd.f32 %v742_v54, %v2789_v9  ;;  %v1164_v9 = vld [vmem:[%s3657_s3 + $0x28] sm:$0xff]  ;;  %v2247_v34 = vpack.c.bf16 %v1161_v61, %v1159_v12 }
 0x188   : > { %v2561_v7 = vpop.eup %2560  ;;  %2568 = vrcp.f32 %v784_v63  ;;  %v765_v10 = vsub.f32 0.0, %v748_v0  ;;  %v2315_v0 = vpack.c.bf16 %v1229_v57, %v1227_v56  ;;  %v1243_v56 = vld [vmem:[%s3657_s3 + $0x2a0] sm:$0xff]  ;;  %v1245_v57 = vld [vmem:[%s3657_s3 + $0x2b0] sm:$0xff]  ;;  %v1180_v12 = vld [vmem:[%s3657_s3 + $0xa8] sm:$0xff] }
 0x189   : > { %v2563_v11 = vpop.eup %2562  ;;  %2570 = vrcp.f32 %v785_v2  ;;  %v778_v13 = vmul.f32 1.442695, %v764_v4  ;;  %v2819_v14 = vmul.f32 %v2561_v7, %v750_v1  ;;  %v1232_v1 = vld [vmem:[%s3657_s3 + $0x248] sm:$0xff]  ;;  %v1234_v2 = vld [vmem:[%s3657_s3 + $0x258] sm:$0xff]  ;;  %v2245_v7 = vpack.c.bf16 %v1162_v58, %v1160_v53 }
 0x18a   : > { %v780_v16 = vmul.f32 1.442695, %v765_v10  ;;  %v2821_v17 = vmul.f32 %v2563_v11, %v751_v8  ;;  %v1166_v8 = vld [vmem:[%s3657_s3 + $0x38] sm:$0xff]  ;;  %v1231_v10 = vld [vmem:[%s3657_s3 + $0x240] sm:$0xff]  ;;  %v1233_v11 = vld [vmem:[%s3657_s3 + $0x250] sm:$0xff]  ;;  %v2331_v61 = vpack.c.bf16 %v1245_v57, %v1243_v56 }
 0x18b   : > { %2572 = vpow2.f32 %v778_v13  ;;  %v1236_v13 = vld [vmem:[%s3657_s3 + $0x268] sm:$0xff]  ;;  %v2249_v18 = vpack.c.bf16 %v1166_v8, %v1164_v9  ;;  %v1191_v56 = vld [vmem:[%s3657_s3 + $0x100] sm:$0xff]  ;;  %v1193_v57 = vld [vmem:[%s3657_s3 + $0x110] sm:$0xff] }
 0x18c   : > { %2574 = vpow2.f32 %v780_v16  ;;  %827 = vmatprep.subr.mxu1 %v2821_v17  ;;  %v1238_v16 = vld [vmem:[%s3657_s3 + $0x278] sm:$0xff] }
 0x18d   : > { %828 = vmatpush1.msra.mxu1 %v2819_v14 }
 0x18e   : > { %v2565_v15 = vpop.eup %2564  ;;  %2158 = vmatmul.mubr.msk.f32.vlgmr.msra.gmra.mrb[8].mxu1 %vm817_vm3, %v2826_v39 }
 0x18f   : > { %v2567_v20 = vpop.eup %2566  ;;  %v786_v21 = vadd.f32 1.0, %v2565_v15  ;;  %897 = vmatprep.mubr.f32.mxu1 %v2596_v3  ;;  %v2317_v15 = vpack.c.bf16 %v1234_v2, %v1232_v1  ;;  %v1249_v1 = vld [vmem:[%s3657_s3 + $0x2d0] sm:$0xff]  ;;  %v1252_v2 = vld [vmem:[%s3657_s3 + $0x2e8] sm:$0xff] }
 0x190   : > { %v787_v23 = vadd.f32 1.0, %v2567_v20  ;;  %v1163_v20 = vld [vmem:[%s3657_s3 + $0x20] sm:$0xff] }
 0x191   : > { %2576 = vrcp.f32 %v786_v21  ;;  %v1165_v21 = vld [vmem:[%s3657_s3 + $0x30] sm:$0xff] }
 0x192   : > { %v2569_v25 = vpop.eup %2568  ;;  %2578 = vrcp.f32 %v787_v23  ;;  %2159 = vmatmul.mubr.msk.f32.gmra.mrb[10].mxu1 %vm817_vm3, %v2839_v22  ;;  %v1168_v23 = vld [vmem:[%s3657_s3 + $0x48] sm:$0xff]  ;;  %v2251_v47 = vpack.c.bf16 %v1165_v21, %v1163_v20  ;;  %v1251_v20 = vld [vmem:[%s3657_s3 + $0x2e0] sm:$0xff]  ;;  %v1253_v21 = vld [vmem:[%s3657_s3 + $0x2f0] sm:$0xff] }
 0x193   : > { %v2571_v26 = vpop.eup %2570  ;;  %v2845_v28 = vmul.f32 %v2569_v25, %v752_v24  ;;  %903 = vmatprep.mubr.f32.mxu1 %v2596_v3  ;;  %v2319_v24 = vpack.c.bf16 %v1233_v11, %v1231_v10  ;;  %v1170_v25 = vld [vmem:[%s3657_s3 + $0x58] sm:$0xff]  ;;  %v1179_v11 = vld [vmem:[%s3657_s3 + $0xa0] sm:$0xff] }
 0x194   : > { %v2853_v30 = vmul.f32 %v2571_v26, %v753_v27  ;;  %v2321_v27 = vpack.c.bf16 %v1238_v16, %v1236_v13  ;;  %v1235_v26 = vld [vmem:[%s3657_s3 + $0x260] sm:$0xff]  ;;  %v1181_v13 = vld [vmem:[%s3657_s3 + $0xb0] sm:$0xff]  ;;  %v1184_v16 = vld [vmem:[%s3657_s3 + $0xc8] sm:$0xff] }
 0x195   : > { %v2573_v52 = vpop.eup %2572 }
 0x196   : > { %v2575_v31 = vpop.eup %2574  ;;  %v788_v32 = vadd.f32 1.0, %v2573_v52  ;;  %910 = vmatprep.subr.mxu1 %v2853_v30  ;;  %2160 = vmatmul.mubr.msk.f32.gmra.mrb[12].mxu1 %vm817_vm3, %v2851_v29  ;;  %v1237_v52 = vld [vmem:[%s3657_s3 + $0x270] sm:$0xff] }
 0x197   : > { %v789_v36 = vadd.f32 1.0, %v2575_v31  ;;  %911 = vmatpush1.msra.mxu1 %v2845_v28  ;;  %974 = vmatprep.mubr.f32.mxu1 %v2596_v3  ;;  %v1242_v31 = vld [vmem:[%s3657_s3 + $0x298] sm:$0xff]  ;;  %v2323_v35 = vpack.c.bf16 %v1237_v52, %v1235_v26  ;;  %v1183_v26 = vld [vmem:[%s3657_s3 + $0xc0] sm:$0xff]  ;;  %v1185_v52 = vld [vmem:[%s3657_s3 + $0xd0] sm:$0xff] }
 0x198   : > { %2580 = vrcp.f32 %v788_v32  ;;  %v2253_v32 = vpack.c.bf16 %v1170_v25, %v1168_v23  ;;  %v1256_v23 = vld [vmem:[%s3657_s3 + $0x308] sm:$0xff]  ;;  %v2267_v25 = vpack.c.bf16 %v1181_v13, %v1179_v11  ;;  %v1267_v11 = vld [vmem:[%s3657_s3 + $0x360] sm:$0xff]  ;;  %v1269_v13 = vld [vmem:[%s3657_s3 + $0x370] sm:$0xff] }
 0x199   : > { %2582 = vrcp.f32 %v789_v36  ;;  %v1169_v36 = vld [vmem:[%s3657_s3 + $0x50] sm:$0xff] }
 0x19a   : > { %2161 = vmatmul.mubr.msk.f32.vlgmr.msra.gmra.mrb[14].mxu1 %vm817_vm3, %v2826_v39  ;;  %v2255_v44 = vpack.c.bf16 %v1169_v36, %v1167_v33  ;;  %v1255_v33 = vld [vmem:[%s3657_s3 + $0x300] sm:$0xff]  ;;  %v1257_v36 = vld [vmem:[%s3657_s3 + $0x310] sm:$0xff] }
 0x19b   : > { %v2577_v40 = vpop.eup %2576  ;;  %980 = vmatprep.mubr.f32.mxu1 %v2596_v3 }
 0x19c   : > { %v2579_v42 = vpop.eup %2578  ;;  %v2875_v43 = vmul.f32 %v2577_v40, %v754_v38  ;;  %v1172_v38 = vld [vmem:[%s3657_s3 + $0x68] sm:$0xff] }
 0x19d   : > { %v2885_v46 = vmul.f32 %v2579_v42, %v755_v41  ;;  %v1239_v41 = vld [vmem:[%s3657_s3 + $0x280] sm:$0xff]  ;;  %v1241_v42 = vld [vmem:[%s3657_s3 + $0x290] sm:$0xff]  ;;  %v2257_v45 = vpack.c.bf16 %v1174_v37, %v1172_v38  ;;  %v1260_v38 = vld [vmem:[%s3657_s3 + $0x328] sm:$0xff]  ;;  %v2271_v37 = vpack.c.bf16 %v1185_v52, %v1183_v26 }
 0x19e   : > { %2162 = vmatmul.mubr.msk.f32.gmra.mrb[16].mxu1 %vm817_vm3, %v2839_v22  ;;  %v2327_v54 = vpack.c.bf16 %v1241_v42, %v1239_v41  ;;  %v1187_v41 = vld [vmem:[%s3657_s3 + $0xe0] sm:$0xff]  ;;  %v1189_v42 = vld [vmem:[%s3657_s3 + $0xf0] sm:$0xff] }
 0x19f   : > { %993 = vmatprep.subr.mxu0 %v2885_v46  ;;  %986 = vmatprep.mubr.f32.mxu1 %v2596_v3  ;;  %v1271_v26 = vld [vmem:[%s3657_s3 + $0x380] sm:$0xff]  ;;  %v1273_v52 = vld [vmem:[%s3657_s3 + $0x390] sm:$0xff] }
 0x1a0   : > { %994 = vmatpush1.msra.mxu0 %v2875_v43 }
 0x1a1   : > { %2164 = vmatmul.mubr.msk.f32.vlgmr.msra.gmra.mrb[8].mxu0 %vm817_vm3, %v2826_v39  ;;  %2310 = vmatprep.subr.bf16.mxu0 %v2309_v49  ;;  %v1171_v49 = vld [vmem:[%s3657_s3 + $0x60] sm:$0xff] }
 0x1a2   : > { %v2581_v59 = vpop.eup %2580  ;;  %2163 = vmatmul.mubr.msk.f32.gmra.mrb[18].mxu1 %vm817_vm3, %v2851_v29  ;;  %1063 = vmatprep.mubr.f32.mxu0 %v2596_v3  ;;  %v2259_v53 = vpack.c.bf16 %v1173_v6, %v1171_v49  ;;  %v1259_v49 = vld [vmem:[%s3657_s3 + $0x320] sm:$0xff]  ;;  %v1261_v6 = vld [vmem:[%s3657_s3 + $0x330] sm:$0xff] }
 0x1a3   : > { %v2583_v62 = vpop.eup %2582  ;;  %v2925_v63 = vmul.f32 %v2581_v59, %v756_v48  ;;  %1140 = vmatprep.mubr.f32.mxu1 %v2596_v3  ;;  %2312 = vmatpush1.bf16.msra.mxu0 %v2311_v50  ;;  %v1178_v50 = vld [vmem:[%s3657_s3 + $0x98] sm:$0xff]  ;;  %v1248_v48 = vld [vmem:[%s3657_s3 + $0x2c8] sm:$0xff]  ;;  %v1175_v59 = vld [vmem:[%s3657_s3 + $0x80] sm:$0xff] }
 0x1a4   : > { %v2937_v4 = vmul.f32 %v2583_v62, %v757_v60  ;;  %2314 = vmatprep.subr.bf16.mxu0 %v2313_v55  ;;  %v2261_v58 = vpack.c.bf16 %v1178_v50, %v1176_v51  ;;  %v1177_v60 = vld [vmem:[%s3657_s3 + $0x90] sm:$0xff]  ;;  %v1182_v62 = vld [vmem:[%s3657_s3 + $0xb8] sm:$0xff]  ;;  %v1264_v51 = vld [vmem:[%s3657_s3 + $0x348] sm:$0xff]  ;;  %v2275_v50 = vpack.c.bf16 %v1189_v42, %v1187_v41 }
 0x1a5   : > { %2165 = vmatmul.mubr.msk.f32.gmra.mrb[10].mxu0 %vm817_vm3, %v2839_v22  ;;  %v2263_v8 = vpack.c.bf16 %v1177_v60, %v1175_v59  ;;  %v2265_v10 = vpack.c.bf16 %v1182_v62, %v1180_v12  ;;  %v1263_v59 = vld [vmem:[%s3657_s3 + $0x340] sm:$0xff]  ;;  %v1265_v60 = vld [vmem:[%s3657_s3 + $0x350] sm:$0xff]  ;;  %v1268_v12 = vld [vmem:[%s3657_s3 + $0x368] sm:$0xff]  ;;  %v2279_v62 = vpack.c.bf16 %v1193_v57, %v1191_v56 }
 0x1a6   : > { %1076 = vmatprep.subr.mxu1 %v2937_v4  ;;  %1069 = vmatprep.mubr.f32.mxu0 %v2596_v3  ;;  %v1275_v41 = vld [vmem:[%s3657_s3 + $0x3a0] sm:$0xff]  ;;  %v1277_v42 = vld [vmem:[%s3657_s3 + $0x3b0] sm:$0xff] }
 0x1a7   : > { %1077 = vmatpush1.msra.mxu1 %v2925_v63  ;;  %2316 = vmatpush1.bf16.msra.mxu0 %v2315_v0  ;;  %v1247_v0 = vld [vmem:[%s3657_s3 + $0x2c0] sm:$0xff]  ;;  %v1281_v57 = vld [vmem:[%s3657_s3 + $0x3d0] sm:$0xff] }
 0x1a8   : > { %2167 = vmatmul.mubr.msk.f32.vlgmr.msra.gmra.mrb[20].mxu1 %vm817_vm3, %v2826_v39  ;;  %2246 = vmatprep.subr.bf16.mxu1 %v2245_v7  ;;  %v1240_v39 = vld [vmem:[%s3657_s3 + $0x288] sm:$0xff]  ;;  %v1254_v7 = vld [vmem:[%s3657_s3 + $0x2f8] sm:$0xff]  ;;  %v1279_v56 = vld [vmem:[%s3657_s3 + $0x3c0] sm:$0xff] }
 0x1a9   : > { %1146 = vmatprep.mubr.f32.mxu1 %v2596_v3  ;;  %2166 = vmatmul.mubr.msk.f32.gmra.mrb[12].mxu0 %vm817_vm3, %v2851_v29  ;;  %v2325_v40 = vpack.c.bf16 %v1242_v31, %v1240_v39  ;;  %v1188_v39 = vld [vmem:[%s3657_s3 + $0xe8] sm:$0xff]  ;;  %v2339_v31 = vpack.c.bf16 %v1253_v21, %v1251_v20  ;;  %v1199_v20 = vld [vmem:[%s3657_s3 + $0x140] sm:$0xff]  ;;  %v1201_v21 = vld [vmem:[%s3657_s3 + $0x150] sm:$0xff] }
 0x1aa   : > { %2248 = vmatpush1.bf16.msra.mxu1 %v2247_v34  ;;  %2318 = vmatprep.subr.bf16.mxu0 %v2317_v15  ;;  %v2335_v34 = vpack.c.bf16 %v1249_v1, %v1247_v0  ;;  %v1186_v15 = vld [vmem:[%s3657_s3 + $0xd8] sm:$0xff]  ;;  %v1195_v0 = vld [vmem:[%s3657_s3 + $0x120] sm:$0xff]  ;;  %v1197_v1 = vld [vmem:[%s3657_s3 + $0x130] sm:$0xff] }
 0x1ab   : > { %2250 = vmatprep.subr.bf16.mxu1 %v2249_v18  ;;  %2320 = vmatpush1.bf16.msra.mxu0 %v2319_v24  ;;  %v2337_v18 = vpack.c.bf16 %v1254_v7, %v1252_v2  ;;  %v1258_v24 = vld [vmem:[%s3657_s3 + $0x318] sm:$0xff]  ;;  %v1200_v2 = vld [vmem:[%s3657_s3 + $0x148] sm:$0xff]  ;;  %v2351_v7 = vpack.c.bf16 %v1265_v60, %v1263_v59  ;;  %v2367_v59 = vpack.c.bf16 %v1281_v57, %v1279_v56  ;;  %v1299_v56 = vld [vmem:[%s3657_s3 + $0x460] sm:$0xff] }
 0x1ac   : > { %2168 = vmatmul.mubr.msk.f32.gmra.mrb[22].mxu1 %vm817_vm3, %v2839_v22  ;;  %2322 = vmatprep.subr.bf16.mxu0 %v2321_v27  ;;  %v1244_v22 = vld [vmem:[%s3657_s3 + $0x2a8] sm:$0xff]  ;;  %v2269_v27 = vpack.c.bf16 %v1186_v15, %v1184_v16  ;;  %v2283_v15 = vpack.c.bf16 %v1197_v1, %v1195_v0  ;;  %v1217_v0 = vld [vmem:[%s3657_s3 + $0x1d0] sm:$0xff] }
 0x1ad   : > { %1152 = vmatprep.mubr.f32.mxu1 %v2596_v3  ;;  %v2329_v55 = vpack.c.bf16 %v1246_v5, %v1244_v22  ;;  %v1192_v22 = vld [vmem:[%s3657_s3 + $0x108] sm:$0xff]  ;;  %v2343_v5 = vpack.c.bf16 %v1257_v36, %v1255_v33  ;;  %v1203_v33 = vld [vmem:[%s3657_s3 + $0x160] sm:$0xff]  ;;  %v1205_v36 = vld [vmem:[%s3657_s3 + $0x170] sm:$0xff] }
 0x1ae   : > { %2252 = vmatpush1.bf16.msra.mxu1 %v2251_v47  ;;  %v1190_v47 = vld [vmem:[%s3657_s3 + $0xf8] sm:$0xff]  ;;  %v1272_v16 = vld [vmem:[%s3657_s3 + $0x388] sm:$0xff]  ;;  %v1301_v57 = vld [vmem:[%s3657_s3 + $0x470] sm:$0xff] }
 0x1af   : > { %2254 = vmatprep.subr.bf16.mxu1 %v2253_v32  ;;  %2324 = vmatpush1.bf16.msra.mxu0 %v2323_v35  ;;  %v2341_v32 = vpack.c.bf16 %v1258_v24, %v1256_v23  ;;  %v1262_v35 = vld [vmem:[%s3657_s3 + $0x338] sm:$0xff]  ;;  %v1204_v23 = vld [vmem:[%s3657_s3 + $0x168] sm:$0xff]  ;;  %v2355_v24 = vpack.c.bf16 %v1269_v13, %v1267_v11  ;;  %v1221_v11 = vld [vmem:[%s3657_s3 + $0x1f0] sm:$0xff] }
 0x1b0   : > { %2169 = vmatmul.mubr.msk.f32.gmra.mrb[24].mxu1 %vm817_vm3, %v2851_v29  ;;  %2326 = vmatprep.subr.bf16.mxu0 %v2325_v40  ;;  %v1250_v29 = vld [vmem:[%s3657_s3 + $0x2d8] sm:$0xff]  ;;  %v2273_v40 = vpack.c.bf16 %v1190_v47, %v1188_v39  ;;  %v1276_v39 = vld [vmem:[%s3657_s3 + $0x3a8] sm:$0xff]  ;;  %v2287_v47 = vpack.c.bf16 %v1201_v21, %v1199_v20 }
 0x1b1   : > { %v2333_v9 = vpack.c.bf16 %v1250_v29, %v1248_v48  ;;  %v1196_v48 = vld [vmem:[%s3657_s3 + $0x128] sm:$0xff]  ;;  %v2347_v29 = vpack.c.bf16 %v1261_v6, %v1259_v49  ;;  %v1207_v49 = vld [vmem:[%s3657_s3 + $0x180] sm:$0xff]  ;;  %v1209_v6 = vld [vmem:[%s3657_s3 + $0x190] sm:$0xff] }
 0x1b2   : > { %2256 = vmatpush1.bf16.msra.mxu1 %v2255_v44  ;;  %v1194_v44 = vld [vmem:[%s3657_s3 + $0x118] sm:$0xff]  ;;  %v1216_v60 = vld [vmem:[%s3657_s3 + $0x1c8] sm:$0xff] }
 0x1b3   : > { %2258 = vmatprep.subr.bf16.mxu1 %v2257_v45  ;;  %2328 = vmatpush1.bf16.msra.mxu0 %v2327_v54  ;;  %v2345_v45 = vpack.c.bf16 %v1262_v35, %v1260_v38  ;;  %v1266_v54 = vld [vmem:[%s3657_s3 + $0x358] sm:$0xff]  ;;  %v1208_v38 = vld [vmem:[%s3657_s3 + $0x188] sm:$0xff]  ;;  %v2359_v35 = vpack.c.bf16 %v1273_v52, %v1271_v26 }
 0x1b4   : > { %2330 = vmatprep.subr.bf16.mxu0 %v2329_v55  ;;  %v2277_v55 = vpack.c.bf16 %v1194_v44, %v1192_v22  ;;  %v1280_v22 = vld [vmem:[%s3657_s3 + $0x3c8] sm:$0xff]  ;;  %v2291_v44 = vpack.c.bf16 %v1205_v36, %v1203_v33 }
 0x1b5   : > { %v1220_v1 = vld [vmem:[%s3657_s3 + $0x1e8] sm:$0xff] }
 0x1b6   : > { %2260 = vmatpush1.bf16.msra.mxu1 %v2259_v53  ;;  %v1198_v53 = vld [vmem:[%s3657_s3 + $0x138] sm:$0xff]  ;;  %v1284_v13 = vld [vmem:[%s3657_s3 + $0x3e8] sm:$0xff] }
 0x1b7   : > { %2262 = vmatprep.subr.bf16.mxu1 %v2261_v58  ;;  %2332 = vmatpush1.bf16.msra.mxu0 %v2331_v61  ;;  %v2349_v58 = vpack.c.bf16 %v1266_v54, %v1264_v51  ;;  %v1270_v61 = vld [vmem:[%s3657_s3 + $0x378] sm:$0xff]  ;;  %v1212_v51 = vld [vmem:[%s3657_s3 + $0x1a8] sm:$0xff]  ;;  %v2363_v54 = vpack.c.bf16 %v1277_v42, %v1275_v41 }
 0x1b8   : > { %2334 = vmatprep.subr.bf16.mxu0 %v2333_v9  ;;  %v2281_v9 = vpack.c.bf16 %v1198_v53, %v1196_v48  ;;  %v2295_v48 = vpack.c.bf16 %v1209_v6, %v1207_v49  ;;  %v1211_v53 = vld [vmem:[%s3657_s3 + $0x1a0] sm:$0xff]  ;;  %v1298_v41 = vld [vmem:[%s3657_s3 + $0x458] sm:$0xff]  ;;  %v1300_v6 = vld [vmem:[%s3657_s3 + $0x468] sm:$0xff] }
 0x1ba   : > { %2264 = vmatpush1.bf16.msra.mxu1 %v2263_v8  ;;  %v1202_v8 = vld [vmem:[%s3657_s3 + $0x158] sm:$0xff] }
 0x1bb   : > { %2266 = vmatprep.subr.bf16.mxu1 %v2265_v10  ;;  %2336 = vmatpush1.bf16.msra.mxu0 %v2335_v34  ;;  %v2353_v10 = vpack.c.bf16 %v1270_v61, %v1268_v12  ;;  %v1274_v34 = vld [vmem:[%s3657_s3 + $0x398] sm:$0xff] }
 0x1bc   : > { %2338 = vmatprep.subr.bf16.mxu0 %v2337_v18  ;;  %v2285_v18 = vpack.c.bf16 %v1202_v8, %v1200_v2  ;;  %v1218_v12 = vld [vmem:[%s3657_s3 + $0x1d8] sm:$0xff] }
 0x1bd   : > { %v1222_v2 = vld [vmem:[%s3657_s3 + $0x1f8] sm:$0xff] }
 0x1be   : > { %2268 = vmatpush1.bf16.msra.mxu1 %v2267_v25  ;;  %v1206_v25 = vld [vmem:[%s3657_s3 + $0x178] sm:$0xff]  ;;  %v2305_v8 = vpack.c.bf16 %v1222_v2, %v1220_v1 }
 0x1bf   : > { %2270 = vmatprep.subr.bf16.mxu1 %v2269_v27  ;;  %2340 = vmatpush1.bf16.msra.mxu0 %v2339_v31  ;;  %v2357_v27 = vpack.c.bf16 %v1274_v34, %v1272_v16  ;;  %v1278_v31 = vld [vmem:[%s3657_s3 + $0x3b8] sm:$0xff] }
 0x1c0   : > { %2342 = vmatprep.subr.bf16.mxu0 %v2341_v32  ;;  %v2289_v32 = vpack.c.bf16 %v1206_v25, %v1204_v23  ;;  %v1286_v16 = vld [vmem:[%s3657_s3 + $0x3f8] sm:$0xff]  ;;  %v1288_v23 = vld [vmem:[%s3657_s3 + $0x408] sm:$0xff] }
 0x1c1   : > { %v2369_v34 = vpack.c.bf16 %v1286_v16, %v1284_v13  ;;  %v1309_v13 = vld [vmem:[%s3657_s3 + $0x4b0] sm:$0xff] }
 0x1c2   : > { %2272 = vmatpush1.bf16.msra.mxu1 %v2271_v37  ;;  %v1210_v37 = vld [vmem:[%s3657_s3 + $0x198] sm:$0xff] }
 0x1c3   : > { %2274 = vmatprep.subr.bf16.mxu1 %v2273_v40  ;;  %2344 = vmatpush1.bf16.msra.mxu0 %v2343_v5  ;;  %v2361_v40 = vpack.c.bf16 %v1278_v31, %v1276_v39  ;;  %v1282_v5 = vld [vmem:[%s3657_s3 + $0x3d8] sm:$0xff]  ;;  %v1287_v39 = vld [vmem:[%s3657_s3 + $0x400] sm:$0xff]  ;;  %v1289_v31 = vld [vmem:[%s3657_s3 + $0x410] sm:$0xff] }
 0x1c4   : > { %2346 = vmatprep.subr.bf16.mxu0 %v2345_v45  ;;  %v2293_v45 = vpack.c.bf16 %v1210_v37, %v1208_v38  ;;  %v2375_v33 = vpack.c.bf16 %v1289_v31, %v1287_v39  ;;  %v1293_v37 = vld [vmem:[%s3657_s3 + $0x430] sm:$0xff] }
 0x1c6   : > { %2276 = vmatpush1.bf16.msra.mxu1 %v2275_v50  ;;  %v1214_v50 = vld [vmem:[%s3657_s3 + $0x1b8] sm:$0xff] }
 0x1c7   : > { %2278 = vmatprep.subr.bf16.mxu1 %v2277_v55  ;;  %2348 = vmatpush1.bf16.msra.mxu0 %v2347_v29  ;;  %v2365_v55 = vpack.c.bf16 %v1282_v5, %v1280_v22  ;;  %v2297_v29 = vpack.c.bf16 %v1214_v50, %v1212_v51  ;;  %v1302_v51 = vld [vmem:[%s3657_s3 + $0x478] sm:$0xff] }
 0x1c8   : > { %2350 = vmatprep.subr.bf16.mxu0 %v2349_v58  ;;  %v1213_v58 = vld [vmem:[%s3657_s3 + $0x1b0] sm:$0xff] }
 0x1c9   : > { %v2299_v61 = vpack.c.bf16 %v1213_v58, %v1211_v53  ;;  %v1306_v53 = vld [vmem:[%s3657_s3 + $0x498] sm:$0xff]  ;;  %v2387_v58 = vpack.c.bf16 %v1301_v57, %v1299_v56  ;;  %v1323_v56 = vld [vmem:[%s3657_s3 + $0x520] sm:$0xff]  ;;  %v1325_v57 = vld [vmem:[%s3657_s3 + $0x530] sm:$0xff] }
 0x1ca   : > { %2280 = vmatpush1.bf16.msra.mxu1 %v2279_v62  ;;  %v2301_v62 = vpack.c.bf16 %v1218_v12, %v1216_v60  ;;  %v1303_v12 = vld [vmem:[%s3657_s3 + $0x480] sm:$0xff] }
 0x1cb   : > { %2282 = vmatprep.subr.bf16.mxu1 %v2281_v9  ;;  %2352 = vmatpush1.bf16.msra.mxu0 %v2351_v7  ;;  %v1215_v9 = vld [vmem:[%s3657_s3 + $0x1c0] sm:$0xff] }
 0x1cc   : > { %2354 = vmatprep.subr.bf16.mxu0 %v2353_v10  ;;  %v2303_v7 = vpack.c.bf16 %v1217_v0, %v1215_v9  ;;  %v1219_v10 = vld [vmem:[%s3657_s3 + $0x1e0] sm:$0xff]  ;;  %v1308_v9 = vld [vmem:[%s3657_s3 + $0x4a8] sm:$0xff]  ;;  %v1310_v0 = vld [vmem:[%s3657_s3 + $0x4b8] sm:$0xff] }
 0x1cd   : > { %v2307_v20 = vpack.c.bf16 %v1221_v11, %v1219_v10  ;;  %v2393_v10 = vpack.c.bf16 %v1310_v0, %v1308_v9  ;;  %v1307_v11 = vld [vmem:[%s3657_s3 + $0x4a0] sm:$0xff]  ;;  %v1333_v0 = vld [vmem:[%s3657_s3 + $0x570] sm:$0xff] }
 0x1ce   : > { %2284 = vmatpush1.bf16.msra.mxu1 %v2283_v15  ;;  %v1283_v15 = vld [vmem:[%s3657_s3 + $0x3e0] sm:$0xff] }
 0x1cf   : > { %2286 = vmatprep.subr.bf16.mxu1 %v2285_v18  ;;  %2356 = vmatpush1.bf16.msra.mxu0 %v2355_v24  ;;  %v1285_v18 = vld [vmem:[%s3657_s3 + $0x3f0] sm:$0xff]  ;;  %v1290_v24 = vld [vmem:[%s3657_s3 + $0x418] sm:$0xff]  ;;  %v1331_v9 = vld [vmem:[%s3657_s3 + $0x560] sm:$0xff] }
 0x1d0   : > { %2358 = vmatprep.subr.bf16.mxu0 %v2357_v27  ;;  %v2371_v21 = vpack.c.bf16 %v1285_v18, %v1283_v15  ;;  %v2373_v25 = vpack.c.bf16 %v1290_v24, %v1288_v23  ;;  %v2600_v27 = vmov 2   ;;  %v1314_v15 = vld [vmem:[%s3657_s3 + $0x4d8] sm:$0xff]  ;;  %v1311_v24 = vld [vmem:[%s3657_s3 + $0x4c0] sm:$0xff] }
 0x1d1   : > { %2530 = vset.pattern.permute.xlu1 %v2600_v27  ;;  %v1316_v27 = vld [vmem:[%s3657_s3 + $0x4e8] sm:$0xff] }
 0x1d2   : > { %2288 = vmatpush1.bf16.msra.mxu1 %v2287_v47  ;;  %1619 = vperm.xlu1 %2530, %v2721_v19   ;;  %v1292_v47 = vld [vmem:[%s3657_s3 + $0x428] sm:$0xff] }
 0x1d3   : > { %2290 = vmatprep.subr.bf16.mxu1 %v2289_v32  ;;  %2360 = vmatpush1.bf16.msra.mxu0 %v2359_v35  ;;  %v1294_v32 = vld [vmem:[%s3657_s3 + $0x438] sm:$0xff]  ;;  %v1291_v35 = vld [vmem:[%s3657_s3 + $0x420] sm:$0xff] }
 0x1d4   : > { %2362 = vmatprep.subr.bf16.mxu0 %v2361_v40  ;;  %v2377_v38 = vpack.c.bf16 %v1294_v32, %v1292_v47  ;;  %v1296_v40 = vld [vmem:[%s3657_s3 + $0x448] sm:$0xff]  ;;  %v2379_v42 = vpack.c.bf16 %v1293_v37, %v1291_v35  ;;  %v1322_v35 = vld [vmem:[%s3657_s3 + $0x518] sm:$0xff] }
 0x1d5   : > { %v2381_v5 = vpack.c.bf16 %v1298_v41, %v1296_v40 }
 0x1d6   : > { %2292 = vmatpush1.bf16.msra.mxu1 %v2291_v44  ;;  %v1295_v44 = vld [vmem:[%s3657_s3 + $0x440] sm:$0xff] }
 0x1d7   : > { %2294 = vmatprep.subr.bf16.mxu1 %v2293_v45  ;;  %2364 = vmatpush1.bf16.msra.mxu0 %v2363_v54  ;;  %v1297_v45 = vld [vmem:[%s3657_s3 + $0x450] sm:$0xff] }
 0x1d8   : > { %2366 = vmatprep.subr.bf16.mxu0 %v2365_v55  ;;  %v2383_v54 = vpack.c.bf16 %v1297_v45, %v1295_v44  ;;  %v2385_v55 = vpack.c.bf16 %v1302_v51, %v1300_v6  ;;  %v1321_v44 = vld [vmem:[%s3657_s3 + $0x510] sm:$0xff]  ;;  %v1324_v45 = vld [vmem:[%s3657_s3 + $0x528] sm:$0xff]  ;;  %v1326_v6 = vld [vmem:[%s3657_s3 + $0x538] sm:$0xff] }
 0x1da   : > { %2296 = vmatpush1.bf16.msra.mxu1 %v2295_v48 }
 0x1db   : > { %2298 = vmatprep.subr.bf16.mxu1 %v2297_v29  ;;  %2368 = vmatpush1.bf16.msra.mxu0 %v2367_v59  ;;  %v1304_v29 = vld [vmem:[%s3657_s3 + $0x488] sm:$0xff] }
 0x1dc   : > { %2370 = vmatprep.subr.bf16.mxu0 %v2369_v34  ;;  %v2389_v60 = vpack.c.bf16 %v1306_v53, %v1304_v29  ;;  %v1312_v34 = vld [vmem:[%s3657_s3 + $0x4c8] sm:$0xff]  ;;  %v2411_v29 = vpack.c.bf16 %v1325_v57, %v1323_v56 }
 0x1dd   : > { %v2397_v23 = vpack.c.bf16 %v1314_v15, %v1312_v34  ;;  %v1340_v34 = vld [vmem:[%s3657_s3 + $0x5a8] sm:$0xff]  ;;  %v1342_v15 = vld [vmem:[%s3657_s3 + $0x5b8] sm:$0xff] }
 0x1de   : > { %2300 = vmatpush1.bf16.msra.mxu1 %v2299_v61  ;;  %v1305_v61 = vld [vmem:[%s3657_s3 + $0x490] sm:$0xff] }
 0x1df   : > { %2302 = vmatprep.subr.bf16.mxu1 %v2301_v62  ;;  %2372 = vmatpush1.bf16.msra.mxu0 %v2371_v21  ;;  %v2391_v2 = vpack.c.bf16 %v1305_v61, %v1303_v12  ;;  %v1334_v12 = vld [vmem:[%s3657_s3 + $0x578] sm:$0xff] }
 0x1e0   : > { %2374 = vmatprep.subr.bf16.mxu0 %v2373_v25  ;;  %v1313_v25 = vld [vmem:[%s3657_s3 + $0x4d0] sm:$0xff] }
 0x1e1   : > { %v2399_v47 = vpack.c.bf16 %v1313_v25, %v1311_v24  ;;  %v1344_v24 = vld [vmem:[%s3657_s3 + $0x5c8] sm:$0xff]  ;;  %v1346_v25 = vld [vmem:[%s3657_s3 + $0x5d8] sm:$0xff] }
 0x1e2   : > { %2304 = vmatpush1.bf16.msra.mxu1 %v2303_v7 }
 0x1e3   : > { %2306 = vmatprep.subr.bf16.mxu1 %v2305_v8 }
 0x1e6   : > { %2308 = vmatpush1.bf16.msra.mxu1 %v2307_v20  ;;  %v2395_v20 = vpack.c.bf16 %v1309_v13, %v1307_v11  ;;  %v1335_v11 = vld [vmem:[%s3657_s3 + $0x580] sm:$0xff]  ;;  %v1337_v13 = vld [vmem:[%s3657_s3 + $0x590] sm:$0xff] }
 0x261   : > { %v893_v26 = vpop.f32.mrb[8].mxu1 }
 0x262   : > { %v895_v52 = vpop.f32.mrb[9].mxu1 }
 0x263   : > { %1415 = vmatprep.mubr.f32.mxu1 %v895_v52 }
 0x264   : > { %1416 = vmatmul.mubr.f32.vlgmr.msra.gmra.mrb[26].mxu1 %v893_v26  ;;  %v1318_v26 = vld [vmem:[%s3657_s3 + $0x4f8] sm:$0xff] }
 0x265   : > { %v899_v19 = vpop.f32.mrb[10].mxu1 }
 0x266   : > { %v901_v36 = vpop.f32.mrb[11].mxu1 }
 0x267   : > { %1504 = vmatprep.mubr.f32.mxu0 %v901_v36  ;;  %v1317_v36 = vld [vmem:[%s3657_s3 + $0x4f0] sm:$0xff] }
 0x268   : > { %1505 = vmatmul.mubr.f32.vlgmr.msra.gmra.mrb[14].mxu0 %v899_v19  ;;  %v2401_v19 = vpack.c.bf16 %v1318_v26, %v1316_v27  ;;  %v2429_v26 = vpack.c.bf16 %v1346_v25, %v1344_v24 }
 0x269   : > { %2376 = vmatpush1.bf16.msra.mxu0 %v2375_v33  ;;  %v3324_v22 = vpop.f32.mrb[12].mxu1  ;;  %v1315_v33 = vld [vmem:[%s3657_s3 + $0x4e0] sm:$0xff] }
 0x26a   : > { %2378 = vmatprep.subr.bf16.mxu0 %v2377_v38  ;;  %v3332_v49 = vpop.f32.mrb[13].mxu1  ;;  %v1320_v38 = vld [vmem:[%s3657_s3 + $0x508] sm:$0xff]  ;;  %v2403_v41 = vpack.c.bf16 %v1317_v36, %v1315_v33 }
 0x26d   : > { %2380 = vmatpush1.bf16.msra.mxu0 %v2379_v42  ;;  %v976_v50 = vpop.f32.mrb[14].mxu1  ;;  %v2405_v42 = vpack.c.bf16 %v1322_v35, %v1320_v38  ;;  %v1347_v38 = vld [vmem:[%s3657_s3 + $0x5e0] sm:$0xff]  ;;  %v1349_v35 = vld [vmem:[%s3657_s3 + $0x5f0] sm:$0xff] }
 0x26e   : > { %2382 = vmatprep.subr.bf16.mxu0 %v2381_v5  ;;  %v978_v48 = vpop.f32.mrb[15].mxu1  ;;  %v1319_v5 = vld [vmem:[%s3657_s3 + $0x500] sm:$0xff] }
 0x26f   : > { %1421 = vmatprep.mubr.f32.mxu1 %v978_v48  ;;  %v1330_v48 = vld [vmem:[%s3657_s3 + $0x558] sm:$0xff] }
 0x270   : > { %1422 = vmatmul.mubr.f32.gmra.mrb[28].mxu1 %v976_v50  ;;  %v2407_v50 = vpack.c.bf16 %v1321_v44, %v1319_v5 }
 0x271   : > { %2384 = vmatpush1.bf16.msra.mxu0 %v2383_v54  ;;  %v982_v59 = vpop.f32.mrb[16].mxu1 }
 0x272   : > { %2386 = vmatprep.subr.bf16.mxu0 %v2385_v55  ;;  %v984_v62 = vpop.f32.mrb[17].mxu1  ;;  %v2409_v55 = vpack.c.bf16 %v1326_v6, %v1324_v45 }
 0x273   : > { %1510 = vmatprep.mubr.f32.mxu0 %v984_v62 }
 0x274   : > { %v1059_v1 = vpop.f32.mrb[8].mxu0  ;;  %1511 = vmatmul.mubr.f32.gmra.mrb[16].mxu0 %v982_v59  ;;  %v1329_v59 = vld [vmem:[%s3657_s3 + $0x550] sm:$0xff] }
 0x275   : > { %2388 = vmatpush1.bf16.msra.mxu0 %v2387_v58  ;;  %v1061_v7 = vpop.f32.mrb[9].mxu0  ;;  %v3364_v8 = vpop.f32.mrb[18].mxu1  ;;  %v1327_v58 = vld [vmem:[%s3657_s3 + $0x540] sm:$0xff] }
 0x276   : > { %2390 = vmatprep.subr.bf16.mxu0 %v2389_v60  ;;  %v3372_v16 = vpop.f32.mrb[19].mxu1  ;;  %1427 = vmatprep.mubr.f32.mxu1 %v1061_v7  ;;  %v1332_v60 = vld [vmem:[%s3657_s3 + $0x568] sm:$0xff]  ;;  %v2415_v61 = vpack.c.bf16 %v1329_v59, %v1327_v58  ;;  %v2419_v7 = vpack.c.bf16 %v1333_v0, %v1331_v9 }
 0x277   : > { %1428 = vmatmul.mubr.f32.gmra.mrb[30].mxu1 %v1059_v1  ;;  %v2417_v62 = vpack.c.bf16 %v1334_v12, %v1332_v60  ;;  %v1336_v1 = vld [vmem:[%s3657_s3 + $0x588] sm:$0xff] }
 0x278   : > { %v1065_v18 = vpop.f32.mrb[10].mxu0 }
 0x279   : > { %2392 = vmatpush1.bf16.msra.mxu0 %v2391_v2  ;;  %v1067_v21 = vpop.f32.mrb[11].mxu0  ;;  %v1338_v2 = vld [vmem:[%s3657_s3 + $0x598] sm:$0xff] }
 0x27a   : > { %2394 = vmatprep.subr.bf16.mxu0 %v2393_v10  ;;  %1516 = vmatprep.mubr.f32.mxu0 %v1067_v21  ;;  %v2421_v10 = vpack.c.bf16 %v1338_v2, %v1336_v1  ;;  %v1339_v21 = vld [vmem:[%s3657_s3 + $0x5a0] sm:$0xff] }
 0x27b   : > { %v1142_v52 = vpop.f32.mrb[20].mxu1  ;;  %1517 = vmatmul.mubr.f32.gmra.mrb[18].mxu0 %v1065_v18  ;;  %v2423_v18 = vpack.c.bf16 %v1337_v13, %v1335_v11 }
 0x27c   : > { %v1144_v39 = vpop.f32.mrb[21].mxu1  ;;  %v3392_v31 = vpop.f32.mrb[12].mxu0 }
 0x27d   : > { %2396 = vmatpush1.bf16.msra.mxu0 %v2395_v20  ;;  %1433 = vmatprep.mubr.f32.mxu1 %v1144_v39  ;;  %v3394_v32 = vpop.f32.mrb[13].mxu0  ;;  %v2425_v20 = vpack.c.bf16 %v1342_v15, %v1340_v34  ;;  %v1345_v39 = vld [vmem:[%s3657_s3 + $0x5d0] sm:$0xff] }
 0x27e   : > { %2398 = vmatprep.subr.bf16.mxu0 %v2397_v23  ;;  %1434 = vmatmul.mubr.f32.gmra.mrb[32].mxu1 %v1142_v52  ;;  %v1341_v23 = vld [vmem:[%s3657_s3 + $0x5b0] sm:$0xff]  ;;  %v1343_v52 = vld [vmem:[%s3657_s3 + $0x5c0] sm:$0xff] }
 0x27f   : > { %v1148_v37 = vpop.f32.mrb[22].mxu1  ;;  %1774 = vmatprep.mubr.f32.mxu1 %v2596_v3  ;;  %v2427_v27 = vpack.c.bf16 %v1341_v23, %v1339_v21  ;;  %v2431_v33 = vpack.c.bf16 %v1345_v39, %v1343_v52  ;;  %v2601_v39 = vmov 3  }
 0x280   : > { %v1150_v40 = vpop.f32.mrb[23].mxu1  ;;  %2551 = vset.pattern.permute.xlu0 %v2601_v39 }
 0x281   : > { %2400 = vmatpush1.bf16.msra.mxu0 %v2399_v47  ;;  %1522 = vmatprep.mubr.f32.mxu0 %v1150_v40  ;;  %v1348_v47 = vld [vmem:[%s3657_s3 + $0x5e8] sm:$0xff] }
 0x282   : > { %2402 = vmatprep.subr.bf16.mxu0 %v2401_v19  ;;  %1523 = vmatmul.mubr.f32.gmra.mrb[20].mxu0 %v1148_v37  ;;  %v1350_v19 = vld [vmem:[%s3657_s3 + $0x5f8] sm:$0xff]  ;;  %v2435_v37 = vpack.c.bf16 %v1349_v35, %v1347_v38 }
 0x283   : > { %1593 = vmatprep.mubr.f32.mxu0 %v3332_v49  ;;  %v3422_v51 = vpop.f32.mrb[24].mxu1  ;;  %v1328_v49 = vld [vmem:[%s3657_s3 + $0x548] sm:$0xff]  ;;  %v2433_v36 = vpack.c.bf16 %v1350_v19, %v1348_v47 }
 0x284   : > { %v3424_v54 = vpop.f32.mrb[25].mxu1  ;;  %v2413_v53 = vpack.c.bf16 %v1330_v48, %v1328_v49 }
 0x285   : > { %2404 = vmatpush1.bf16.msra.mxu0 %v2403_v41 }
 0x286   : > { %2406 = vmatprep.subr.bf16.mxu0 %v2405_v42 }
 0x289   : > { %2408 = vmatpush1.bf16.msra.mxu0 %v2407_v50 }
 0x28a   : > { %2410 = vmatprep.subr.bf16.mxu0 %v2409_v55 }
 0x28d   : > { %2412 = vmatpush1.bf16.msra.mxu0 %v2411_v29 }
 0x28e   : > { %2414 = vmatprep.subr.bf16.mxu0 %v2413_v53 }
 0x291   : > { %2416 = vmatpush1.bf16.msra.mxu0 %v2415_v61 }
 0x292   : > { %2418 = vmatprep.subr.bf16.mxu0 %v2417_v62 }
 0x295   : > { %2420 = vmatpush1.bf16.msra.mxu0 %v2419_v7 }
 0x296   : > { %2422 = vmatprep.subr.bf16.mxu0 %v2421_v10 }
 0x299   : > { %2424 = vmatpush1.bf16.msra.mxu0 %v2423_v18 }
 0x29a   : > { %2426 = vmatprep.subr.bf16.mxu0 %v2425_v20 }
 0x29d   : > { %2428 = vmatpush1.bf16.msra.mxu0 %v2427_v27 }
 0x29e   : > { %2430 = vmatprep.subr.bf16.mxu0 %v2429_v26 }
 0x2a1   : > { %2432 = vmatpush1.bf16.msra.mxu0 %v2431_v33 }
 0x2a2   : > { %2434 = vmatprep.subr.bf16.mxu0 %v2433_v36 }
 0x2a5   : > { %2436 = vmatpush1.bf16.msra.mxu0 %v2435_v37 }
 0x2a8   : > { %1594 = vmatmul.mubr.f32.vlgmr.msra.gmra.mrb[14].mxu0 %v3324_v22 }
 0x2a9   : > { %1599 = vmatprep.mubr.f32.mxu0 %v3372_v16  ;;  %v1620_v16 = vpop.permute.xlu1 %1619 }
 0x2ac   : > { %1600 = vmatmul.mubr.f32.gmra.mrb[16].mxu0 %v3364_v8 }
 0x2ad   : > { %1605 = vmatprep.mubr.f32.mxu0 %v3394_v32 }
 0x2b0   : > { %1606 = vmatmul.mubr.f32.gmra.mrb[18].mxu0 %v3392_v31 }
 0x2b1   : > { %1611 = vmatprep.mubr.f32.mxu0 %v3424_v54 }
 0x2b4   : > { %1612 = vmatmul.mubr.f32.gmra.mrb[20].mxu0 %v3422_v51 }
 0x337   : > { %v1417_v40 = vpop.f32.mrb[26].mxu1 }
 0x338   : > { %v1419_v41 = vpop.f32.mrb[27].mxu1 }
 0x343   : > { %v1423_v42 = vpop.f32.mrb[28].mxu1 }
 0x344   : > { %v1425_v5 = vpop.f32.mrb[29].mxu1 }
 0x34a   : > { %v1429_v44 = vpop.f32.mrb[30].mxu1 }
 0x34b   : > { %v1431_v45 = vpop.f32.mrb[31].mxu1 }
 0x351   : > { %v1435_v6 = vpop.f32.mrb[32].mxu1 }
 0x352   : > { %v1437_v22 = vpop.f32.mrb[33].mxu1 }
 0x37b   : > { %v1595_v50 = vpop.f32.mrb[14].mxu0 }
 0x37c   : > { %v2469_v55 = vadd.f32 %v1595_v50, %v1417_v40  ;;  %v1597_v8 = vpop.f32.mrb[15].mxu0 }
 0x37d   : > { %v2470_v56 = vadd.f32 %v1597_v8, %v1419_v41 }
 0x37e   : > { %v1622_v32 = vadd.f32 %v2469_v55, %v1620_v16 }
 0x37f   : > { %v1601_v57 = vpop.f32.mrb[16].mxu0  ;;  %v1623_v31 = vadd.f32 %v2470_v56, %v1620_v16 }
 0x380   : > { %v2471_v49 = vadd.f32 %v1601_v57, %v1423_v42  ;;  %v1603_v54 = vpop.f32.mrb[17].mxu0  ;;  %v1630_v51 = vadd.f32 %v1622_v32, %v2819_v14  ;;  %v1702_v32 = vld [vmem:[%s3658_s4] sm:$0xff] }
 0x381   : > { %v2472_v48 = vadd.f32 %v1603_v54, %v1425_v5  ;;  %v1631_v29 = vadd.f32 %v1623_v31, %v2821_v17 }
 0x382   : > { %v1624_v53 = vadd.f32 %v2471_v49, %v1620_v16  ;;  %v1638_v58 = vmax.f32 %v1630_v51, 0.0 }
 0x383   : > { %v1625_v59 = vadd.f32 %v2472_v48, %v1620_v16  ;;  %v1607_v60 = vpop.f32.mrb[18].mxu0  ;;  %v1639_v12 = vmax.f32 %v1631_v29, 0.0 }
 0x384   : > { %v1632_v61 = vadd.f32 %v1624_v53, %v2845_v28  ;;  %v2473_v62 = vadd.f32 %v1607_v60, %v1429_v44  ;;  %v1609_v9 = vpop.f32.mrb[19].mxu0  ;;  %1678 = vrot.lane.b32.xlu0 %v1638_v58, %s2595_s12 }
 0x385   : > { %v1633_v0 = vadd.f32 %v1625_v59, %v2853_v30  ;;  %v2474_v1 = vadd.f32 %v1609_v9, %v1431_v45  ;;  %v2531_v2 = vpack.i.bf16 %v1639_v12, %v1638_v58  ;;  %v2602_v9 = vmov 0.0|0.0  }
 0x386   : > { %v1640_v7 = vmax.f32 %v1632_v61, 0.0  ;;  %v1626_v14 = vadd.f32 %v2473_v62, %v1620_v16  ;;  %v1927_v61 = vld [vmem:[%s3661_s7 + $0x8] sm:$0xff] }
 0x387   : > { %v1641_v10 = vmax.f32 %v1633_v0, 0.0  ;;  %v1627_v11 = vadd.f32 %v2474_v1, %v1620_v16  ;;  %v1613_v17 = vpop.f32.mrb[20].mxu0  ;;  %2532 = vrot.lane.b32.xlu1 %v2531_v2, %s2597_s13  ;;  %v1928_v0 = vld [vmem:[%s3661_s7 + $0x10] sm:$0xff]  ;;  %v1929_v1 = vld [vmem:[%s3661_s7 + $0x18] sm:$0xff] }
 0x388   : > { %v2475_v13 = vadd.f32 %v1613_v17, %v1435_v6  ;;  %v1615_v34 = vpop.f32.mrb[21].mxu0  ;;  %v1634_v15 = vadd.f32 %v1626_v14, %v2875_v43  ;;  %v2449_v2 = vpack.c.bf16 %v1929_v1, %v1928_v0  ;;  %v1931_v14 = vld [vmem:[%s3661_s7 + $0x28] sm:$0xff]  ;;  %v1933_v17 = vld [vmem:[%s3661_s7 + $0x38] sm:$0xff] }
 0x389   : > { %v1635_v28 = vadd.f32 %v1627_v11, %v2885_v46  ;;  %v2476_v18 = vadd.f32 %v1615_v34, %v1437_v22  ;;  %v2536_v20 = vpack.i.bf16 %v1641_v10, %v1640_v7  ;;  %v1932_v11 = vld [vmem:[%s3661_s7 + $0x30] sm:$0xff]  ;;  %v1934_v34 = vld [vmem:[%s3661_s7 + $0x40] sm:$0xff] }
 0x38a   : > { %v1628_v21 = vadd.f32 %v2475_v13, %v1620_v16  ;;  %v1642_v24 = vmax.f32 %v1634_v15, 0.0  ;;  %v2455_v13 = vpack.c.bf16 %v1933_v17, %v1932_v11  ;;  %v1935_v15 = vld [vmem:[%s3661_s7 + $0x48] sm:$0xff] }
 0x38b   : > { %v1629_v23 = vadd.f32 %v2476_v18, %v1620_v16  ;;  %1680 = vrot.lane.b32.xlu1 %v1639_v12, %s2595_s12  ;;  %2537 = vrot.lane.b32.xlu0 %v2536_v20, %s2597_s13  ;;  %v1643_v25 = vmax.f32 %v1635_v28, 0.0  ;;  %v1926_v12 = vld [vmem:[%s3661_s7] sm:$0xff]  ;;  %v2458_v28 = vpack.c.bf16 %v1935_v15, %v1934_v34  ;;  %v1936_v18 = vld [vmem:[%s3661_s7 + $0x50] sm:$0xff] }
 0x38c   : > { %v1636_v30 = vadd.f32 %v1628_v21, %v2925_v63  ;;  %v2586_v63 = vld [vmem:[%s3659_s5] sm:$0xff]  ;;  %v2446_v62 = vpack.c.bf16 %v1927_v61, %v1926_v12  ;;  %v1937_v20 = vld [vmem:[%s3661_s7 + $0x58] sm:$0xff] }
 0x38d   : > { %v1637_v27 = vadd.f32 %v1629_v23, %v2937_v4  ;;  %v2541_v43 = vpack.i.bf16 %v1643_v25, %v1642_v24  ;;  %v2461_v21 = vpack.c.bf16 %v1937_v20, %v1936_v18  ;;  %v1938_v23 = vld [vmem:[%s3661_s7 + $0x60] sm:$0xff] }
 0x38e   : > { %v1644_v26 = vmax.f32 %v1636_v30, 0.0  ;;  %v1939_v30 = vld [vmem:[%s3661_s7 + $0x68] sm:$0xff] }
 0x38f   : > { %v1645_v52 = vmax.f32 %v1637_v27, 0.0  ;;  %1684 = vrot.lane.b32.xlu1 %v1640_v7, %s2595_s12  ;;  %1686 = vrot.lane.b32.xlu0 %v1641_v10, %s2595_s12  ;;  %v1941_v27 = vld [vmem:[%s3661_s7 + $0x78] sm:$0xff] }
 0x391   : > { %v2546_v46 = vpack.i.bf16 %v1645_v52, %v1644_v26 }
 0x393   : > { %2542 = vrot.lane.b32.xlu1 %v2541_v43, %s2597_s13  ;;  %2547 = vrot.lane.b32.xlu0 %v2546_v46, %s2597_s13  ;;  %s310_s13 = scalar_lea.vmem %s3662_s8, %s2140_s11 }
 0x397   : > { %1698 = vrot.lane.b32.xlu1 %v1645_v52, %s2595_s12  ;;  %1696 = vrot.lane.b32.xlu0 %v1644_v26, %s2595_s12 }
 0x39b   : > { %1692 = vrot.lane.b32.xlu1 %v1643_v25, %s2595_s12  ;;  %1690 = vrot.lane.b32.xlu0 %v1642_v24, %s2595_s12  ;;  %v1940_v25 = vld [vmem:[%s3661_s7 + $0x70] sm:$0xff] }
 0x39f   : > { %1704 = vperm.xlu0 %2551, %v2586_v63  }
 0x3f6   : > { %v1679_v4 = vpop.permute.xlu0 %1678 }
 0x3f9   : > { %v2533_v47 = vpop.permute.xlu1 %2532 }
 0x3fa   : > { %v2535_v19 = vunpack.i.h.bf16 %v2533_v47  ;;  %v2534_v33 = vunpack.i.l.bf16 %v2533_v47 }
 0x3fc   : > { %v1652_v40 = vsel %vm340_vm0, %v2534_v33, %v2535_v19 }
 0x3fd   : > { %v1681_v36 = vpop.permute.xlu1 %1680  ;;  %v2538_v38 = vpop.permute.xlu0 %2537  ;;  %v2439_v45 = vpack.c.bf16 %v1652_v40, %v1638_v58 }
 0x3fe   : > { %v2540_v35 = vunpack.i.h.bf16 %v2538_v38  ;;  %v2539_v37 = vunpack.i.l.bf16 %v2538_v38  ;;  %v3544_v57 = vsel %vm390_vm1, %v1679_v4, %v1681_v36 }
 0x400   : > { %v1660_v41 = vsel %vm340_vm0, %v2539_v37, %v2540_v35 }
 0x401   : > { %v1685_v42 = vpop.permute.xlu1 %1684  ;;  %v1687_v5 = vpop.permute.xlu0 %1686  ;;  %v2437_v44 = vpack.c.bf16 %v1660_v41, %v1640_v7  ;;  %v1930_v7 = vld [vmem:[%s3661_s7 + $0x20] sm:$0xff] }
 0x402   : > { %v3537_v6 = vsel %vm390_vm1, %v1685_v42, %v1687_v5  ;;  %v2452_v10 = vpack.c.bf16 %v1931_v14, %v1930_v7 }
 0x403   : > { %2438 = vmatprep.subr.bf16.mxu1 %v2437_v44 }
 0x404   : > { %2440 = vmatpush1.bf16.msra.mxu1 %v2439_v45 }
 0x405   : > { %1714 = vmatprep.subr.mxu1 %v3537_v6  ;;  %v2543_v22 = vpop.permute.xlu1 %2542  ;;  %v2548_v50 = vpop.permute.xlu0 %2547 }
 0x406   : > { %v2545_v16 = vunpack.i.h.bf16 %v2543_v22  ;;  %v2544_v55 = vunpack.i.l.bf16 %v2543_v22  ;;  %v2550_v8 = vunpack.i.h.bf16 %v2548_v50  ;;  %v2549_v56 = vunpack.i.l.bf16 %v2548_v50 }
 0x408   : > { %v1668_v31 = vsel %vm340_vm0, %v2544_v55, %v2545_v16  ;;  %1715 = vmatpush1.msra.mxu1 %v3544_v57  ;;  %v1676_v49 = vsel %vm340_vm0, %v2549_v56, %v2550_v8 }
 0x409   : > { %v2443_v54 = vpack.c.bf16 %v1668_v31, %v1642_v24  ;;  %2170 = vmatmul.mubr.msk.f32.vlgmr.msra.gmra.mrb[34].mxu1 %vm435_vm2, %v1702_v32  ;;  %v1699_v51 = vpop.permute.xlu1 %1698  ;;  %v1697_v48 = vpop.permute.xlu0 %1696  ;;  %v2441_v29 = vpack.c.bf16 %v1676_v49, %v1644_v26  ;;  %v2464_v24 = vpack.c.bf16 %v1939_v30, %v1938_v23  ;;  %v2467_v26 = vpack.c.bf16 %v1941_v27, %v1940_v25 }
 0x40a   : > { %1845 = vmatprep.mubr.f32.mxu1 %v2596_v3  ;;  %v3552_v53 = vsel %vm390_vm1, %v1697_v48, %v1699_v51 }
 0x40b   : > { %2442 = vmatprep.subr.bf16.mxu1 %v2441_v29 }
 0x40c   : > { %2444 = vmatpush1.bf16.msra.mxu1 %v2443_v54 }
 0x40d   : > { %v1693_v58 = vpop.permute.xlu1 %1692  ;;  %v1691_v59 = vpop.permute.xlu0 %1690  ;;  %1785 = vmatprep.subr.mxu1 %v3552_v53 }
 0x40e   : > { %v3556_v60 = vsel %vm390_vm1, %v1691_v59, %v1693_v58 }
 0x410   : > { %1786 = vmatpush1.msra.mxu1 %v3556_v60 }
 0x411   : > { %2171 = vmatmul.mubr.msk.f32.vlgmr.msra.gmra.mrb[36].mxu1 %vm435_vm2, %v1702_v32  ;;  %2445 = vmatprep.subr.bf16.mxu1 %v2602_v9 }
 0x412   : > { %2447 = vmatpush3.bf16.msra.mxu1 %v2446_v62  ;;  %2226 = vmatprep.mubr.msk.f32.mxu1 %vm2603_vm4, %v2596_v3 }
 0x413   : > { %2448 = vmatprep.subr.bf16.mxu1 %v2602_v9 }
 0x416   : > { %2450 = vmatpush3.bf16.msra.mxu1 %v2449_v2 }
 0x417   : > { %2451 = vmatprep.subr.bf16.mxu1 %v2602_v9 }
 0x41a   : > { %2453 = vmatpush3.bf16.msra.mxu1 %v2452_v10 }
 0x41b   : > { %2454 = vmatprep.subr.bf16.mxu1 %v2602_v9 }
 0x41e   : > { %2456 = vmatpush3.bf16.msra.mxu1 %v2455_v13  ;;  %v1705_v52 = vpop.permute.xlu0 %1704 }
 0x41f   : > { %2457 = vmatprep.subr.bf16.mxu1 %v2602_v9 }
 0x422   : > { %2459 = vmatpush3.bf16.msra.mxu1 %v2458_v28 }
 0x423   : > { %2460 = vmatprep.subr.bf16.mxu1 %v2602_v9 }
 0x426   : > { %2462 = vmatpush3.bf16.msra.mxu1 %v2461_v21 }
 0x427   : > { %2463 = vmatprep.subr.bf16.mxu1 %v2602_v9 }
 0x42a   : > { %2465 = vmatpush3.bf16.msra.mxu1 %v2464_v24 }
 0x42b   : > { %2466 = vmatprep.subr.bf16.mxu1 %v2602_v9 }
 0x42e   : > { %2468 = vmatpush3.bf16.msra.mxu1 %v2467_v26 }
 0x4dc   : > { %v1776_v43 = vpop.f32.mrb[34].mxu1 }
 0x4dd   : > { %v1777_v46 = vadd.f32 %v1776_v43, %v1705_v52  ;;  %v1778_v39 = vpop.f32.mrb[35].mxu1 }
 0x4de   : > { %v1779_v63 = vadd.f32 %v1778_v39, %v1705_v52 }
 0x4df   : > { %v1852_v4 = vadd.f32 %v1777_v46, %v3544_v57 }
 0x4e0   : > { %v1853_v47 = vadd.f32 %v1779_v63, %v3537_v6 }
 0x4e1   : > { %v3611_v19 = vmax.f32 %v1852_v4, 0.0 }
 0x4e2   : > { %v3613_v33 = vmax.f32 %v1853_v47, 0.0 }
 0x4e3   : > { %v1860_v36 = vrot.slane %v3611_v19, 4  ;;  %v1884_v38 = vmul.f32 %v3611_v19, %v3611_v19 }
 0x4e4   : > { %v1866_v3 = vrot.slane %v3613_v33, 4  ;;  %v1885_v35 = vmul.f32 %v3613_v33, %v3613_v33  ;;  %v1847_v37 = vpop.f32.mrb[36].mxu1 }
 0x4e5   : > { %v1861_v40 = vadd.f32 %v1860_v36, %v3611_v19  ;;  %v1888_v41 = vrot.slane %v1884_v38, 4  ;;  %v1848_v42 = vadd.f32 %v1847_v37, %v1705_v52  ;;  %v1849_v5 = vpop.f32.mrb[37].mxu1 }
 0x4e6   : > { %v1867_v44 = vadd.f32 %v1866_v3, %v3613_v33  ;;  %v1894_v45 = vrot.slane %v1885_v35, 4  ;;  %v1850_v6 = vadd.f32 %v1849_v5, %v1705_v52 }
 0x4e7   : > { %v1862_v22 = vrot.slane %v1861_v40, 2  ;;  %v1889_v50 = vadd.f32 %v1888_v41, %v1884_v38  ;;  %v1854_v16 = vadd.f32 %v1848_v42, %v3556_v60 }
 0x4e8   : > { %v1868_v55 = vrot.slane %v1867_v44, 2  ;;  %v1895_v8 = vadd.f32 %v1894_v45, %v1885_v35  ;;  %v1855_v56 = vadd.f32 %v1850_v6, %v3552_v53 }
 0x4e9   : > { %v3625_v32 = vmax.f32 %v1854_v16, 0.0  ;;  %v1863_v57 = vadd.f32 %v1862_v22, %v1861_v40  ;;  %v1890_v54 = vrot.slane %v1889_v50, 2 }
 0x4ea   : > { %v1869_v31 = vadd.f32 %v1868_v55, %v1867_v44  ;;  %v3627_v49 = vmax.f32 %v1855_v56, 0.0  ;;  %v1896_v29 = vrot.slane %v1895_v8, 2  ;;  %v2021_v44 = vlaneseq }
 0x4eb   : > { %v1872_v51 = vrot.slane %v3625_v32, 4  ;;  %v1886_v48 = vmul.f32 %v3625_v32, %v3625_v32  ;;  %v1864_v12 = vrot.slane %v1863_v57, 1  ;;  %v1891_v2 = vadd.f32 %v1890_v54, %v1889_v50 }
 0x4ec   : > { %v1878_v58 = vrot.slane %v3627_v49, 4  ;;  %v1887_v59 = vmul.f32 %v3627_v49, %v3627_v49  ;;  %v1870_v61 = vrot.slane %v1869_v31, 1  ;;  %v1897_v14 = vadd.f32 %v1896_v29, %v1895_v8 }
 0x4ed   : > { %v1873_v53 = vadd.f32 %v1872_v51, %v3625_v32  ;;  %v1900_v60 = vrot.slane %v1886_v48, 4  ;;  %v1865_v13 = vadd.f32 %v1864_v12, %v1863_v57  ;;  %v1892_v20 = vrot.slane %v1891_v2, 1 }
 0x4ee   : > { %v1879_v62 = vadd.f32 %v1878_v58, %v3627_v49  ;;  %v1906_v9 = vrot.slane %v1887_v59, 4  ;;  %v1871_v34 = vadd.f32 %v1870_v61, %v1869_v31  ;;  %v1898_v30 = vrot.slane %v1897_v14, 1 }
 0x4ef   : > { %v1874_v0 = vrot.slane %v1873_v53, 2  ;;  %v1901_v1 = vadd.f32 %v1900_v60, %v1886_v48  ;;  %v1893_v46 = vadd.f32 %v1892_v20, %v1891_v2  ;;  %v2022_v22 = vshrl.u32 %v2021_v44, 7  ;;  %v2012_v2 = vld [vmem:[%s3660_s6] sm:$0xff] }
 0x4f0   : > { %v1880_v7 = vrot.slane %v1879_v62, 2  ;;  %v1907_v10 = vadd.f32 %v1906_v9, %v1887_v59  ;;  %v1913_v43 = vsel %vm1912_vm5, %v1865_v13, %v1871_v34  ;;  %v1899_v63 = vadd.f32 %v1898_v30, %v1897_v14 }
 0x4f1   : > { %v1875_v11 = vadd.f32 %v1874_v0, %v1873_v53  ;;  %v1902_v17 = vrot.slane %v1901_v1, 2  ;;  %v2023_v50 = vsub.s32 0, %v2022_v22  ;;  %v2036_v16 = vsub.s32 1, %v2022_v22 }
 0x4f2   : > { %v1881_v15 = vadd.f32 %v1880_v7, %v1879_v62  ;;  %v1908_v28 = vrot.slane %v1907_v10, 2  ;;  %v2050_v55 = vsub.s32 2, %v2022_v22  ;;  %v2064_v8 = vsub.s32 3, %v2022_v22 }
 0x4f3   : > { %v1876_v18 = vrot.slane %v1875_v11, 1  ;;  %v1903_v21 = vadd.f32 %v1902_v17, %v1901_v1  ;;  %v2028_v51 = vsub.s32 4, %v2022_v22  ;;  %v2041_v48 = vsub.s32 5, %v2022_v22 }
 0x4f4   : > { %v1882_v23 = vrot.slane %v1881_v15, 1  ;;  %v1909_v24 = vadd.f32 %v1908_v28, %v1907_v10  ;;  %v2055_v29 = vsub.s32 6, %v2022_v22  ;;  %v2069_v58 = vsub.s32 7, %v2022_v22 }
 0x4f5   : > { %v1877_v25 = vadd.f32 %v1876_v18, %v1875_v11  ;;  %v1904_v27 = vrot.slane %v1903_v21, 1 }
 0x4f6   : > { %v1883_v26 = vadd.f32 %v1882_v23, %v1881_v15  ;;  %v1910_v52 = vrot.slane %v1909_v24, 1 }
 0x4f7   : > { %v1915_v39 = vsel %vm1914_vm6, %v1913_v43, %v1877_v25  ;;  %v1905_v47 = vadd.f32 %v1904_v27, %v1903_v21 }
 0x4f8   : > { %v1917_v4 = vsel %vm1916_vm7, %v1915_v39, %v1883_v26  ;;  %v1911_v38 = vadd.f32 %v1910_v52, %v1909_v24 }
 0x4f9   : > { %v1919_v36 = vsel %vm1918_vm8, %v1917_v4, %v1893_v46 }
 0x4fa   : > { %v1921_v3 = vsel %vm1920_vm9, %v1919_v36, %v1899_v63 }
 0x4fb   : > { %v1923_v35 = vsel %vm1922_vm10, %v1921_v3, %v1905_v47 }
 0x4fc   : > { %v1925_v37 = vsel %vm1924_vm11, %v1923_v35, %v1911_v38 }
 0x4fd   : > { %2227 = vmatmul.mubr.f32.vlgmr.msra.gmra.mrb[38].mxu1 %v1925_v37 }
 0x5d0   : > { %v2008_v40 = vpop.f32.mrb[38].mxu1 }
 0x5d1   : > { %v2014_v41 = vmul.f32 %v2008_v40, %v2008_v40  ;;  %v2228_v42 = vpop.f32.mrb[39].mxu1  ;;  %v2024_v56 = vrot.slane %v2008_v40, %v2023_v50  ;;  %v2037_v57 = vrot.slane %v2008_v40, %v2036_v16  ;;  %v2051_v31 = vrot.slane %v2008_v40, %v2050_v55 }
 0x5d2   : > { %v2065_v54 = vrot.slane %v2008_v40, %v2064_v8 }
 0x5d3   : > { %v2016_v5 = vrot.slane %v2014_v41, 4  ;;  %v2025_v53 = vsub.f32 %v3611_v19, %v2024_v56  ;;  %v2038_v60 = vsub.f32 %v3613_v33, %v2037_v57  ;;  %v2052_v12 = vsub.f32 %v3625_v32, %v2051_v31  ;;  %v2013_v19 = vld [vmem:[%s3660_s6 + $0x8] sm:$0xff] }
 0x5d4   : > { %v2066_v61 = vsub.f32 %v3627_v49, %v2065_v54 }
 0x5d5   : > { %v2018_v45 = vsub.f32 %v2008_v40, %v2016_v5 }
 0x5d7   : > { %v2019_v6 = vadd.f32 1e-05, %v2018_v45 }
 0x5d9   : > { %2584 = vrsqrt.f32 %v2019_v6 }
 0x5e3   : > { %v2585_v59 = vpop.eup %2584 }
 0x5e4   : > { %v2029_v62 = vrot.slane %v2585_v59, %v2028_v51  ;;  %v2042_v9 = vrot.slane %v2585_v59, %v2041_v48  ;;  %v2056_v0 = vrot.slane %v2585_v59, %v2055_v29  ;;  %v2070_v1 = vrot.slane %v2585_v59, %v2069_v58 }
 0x5e6   : > { %v2030_v7 = vmul.f32 %v2029_v62, %v2025_v53  ;;  %v2043_v14 = vmul.f32 %v2042_v9, %v2038_v60  ;;  %v2057_v10 = vmul.f32 %v2056_v0, %v2052_v12  ;;  %v2071_v11 = vmul.f32 %v2070_v1, %v2066_v61 }
 0x5e8   : > { %v2031_v33 = vmul.f32 %v2030_v7, %v2012_v2  ;;  %v2044_v32 = vmul.f32 %v2043_v14, %v2012_v2  ;;  %v2058_v49 = vmul.f32 %v2057_v10, %v2012_v2  ;;  %v2072_v17 = vmul.f32 %v2071_v11, %v2012_v2 }
 0x5ea   : > { %v2032_v13 = vadd.f32 %v2031_v33, %v2013_v19  ;;  %v2045_v34 = vadd.f32 %v2044_v32, %v2013_v19  ;;  %v2059_v15 = vadd.f32 %v2058_v49, %v2013_v19  ;;  %v2073_v28 = vadd.f32 %v2072_v17, %v2013_v19 }
 0x5ec   : > { %2033 = vst [vmem:[%s310_s13] sm:$0xff] %v2032_v13  ;;  %2172 = vst [vmem:[%s310_s13 + $0x8] sm:$0xff] %v2045_v34 }
 0x5ed   : > { %2173 = vst [vmem:[%s310_s13 + $0x10] sm:$0xff] %v2059_v15  ;;  %2174 = vst [vmem:[%s310_s13 + $0x18] sm:$0xff] %v2073_v28 }
 0x5ee PF: > { %s18_s27 = sadd.s32 1, %s2593_s27  }
 0x5ef   : > { %p15_p4 = scmp.ge.s32.totalorder %s18_s27, 4  }
 0x5f1   :  { %17 = sbr.rel (!%p15_p4) target bundleno = 1 (0x1), region = 88 }

</bundles_post_ra>
